<compile_context>
chip_gen: v7x
topology: tpu7x:2x2x1
jax: 0.10.0
libtpu: 0.0.40
codegen_flags: <defaults>
</compile_context>

<pallas_src>
import numpy as np
import jax
import jax.numpy as jnp
from jax.experimental import pallas as pl
from jax.experimental.pallas import tpu as pltpu

# ----- model constants (from the PyTorch module) -----
OUTC = 3          # conv out channels
KH, KW = 3, 5     # conv kernel
HID = 50          # LSTM hidden size
FEAT = 3 * 2 * 3  # flattened CNN features = 18
HP = 128          # lane-padded hidden / per-gate width
G = 4 * HP        # lane-aligned gate block (i, f, g, o each at a 128-lane boundary)
MXU_DTYPE = jnp.bfloat16   # matmul operands only; accumulation + state math stay f32
NEG_BIG = -1e30            # padding value for head-bias lanes (keeps log_softmax exact)


def _round_up(x, m):
    return ((x + m - 1) // m) * m


# =====================  parameter repacking (wrapper-side, tiny one-time ops)  =====================
def _build_cnn_weights(conv_w, conv_b, H, W, kpad):
    """Dense-matmul formulation of conv(3x5) + maxpool(2) + flatten.

    Returns:
      wcnn: (kpad, 4*HP) f32.  Column block q = dh*2+dw (2x2 pool offset) holds the conv weights
            shifted so that column (q*HP + c*6 + ph*3 + pw) computes the conv output at pooled
            cell (ph, pw), offset (dh, dw), channel c (PyTorch flatten order).  Rows >= H*W are 0.
      bcnn: (1, HP) f32 conv bias per real feature column, zero in padded lanes.
      nfeat: number of real feature columns (must equal FEAT=18).
    """
    ch, cw = H - KH + 1, W - KW + 1
    phn, pwn = ch // 2, cw // 2
    nfeat = OUTC * phn * pwn

    c, ph, pw, dh, dw, kh, kw = np.meshgrid(
        np.arange(OUTC), np.arange(phn), np.arange(pwn),
        np.arange(2), np.arange(2), np.arange(KH), np.arange(KW), indexing="ij")
    q = dh * 2 + dw
    cols = q * HP + (c * (phn * pwn) + ph * pwn + pw)
    rows = (2 * ph + dh + kh) * W + (2 * pw + dw + kw)

    vals = conv_w.astype(jnp.float32)[c.ravel(), 0, kh.ravel(), kw.ravel()]
    wcnn = jnp.zeros((kpad, G), jnp.float32).at[rows.ravel(), cols.ravel()].set(vals)
    bcnn = jnp.zeros((1, HP), jnp.float32).at[0, :nfeat].set(
        jnp.repeat(conv_b.astype(jnp.float32), phn * pwn))
    return wcnn, bcnn, nfeat


def _pack_gate_matrix(w):
    """PyTorch (4*HID, in_dim) gate weights -> (HP, G) f32 with each gate lane-aligned at g*HP."""
    in_dim = w.shape[1]
    out = jnp.zeros((HP, G), jnp.float32)
    wt = w.astype(jnp.float32)
    for g in range(4):
        out = out.at[:in_dim, g * HP:g * HP + HID].set(wt[g * HID:(g + 1) * HID, :].T)
    return out


def _pack_gate_bias(b):
    out = jnp.zeros((1, G), jnp.float32)
    bf = b.astype(jnp.float32)
    for g in range(4):
        out = out.at[0, g * HP:g * HP + HID].set(bf[g * HID:(g + 1) * HID])
    return out


# =====================  fused kernel  =====================
def _make_fused_kernel(S, BP, KPAD):
    # static row offsets inside the consolidated weight slab
    R_IH0 = KPAD              # layer-0 W_ih            (HP rows)
    R_HH0 = KPAD + HP         # layer-0 W_hh            (HP rows)
    R_W1 = KPAD + 2 * HP      # layer-1 [W_ih; W_hh]    (2*HP rows, merged K=256 matmul)
    R_HEAD = KPAD + 4 * HP    # head weight             (HP rows)

    def sig(x):
        # sigmoid(x) == 0.5*tanh(0.5*x) + 0.5 : one EUP op instead of exp + add + reciprocal
        return 0.5 * jnp.tanh(0.5 * x) + 0.5

    def gates_to_state(gates, c_prev):
        # lane-aligned 128-wide gate slices: pure VPU/EUP work, no cross-lane shuffles.
        # Padded lanes (HID..127) stay exactly 0 in h/c because the g-gate is tanh(0)=0 there
        # and the initial state is zero (documented: only valid for zero initial h/c).
        i = sig(gates[:, 0:HP])
        f = sig(gates[:, HP:2 * HP])
        g = jnp.tanh(gates[:, 2 * HP:3 * HP])
        o = sig(gates[:, 3 * HP:4 * HP])
        c_new = f * c_prev + i * g
        return o * jnp.tanh(c_new), c_new

    def kernel(x_ref, w_ref, b_ref, o_ref, g0_scr):
        # ---- CNN: conv-as-dense-matmul, fused 2x2 max-pool + bias + ReLU ----
        conv = jnp.dot(x_ref[...], w_ref[0:KPAD, :],
                       preferred_element_type=jnp.float32)              # (S*BP, 4*HP)
        pooled = jnp.maximum(
            jnp.maximum(conv[:, 0:HP], conv[:, HP:2 * HP]),
            jnp.maximum(conv[:, 2 * HP:3 * HP], conv[:, 3 * HP:4 * HP]))
        feat = jnp.maximum(pooled + b_ref[0:1, 0:HP], 0.0)              # (S*BP, HP) f32; lanes>=18 are 0
        # (padded batch rows pick up relu(bias) features; they are discarded by the wrapper slice)

        # ---- hoisted layer-0 input projection (+bias) for all timesteps; parked in VMEM scratch
        #      so the unrolled recurrence does not keep (S*BP, G) live in vregs ----
        g0_scr[...] = jnp.dot(feat.astype(MXU_DTYPE), w_ref[R_IH0:R_IH0 + HP, :],
                              preferred_element_type=jnp.float32) + b_ref[1:2, :]

        b1b = jnp.broadcast_to(b_ref[2:3, :], (BP, G))                  # hoisted: 1 broadcast, not S

        zeros = jnp.zeros((BP, HP), jnp.float32)
        h0 = c0 = h1 = c1 = zeros
        # statically unrolled recurrence; weights read from VMEM at point of use
        for t in range(S):
            g0 = g0_scr[pl.ds(t * BP, BP), :] + jnp.dot(
                h0.astype(MXU_DTYPE), w_ref[R_HH0:R_HH0 + HP, :],
                preferred_element_type=jnp.float32)
            h0, c0 = gates_to_state(g0, c0)
            # layer-1: merged input+recurrent matmul, K = 2*HP = 256 (one MXU pass on v6e/v7x)
            h01 = jnp.concatenate([h0, h1], axis=1).astype(MXU_DTYPE)   # (BP, 2*HP)
            g1 = b1b + jnp.dot(h01, w_ref[R_W1:R_W1 + 2 * HP, :],
                               preferred_element_type=jnp.float32)
            h1, c1 = gates_to_state(g1, c1)

        # ---- head: Linear + log_softmax on the final hidden state; lane-dense (BP, HP) store ----
        logits = jnp.dot(h1.astype(MXU_DTYPE), w_ref[R_HEAD:R_HEAD + HP, 0:HP],
                         preferred_element_type=jnp.float32) + b_ref[3:4, 0:HP]
        # padded class lanes carry bias NEG_BIG -> exp underflows to exactly 0, softmax is exact
        m = jnp.max(logits, axis=1, keepdims=True)
        s = logits - m
        lse = jnp.log(jnp.sum(jnp.exp(s), axis=1, keepdims=True))
        o_ref[...] = s - lse
    return kernel


# =====================  full forward (matches CNN_LSTM.forward, eval mode)  =====================
def cnn_lstm_forward(x, params):
    B, T, C, H, W, S = x.shape
    if T != 1 or C != 1:
        # PyTorch's r_in = c_out.view(B, S, -1) only matches the LSTM input size when T == 1.
        raise ValueError("CNN_LSTM forward requires T == 1 and C == 1")
    num_class = params["lin_w"].shape[0]
    assert HID <= HP and num_class <= HP and FEAT <= HP
    BP = _round_up(B, 8)          # pad per-step batch rows to a full sublane tile
    KPAD = _round_up(H * W, 128)  # pad conv contraction dim to a full lane tile

    # PyTorch `x.view(B*T*S, C, H, W)` on a contiguous (B,T,C,H,W,S) tensor reinterprets the raw
    # layout (the sequence dim is fastest-varying); reproduce that exactly, then go time-major
    # with the per-step batch padded to BP rows.  Row (t*BP + b) of x_pad = c_in[b*S + t].
    x_cin = x.astype(jnp.float32).reshape(B * T * S, C, H * W)[:, 0, :]   # row n = b*S + s
    x_t = jnp.transpose(x_cin.reshape(B, S, H * W), (1, 0, 2))            # (S, B, H*W)
    x_pad = jnp.zeros((S, BP, KPAD), jnp.float32).at[:, :B, :H * W].set(x_t)
    x_pad = x_pad.reshape(S * BP, KPAD).astype(MXU_DTYPE)

    # ---- consolidated weight slab: ONE HBM->VMEM DMA for all matmul weights (bf16) ----
    wcnn, bcnn, nfeat = _build_cnn_weights(params["conv_w"], params["conv_b"], H, W, KPAD)
    assert nfeat == FEAT, (nfeat, FEAT)
    wih0 = _pack_gate_matrix(params["wih0"])
    whh0 = _pack_gate_matrix(params["whh0"])
    w1 = jnp.concatenate([_pack_gate_matrix(params["wih1"]),
                          _pack_gate_matrix(params["whh1"])], axis=0)     # (2*HP, G) merged layer-1
    whead = jnp.zeros((HP, G), jnp.float32).at[:HID, :num_class].set(
        params["lin_w"].T.astype(jnp.float32))
    w_all = jnp.concatenate([wcnn, wih0, whh0, w1, whead], axis=0).astype(MXU_DTYPE)

    # ---- consolidated bias slab (f32; state math stays f32) ----
    b0 = _pack_gate_bias(params["bih0"] + params["bhh0"])
    b1 = _pack_gate_bias(params["bih1"] + params["bhh1"])
    bhead = jnp.full((HP,), NEG_BIG, jnp.float32).at[:num_class].set(
        params["lin_b"].astype(jnp.float32))
    b_all = jnp.zeros((8, G), jnp.float32)
    b_all = b_all.at[0, :HP].set(bcnn[0])   # conv bias
    b_all = b_all.at[1, :].set(b0[0])       # layer-0 gate bias
    b_all = b_all.at[2, :].set(b1[0])       # layer-1 gate bias
    b_all = b_all.at[3, :HP].set(bhead)     # head bias (padded lanes = NEG_BIG)

    kernel = _make_fused_kernel(S, BP, KPAD)
    out = pl.pallas_call(
        kernel,
        out_shape=jax.ShapeDtypeStruct((BP, HP), jnp.float32),   # lane-dense log-prob slab
        in_specs=[pl.BlockSpec(memory_space=pltpu.MemorySpace.VMEM)] * 3,
        out_specs=pl.BlockSpec(memory_space=pltpu.MemorySpace.VMEM),
        scratch_shapes=[pltpu.VMEM((S * BP, G), jnp.float32)],   # hoisted layer-0 gate projections
        compiler_params=pltpu.CompilerParams(vmem_limit_bytes=32 * 1024 * 1024),
    )(x_pad, w_all, b_all)
    # TODO(synk): for large B, add a batch grid with dimension_semantics=("parallel",) to use
    #             both v7x TensorCores; at B=2 a gridless single call is optimal.
    return out[:B, :num_class]


# =====================  deterministic parameter init  =====================
def init_params(key, num_class):
    ks = jax.random.split(key, 12)

    def u(k, shape, fan):
        bound = 1.0 / np.sqrt(fan)
        return jax.random.uniform(k, shape, jnp.float32, -bound, bound)

    return {
        "conv_w": u(ks[0], (OUTC, 1, KH, KW), 1 * KH * KW),
        "conv_b": u(ks[1], (OUTC,), 1 * KH * KW),
        "wih0": u(ks[2], (4 * HID, FEAT), HID),
        "whh0": u(ks[3], (4 * HID, HID), HID),
        "bih0": u(ks[4], (4 * HID,), HID),
        "bhh0": u(ks[5], (4 * HID,), HID),
        "wih1": u(ks[6], (4 * HID, HID), HID),
        "whh1": u(ks[7], (4 * HID, HID), HID),
        "bih1": u(ks[8], (4 * HID,), HID),
        "bhh1": u(ks[9], (4 * HID,), HID),
        "lin_w": u(ks[10], (num_class, HID), HID),
        "lin_b": u(ks[11], (num_class,), HID),
    }


# =====================  pure-JAX reference (mirrors the PyTorch forward, f32)  =====================
def reference_forward(x, p):
    B, T, C, H, W, S = x.shape
    c_in = x.reshape(B * T * S, C, H, W)        # same raw-layout reinterpretation as torch .view
    conv = jax.lax.conv_general_dilated(
        c_in, p["conv_w"], (1, 1), "VALID",
        dimension_numbers=("NCHW", "OIHW", "NCHW")) + p["conv_b"][None, :, None, None]
    pooled = jax.lax.reduce_window(conv, -jnp.inf, jax.lax.max,
                                   (1, 1, 2, 2), (1, 1, 2, 2), "VALID")
    act = jnp.maximum(pooled, 0.0)
    feat = act.reshape(c_in.shape[0], -1)
    r_in = feat.reshape(B, S, -1)

    def lstm_layer(inp, wih, whh, bih, bhh):
        h = jnp.zeros((inp.shape[0], HID), jnp.float32)
        c = jnp.zeros((inp.shape[0], HID), jnp.float32)
        outs = []
        for t in range(inp.shape[1]):
            g = inp[:, t] @ wih.T + bih + h @ whh.T + bhh
            i = jax.nn.sigmoid(g[:, :HID])
            f = jax.nn.sigmoid(g[:, HID:2 * HID])
            gg = jnp.tanh(g[:, 2 * HID:3 * HID])
            o = jax.nn.sigmoid(g[:, 3 * HID:4 * HID])
            c = f * c + i * gg
            h = o * jnp.tanh(c)
            outs.append(h)
        return jnp.stack(outs, axis=1)

    l0 = lstm_layer(r_in, p["wih0"], p["whh0"], p["bih0"], p["bhh0"])
    l1 = lstm_layer(l0, p["wih1"], p["whh1"], p["bih1"], p["bhh1"])
    logits = l1[:, -1] @ p["lin_w"].T + p["lin_b"]
    return jax.nn.log_softmax(logits, axis=1)


if __name__ == "__main__":
    B, T, C, H, W, S = 2, 1, 1, 6, 10, 8      # conv(3x5) -> (4,6); pool(2) -> (2,3); 3*2*3 = 18
    NUM_CLASS = 5

    key = jax.random.PRNGKey(0)
    x = jax.random.normal(key, (B, T, C, H, W, S), dtype=jnp.float32)
    params = init_params(jax.random.PRNGKey(42), NUM_CLASS)

    fwd = jax.jit(cnn_lstm_forward)
    out = jax.block_until_ready(fwd(x, params))

    assert out.shape == (B, NUM_CLASS), out.shape
    assert bool(jnp.all(jnp.isfinite(out)))
    # log-softmax rows exponentiate to probabilities summing to 1
    assert bool(jnp.allclose(jnp.sum(jnp.exp(out), axis=1), 1.0, atol=1e-3))
    # compare against the pure-JAX f32 reference (kernel uses bf16 MXU operands -> small drift)
    ref = jax.block_until_ready(reference_forward(x, params))
    assert bool(jnp.allclose(out, ref, atol=5e-2)), (out, ref)

    print("KERNEL_OK")
</pallas_src>

<mosaic_0001>
module attributes {stable_mosaic.version = 11 : i64} {
  func.func @kernel(%arg0: memref<64x128xbf16, #tpu.memory_space<vmem>>, %arg1: memref<768x512xbf16, #tpu.memory_space<vmem>>, %arg2: memref<8x512xf32, #tpu.memory_space<vmem>>, %arg3: memref<8x128xf32, #tpu.memory_space<vmem>>, %arg4: memref<64x512xf32, #tpu.memory_space<vmem>>) attributes {dimension_semantics = [], scalar_prefetch = 0 : i64, scratch_operands = 1 : i64, tpu.core_type = #tpu.core_type<tc>} {
    %c0 = arith.constant 0 : index
    %c0_0 = arith.constant 0 : index
    %0 = vector.load %arg0[%c0, %c0_0] : memref<64x128xbf16, #tpu.memory_space<vmem>>, vector<64x128xbf16>
    %c0_1 = arith.constant 0 : index
    %c0_2 = arith.constant 0 : index
    %1 = vector.load %arg1[%c0_1, %c0_2] : memref<768x512xbf16, #tpu.memory_space<vmem>>, vector<128x512xbf16>
    %cst = arith.constant dense<0.000000e+00> : vector<64x512xf32>
    %2 = tpu.matmul %0, %1, %cst {dimension_numbers = #tpu.dot_dimension_numbers<[1], [0], [0], [1], [0, 0, 1, 1], [], []>} : vector<64x128xbf16>, vector<128x512xbf16>, vector<64x512xf32> -> vector<64x512xf32>
    %3 = vector.extract_strided_slice %2 {offsets = [0, 0], sizes = [64, 128], strides = [1, 1]} : vector<64x512xf32> to vector<64x128xf32>
    %4 = vector.extract_strided_slice %2 {offsets = [0, 128], sizes = [64, 128], strides = [1, 1]} : vector<64x512xf32> to vector<64x128xf32>
    %5 = arith.maximumf %3, %4 : vector<64x128xf32>
    %6 = vector.extract_strided_slice %2 {offsets = [0, 256], sizes = [64, 128], strides = [1, 1]} : vector<64x512xf32> to vector<64x128xf32>
    %7 = vector.extract_strided_slice %2 {offsets = [0, 384], sizes = [64, 128], strides = [1, 1]} : vector<64x512xf32> to vector<64x128xf32>
    %8 = arith.maximumf %6, %7 : vector<64x128xf32>
    %9 = arith.maximumf %5, %8 : vector<64x128xf32>
    %c0_3 = arith.constant 0 : index
    %c0_4 = arith.constant 0 : index
    %10 = vector.load %arg2[%c0_3, %c0_4] : memref<8x512xf32, #tpu.memory_space<vmem>>, vector<1x128xf32>
    %11 = vector.broadcast %10 : vector<1x128xf32> to vector<64x128xf32>
    %12 = arith.addf %9, %11 : vector<64x128xf32>
    %cst_5 = arith.constant 0.000000e+00 : f32
    %13 = vector.broadcast %cst_5 : f32 to vector<64x128xf32>
    %14 = arith.maximumf %12, %13 : vector<64x128xf32>
    %15 = arith.truncf %14 : vector<64x128xf32> to vector<64x128xbf16>
    %c128 = arith.constant 128 : index
    %c0_6 = arith.constant 0 : index
    %16 = vector.load %arg1[%c128, %c0_6] : memref<768x512xbf16, #tpu.memory_space<vmem>>, vector<128x512xbf16>
    %cst_7 = arith.constant dense<0.000000e+00> : vector<64x512xf32>
    %17 = tpu.matmul %15, %16, %cst_7 {dimension_numbers = #tpu.dot_dimension_numbers<[1], [0], [0], [1], [0, 0, 1, 1], [], []>} : vector<64x128xbf16>, vector<128x512xbf16>, vector<64x512xf32> -> vector<64x512xf32>
    %c1 = arith.constant 1 : index
    %c0_8 = arith.constant 0 : index
    %18 = vector.load %arg2[%c1, %c0_8] : memref<8x512xf32, #tpu.memory_space<vmem>>, vector<1x512xf32>
    %19 = vector.broadcast %18 : vector<1x512xf32> to vector<64x512xf32>
    %20 = arith.addf %17, %19 : vector<64x512xf32>
    %c0_9 = arith.constant 0 : index
    %c0_10 = arith.constant 0 : index
    %21 = vector.load %arg4[%c0_9, %c0_10] : memref<64x512xf32, #tpu.memory_space<vmem>>, vector<64x512xf32>
    tpu.vector_store %arg4[%c0_9, %c0_10], %20 {strides = array<i32>} : memref<64x512xf32, #tpu.memory_space<vmem>>, vector<64x512xf32>,
    %c2 = arith.constant 2 : index
    %c0_11 = arith.constant 0 : index
    %22 = vector.load %arg2[%c2, %c0_11] : memref<8x512xf32, #tpu.memory_space<vmem>>, vector<1x512xf32>
    %23 = vector.shape_cast %22 : vector<1x512xf32> to vector<1x512xf32>
    %24 = vector.broadcast %23 : vector<1x512xf32> to vector<8x512xf32>
    %cst_12 = arith.constant 0.000000e+00 : f32
    %25 = vector.broadcast %cst_12 : f32 to vector<8x128xf32>
    %c0_13 = arith.constant 0 : index
    %c0_14 = arith.constant 0 : index
    %26 = vector.load %arg4[%c0_13, %c0_14] : memref<64x512xf32, #tpu.memory_space<vmem>>, vector<8x512xf32>
    %27 = arith.truncf %25 : vector<8x128xf32> to vector<8x128xbf16>
    %c256 = arith.constant 256 : index
    %c0_15 = arith.constant 0 : index
    %28 = vector.load %arg1[%c256, %c0_15] : memref<768x512xbf16, #tpu.memory_space<vmem>>, vector<128x512xbf16>
    %cst_16 = arith.constant dense<0.000000e+00> : vector<8x512xf32>
    %29 = tpu.matmul %27, %28, %cst_16 {dimension_numbers = #tpu.dot_dimension_numbers<[1], [0], [0], [1], [0, 0, 1, 1], [], []>} : vector<8x128xbf16>, vector<128x512xbf16>, vector<8x512xf32> -> vector<8x512xf32>
    %30 = arith.addf %26, %29 : vector<8x512xf32>
    %31 = vector.extract_strided_slice %30 {offsets = [0, 0], sizes = [8, 128], strides = [1, 1]} : vector<8x512xf32> to vector<8x128xf32>
    %cst_17 = arith.constant 5.000000e-01 : f32
    %32 = vector.broadcast %cst_17 : f32 to vector<8x128xf32>
    %33 = arith.mulf %32, %31 : vector<8x128xf32>
    %34 = math.tanh %33 : vector<8x128xf32>
    %cst_18 = arith.constant 5.000000e-01 : f32
    %35 = vector.broadcast %cst_18 : f32 to vector<8x128xf32>
    %36 = arith.mulf %35, %34 : vector<8x128xf32>
    %cst_19 = arith.constant 5.000000e-01 : f32
    %37 = vector.broadcast %cst_19 : f32 to vector<8x128xf32>
    %38 = arith.addf %36, %37 : vector<8x128xf32>
    %39 = vector.extract_strided_slice %30 {offsets = [0, 128], sizes = [8, 128], strides = [1, 1]} : vector<8x512xf32> to vector<8x128xf32>
    %cst_20 = arith.constant 5.000000e-01 : f32
    %40 = vector.broadcast %cst_20 : f32 to vector<8x128xf32>
    %41 = arith.mulf %40, %39 : vector<8x128xf32>
    %42 = math.tanh %41 : vector<8x128xf32>
    %cst_21 = arith.constant 5.000000e-01 : f32
    %43 = vector.broadcast %cst_21 : f32 to vector<8x128xf32>
    %44 = arith.mulf %43, %42 : vector<8x128xf32>
    %cst_22 = arith.constant 5.000000e-01 : f32
    %45 = vector.broadcast %cst_22 : f32 to vector<8x128xf32>
    %46 = arith.addf %44, %45 : vector<8x128xf32>
    %47 = vector.extract_strided_slice %30 {offsets = [0, 256], sizes = [8, 128], strides = [1, 1]} : vector<8x512xf32> to vector<8x128xf32>
    %48 = math.tanh %47 : vector<8x128xf32>
    %49 = vector.extract_strided_slice %30 {offsets = [0, 384], sizes = [8, 128], strides = [1, 1]} : vector<8x512xf32> to vector<8x128xf32>
    %cst_23 = arith.constant 5.000000e-01 : f32
    %50 = vector.broadcast %cst_23 : f32 to vector<8x128xf32>
    %51 = arith.mulf %50, %49 : vector<8x128xf32>
    %52 = math.tanh %51 : vector<8x128xf32>
    %cst_24 = arith.constant 5.000000e-01 : f32
    %53 = vector.broadcast %cst_24 : f32 to vector<8x128xf32>
    %54 = arith.mulf %53, %52 : vector<8x128xf32>
    %cst_25 = arith.constant 5.000000e-01 : f32
    %55 = vector.broadcast %cst_25 : f32 to vector<8x128xf32>
    %56 = arith.addf %54, %55 : vector<8x128xf32>
    %57 = arith.mulf %46, %25 : vector<8x128xf32>
    %58 = arith.mulf %38, %48 : vector<8x128xf32>
    %59 = arith.addf %57, %58 : vector<8x128xf32>
    %60 = math.tanh %59 : vector<8x128xf32>
    %61 = arith.mulf %56, %60 : vector<8x128xf32>
    %62 = tpu.concatenate %61, %25 in 1 : vector<8x128xf32>, vector<8x128xf32> -> vector<8x256xf32>
    %63 = arith.truncf %62 : vector<8x256xf32> to vector<8x256xbf16>
    %c384 = arith.constant 384 : index
    %c0_26 = arith.constant 0 : index
    %64 = vector.load %arg1[%c384, %c0_26] : memref<768x512xbf16, #tpu.memory_space<vmem>>, vector<256x512xbf16>
    %cst_27 = arith.constant dense<0.000000e+00> : vector<8x512xf32>
    %65 = tpu.matmul %63, %64, %cst_27 {dimension_numbers = #tpu.dot_dimension_numbers<[1], [0], [0], [1], [0, 0, 1, 1], [], []>} : vector<8x256xbf16>, vector<256x512xbf16>, vector<8x512xf32> -> vector<8x512xf32>
    %66 = arith.addf %24, %65 : vector<8x512xf32>
    %67 = vector.extract_strided_slice %66 {offsets = [0, 0], sizes = [8, 128], strides = [1, 1]} : vector<8x512xf32> to vector<8x128xf32>
    %cst_28 = arith.constant 5.000000e-01 : f32
    %68 = vector.broadcast %cst_28 : f32 to vector<8x128xf32>
    %69 = arith.mulf %68, %67 : vector<8x128xf32>
    %70 = math.tanh %69 : vector<8x128xf32>
    %cst_29 = arith.constant 5.000000e-01 : f32
    %71 = vector.broadcast %cst_29 : f32 to vector<8x128xf32>
    %72 = arith.mulf %71, %70 : vector<8x128xf32>
    %cst_30 = arith.constant 5.000000e-01 : f32
    %73 = vector.broadcast %cst_30 : f32 to vector<8x128xf32>
    %74 = arith.addf %72, %73 : vector<8x128xf32>
    %75 = vector.extract_strided_slice %66 {offsets = [0, 128], sizes = [8, 128], strides = [1, 1]} : vector<8x512xf32> to vector<8x128xf32>
    %cst_31 = arith.constant 5.000000e-01 : f32
    %76 = vector.broadcast %cst_31 : f32 to vector<8x128xf32>
    %77 = arith.mulf %76, %75 : vector<8x128xf32>
    %78 = math.tanh %77 : vector<8x128xf32>
    %cst_32 = arith.constant 5.000000e-01 : f32
    %79 = vector.broadcast %cst_32 : f32 to vector<8x128xf32>
    %80 = arith.mulf %79, %78 : vector<8x128xf32>
    %cst_33 = arith.constant 5.000000e-01 : f32
    %81 = vector.broadcast %cst_33 : f32 to vector<8x128xf32>
    %82 = arith.addf %80, %81 : vector<8x128xf32>
    %83 = vector.extract_strided_slice %66 {offsets = [0, 256], sizes = [8, 128], strides = [1, 1]} : vector<8x512xf32> to vector<8x128xf32>
    %84 = math.tanh %83 : vector<8x128xf32>
    %85 = vector.extract_strided_slice %66 {offsets = [0, 384], sizes = [8, 128], strides = [1, 1]} : vector<8x512xf32> to vector<8x128xf32>
    %cst_34 = arith.constant 5.000000e-01 : f32
    %86 = vector.broadcast %cst_34 : f32 to vector<8x128xf32>
    %87 = arith.mulf %86, %85 : vector<8x128xf32>
    %88 = math.tanh %87 : vector<8x128xf32>
    %cst_35 = arith.constant 5.000000e-01 : f32
    %89 = vector.broadcast %cst_35 : f32 to vector<8x128xf32>
    %90 = arith.mulf %89, %88 : vector<8x128xf32>
    %cst_36 = arith.constant 5.000000e-01 : f32
    %91 = vector.broadcast %cst_36 : f32 to vector<8x128xf32>
    %92 = arith.addf %90, %91 : vector<8x128xf32>
    %93 = arith.mulf %82, %25 : vector<8x128xf32>
    %94 = arith.mulf %74, %84 : vector<8x128xf32>
    %95 = arith.addf %93, %94 : vector<8x128xf32>
    %96 = math.tanh %95 : vector<8x128xf32>
    %97 = arith.mulf %92, %96 : vector<8x128xf32>
    %c8 = arith.constant 8 : index
    %c0_37 = arith.constant 0 : index
    %98 = vector.load %arg4[%c8, %c0_37] : memref<64x512xf32, #tpu.memory_space<vmem>>, vector<8x512xf32>
    %99 = arith.truncf %61 : vector<8x128xf32> to vector<8x128xbf16>
    %c256_38 = arith.constant 256 : index
    %c0_39 = arith.constant 0 : index
    %100 = vector.load %arg1[%c256_38, %c0_39] : memref<768x512xbf16, #tpu.memory_space<vmem>>, vector<128x512xbf16>
    %cst_40 = arith.constant dense<0.000000e+00> : vector<8x512xf32>
    %101 = tpu.matmul %99, %100, %cst_40 {dimension_numbers = #tpu.dot_dimension_numbers<[1], [0], [0], [1], [0, 0, 1, 1], [], []>} : vector<8x128xbf16>, vector<128x512xbf16>, vector<8x512xf32> -> vector<8x512xf32>
    %102 = arith.addf %98, %101 : vector<8x512xf32>
    %103 = vector.extract_strided_slice %102 {offsets = [0, 0], sizes = [8, 128], strides = [1, 1]} : vector<8x512xf32> to vector<8x128xf32>
    %cst_41 = arith.constant 5.000000e-01 : f32
    %104 = vector.broadcast %cst_41 : f32 to vector<8x128xf32>
    %105 = arith.mulf %104, %103 : vector<8x128xf32>
    %106 = math.tanh %105 : vector<8x128xf32>
    %cst_42 = arith.constant 5.000000e-01 : f32
    %107 = vector.broadcast %cst_42 : f32 to vector<8x128xf32>
    %108 = arith.mulf %107, %106 : vector<8x128xf32>
    %cst_43 = arith.constant 5.000000e-01 : f32
    %109 = vector.broadcast %cst_43 : f32 to vector<8x128xf32>
    %110 = arith.addf %108, %109 : vector<8x128xf32>
    %111 = vector.extract_strided_slice %102 {offsets = [0, 128], sizes = [8, 128], strides = [1, 1]} : vector<8x512xf32> to vector<8x128xf32>
    %cst_44 = arith.constant 5.000000e-01 : f32
    %112 = vector.broadcast %cst_44 : f32 to vector<8x128xf32>
    %113 = arith.mulf %112, %111 : vector<8x128xf32>
    %114 = math.tanh %113 : vector<8x128xf32>
    %cst_45 = arith.constant 5.000000e-01 : f32
    %115 = vector.broadcast %cst_45 : f32 to vector<8x128xf32>
    %116 = arith.mulf %115, %114 : vector<8x128xf32>
    %cst_46 = arith.constant 5.000000e-01 : f32
    %117 = vector.broadcast %cst_46 : f32 to vector<8x128xf32>
    %118 = arith.addf %116, %117 : vector<8x128xf32>
    %119 = vector.extract_strided_slice %102 {offsets = [0, 256], sizes = [8, 128], strides = [1, 1]} : vector<8x512xf32> to vector<8x128xf32>
    %120 = math.tanh %119 : vector<8x128xf32>
    %121 = vector.extract_strided_slice %102 {offsets = [0, 384], sizes = [8, 128], strides = [1, 1]} : vector<8x512xf32> to vector<8x128xf32>
    %cst_47 = arith.constant 5.000000e-01 : f32
    %122 = vector.broadcast %cst_47 : f32 to vector<8x128xf32>
    %123 = arith.mulf %122, %121 : vector<8x128xf32>
    %124 = math.tanh %123 : vector<8x128xf32>
    %cst_48 = arith.constant 5.000000e-01 : f32
    %125 = vector.broadcast %cst_48 : f32 to vector<8x128xf32>
    %126 = arith.mulf %125, %124 : vector<8x128xf32>
    %cst_49 = arith.constant 5.000000e-01 : f32
    %127 = vector.broadcast %cst_49 : f32 to vector<8x128xf32>
    %128 = arith.addf %126, %127 : vector<8x128xf32>
    %129 = arith.mulf %118, %59 : vector<8x128xf32>
    %130 = arith.mulf %110, %120 : vector<8x128xf32>
    %131 = arith.addf %129, %130 : vector<8x128xf32>
    %132 = math.tanh %131 : vector<8x128xf32>
    %133 = arith.mulf %128, %132 : vector<8x128xf32>
    %134 = tpu.concatenate %133, %97 in 1 : vector<8x128xf32>, vector<8x128xf32> -> vector<8x256xf32>
    %135 = arith.truncf %134 : vector<8x256xf32> to vector<8x256xbf16>
    %c384_50 = arith.constant 384 : index
    %c0_51 = arith.constant 0 : index
    %136 = vector.load %arg1[%c384_50, %c0_51] : memref<768x512xbf16, #tpu.memory_space<vmem>>, vector<256x512xbf16>
    %cst_52 = arith.constant dense<0.000000e+00> : vector<8x512xf32>
    %137 = tpu.matmul %135, %136, %cst_52 {dimension_numbers = #tpu.dot_dimension_numbers<[1], [0], [0], [1], [0, 0, 1, 1], [], []>} : vector<8x256xbf16>, vector<256x512xbf16>, vector<8x512xf32> -> vector<8x512xf32>
    %138 = arith.addf %24, %137 : vector<8x512xf32>
    %139 = vector.extract_strided_slice %138 {offsets = [0, 0], sizes = [8, 128], strides = [1, 1]} : vector<8x512xf32> to vector<8x128xf32>
    %cst_53 = arith.constant 5.000000e-01 : f32
    %140 = vector.broadcast %cst_53 : f32 to vector<8x128xf32>
    %141 = arith.mulf %140, %139 : vector<8x128xf32>
    %142 = math.tanh %141 : vector<8x128xf32>
    %cst_54 = arith.constant 5.000000e-01 : f32
    %143 = vector.broadcast %cst_54 : f32 to vector<8x128xf32>
    %144 = arith.mulf %143, %142 : vector<8x128xf32>
    %cst_55 = arith.constant 5.000000e-01 : f32
    %145 = vector.broadcast %cst_55 : f32 to vector<8x128xf32>
    %146 = arith.addf %144, %145 : vector<8x128xf32>
    %147 = vector.extract_strided_slice %138 {offsets = [0, 128], sizes = [8, 128], strides = [1, 1]} : vector<8x512xf32> to vector<8x128xf32>
    %cst_56 = arith.constant 5.000000e-01 : f32
    %148 = vector.broadcast %cst_56 : f32 to vector<8x128xf32>
    %149 = arith.mulf %148, %147 : vector<8x128xf32>
    %150 = math.tanh %149 : vector<8x128xf32>
    %cst_57 = arith.constant 5.000000e-01 : f32
    %151 = vector.broadcast %cst_57 : f32 to vector<8x128xf32>
    %152 = arith.mulf %151, %150 : vector<8x128xf32>
    %cst_58 = arith.constant 5.000000e-01 : f32
    %153 = vector.broadcast %cst_58 : f32 to vector<8x128xf32>
    %154 = arith.addf %152, %153 : vector<8x128xf32>
    %155 = vector.extract_strided_slice %138 {offsets = [0, 256], sizes = [8, 128], strides = [1, 1]} : vector<8x512xf32> to vector<8x128xf32>
    %156 = math.tanh %155 : vector<8x128xf32>
    %157 = vector.extract_strided_slice %138 {offsets = [0, 384], sizes = [8, 128], strides = [1, 1]} : vector<8x512xf32> to vector<8x128xf32>
    %cst_59 = arith.constant 5.000000e-01 : f32
    %158 = vector.broadcast %cst_59 : f32 to vector<8x128xf32>
    %159 = arith.mulf %158, %157 : vector<8x128xf32>
    %160 = math.tanh %159 : vector<8x128xf32>
    %cst_60 = arith.constant 5.000000e-01 : f32
    %161 = vector.broadcast %cst_60 : f32 to vector<8x128xf32>
    %162 = arith.mulf %161, %160 : vector<8x128xf32>
    %cst_61 = arith.constant 5.000000e-01 : f32
    %163 = vector.broadcast %cst_61 : f32 to vector<8x128xf32>
    %164 = arith.addf %162, %163 : vector<8x128xf32>
    %165 = arith.mulf %154, %95 : vector<8x128xf32>
    %166 = arith.mulf %146, %156 : vector<8x128xf32>
    %167 = arith.addf %165, %166 : vector<8x128xf32>
    %168 = math.tanh %167 : vector<8x128xf32>
    %169 = arith.mulf %164, %168 : vector<8x128xf32>
    %c16 = arith.constant 16 : index
    %c0_62 = arith.constant 0 : index
    %170 = vector.load %arg4[%c16, %c0_62] : memref<64x512xf32, #tpu.memory_space<vmem>>, vector<8x512xf32>
    %171 = arith.truncf %133 : vector<8x128xf32> to vector<8x128xbf16>
    %c256_63 = arith.constant 256 : index
    %c0_64 = arith.constant 0 : index
    %172 = vector.load %arg1[%c256_63, %c0_64] : memref<768x512xbf16, #tpu.memory_space<vmem>>, vector<128x512xbf16>
    %cst_65 = arith.constant dense<0.000000e+00> : vector<8x512xf32>
    %173 = tpu.matmul %171, %172, %cst_65 {dimension_numbers = #tpu.dot_dimension_numbers<[1], [0], [0], [1], [0, 0, 1, 1], [], []>} : vector<8x128xbf16>, vector<128x512xbf16>, vector<8x512xf32> -> vector<8x512xf32>
    %174 = arith.addf %170, %173 : vector<8x512xf32>
    %175 = vector.extract_strided_slice %174 {offsets = [0, 0], sizes = [8, 128], strides = [1, 1]} : vector<8x512xf32> to vector<8x128xf32>
    %cst_66 = arith.constant 5.000000e-01 : f32
    %176 = vector.broadcast %cst_66 : f32 to vector<8x128xf32>
    %177 = arith.mulf %176, %175 : vector<8x128xf32>
    %178 = math.tanh %177 : vector<8x128xf32>
    %cst_67 = arith.constant 5.000000e-01 : f32
    %179 = vector.broadcast %cst_67 : f32 to vector<8x128xf32>
    %180 = arith.mulf %179, %178 : vector<8x128xf32>
    %cst_68 = arith.constant 5.000000e-01 : f32
    %181 = vector.broadcast %cst_68 : f32 to vector<8x128xf32>
    %182 = arith.addf %180, %181 : vector<8x128xf32>
    %183 = vector.extract_strided_slice %174 {offsets = [0, 128], sizes = [8, 128], strides = [1, 1]} : vector<8x512xf32> to vector<8x128xf32>
    %cst_69 = arith.constant 5.000000e-01 : f32
    %184 = vector.broadcast %cst_69 : f32 to vector<8x128xf32>
    %185 = arith.mulf %184, %183 : vector<8x128xf32>
    %186 = math.tanh %185 : vector<8x128xf32>
    %cst_70 = arith.constant 5.000000e-01 : f32
    %187 = vector.broadcast %cst_70 : f32 to vector<8x128xf32>
    %188 = arith.mulf %187, %186 : vector<8x128xf32>
    %cst_71 = arith.constant 5.000000e-01 : f32
    %189 = vector.broadcast %cst_71 : f32 to vector<8x128xf32>
    %190 = arith.addf %188, %189 : vector<8x128xf32>
    %191 = vector.extract_strided_slice %174 {offsets = [0, 256], sizes = [8, 128], strides = [1, 1]} : vector<8x512xf32> to vector<8x128xf32>
    %192 = math.tanh %191 : vector<8x128xf32>
    %193 = vector.extract_strided_slice %174 {offsets = [0, 384], sizes = [8, 128], strides = [1, 1]} : vector<8x512xf32> to vector<8x128xf32>
    %cst_72 = arith.constant 5.000000e-01 : f32
    %194 = vector.broadcast %cst_72 : f32 to vector<8x128xf32>
    %195 = arith.mulf %194, %193 : vector<8x128xf32>
    %196 = math.tanh %195 : vector<8x128xf32>
    %cst_73 = arith.constant 5.000000e-01 : f32
    %197 = vector.broadcast %cst_73 : f32 to vector<8x128xf32>
    %198 = arith.mulf %197, %196 : vector<8x128xf32>
    %cst_74 = arith.constant 5.000000e-01 : f32
    %199 = vector.broadcast %cst_74 : f32 to vector<8x128xf32>
    %200 = arith.addf %198, %199 : vector<8x128xf32>
    %201 = arith.mulf %190, %131 : vector<8x128xf32>
    %202 = arith.mulf %182, %192 : vector<8x128xf32>
    %203 = arith.addf %201, %202 : vector<8x128xf32>
    %204 = math.tanh %203 : vector<8x128xf32>
    %205 = arith.mulf %200, %204 : vector<8x128xf32>
    %206 = tpu.concatenate %205, %169 in 1 : vector<8x128xf32>, vector<8x128xf32> -> vector<8x256xf32>
    %207 = arith.truncf %206 : vector<8x256xf32> to vector<8x256xbf16>
    %c384_75 = arith.constant 384 : index
    %c0_76 = arith.constant 0 : index
    %208 = vector.load %arg1[%c384_75, %c0_76] : memref<768x512xbf16, #tpu.memory_space<vmem>>, vector<256x512xbf16>
    %cst_77 = arith.constant dense<0.000000e+00> : vector<8x512xf32>
    %209 = tpu.matmul %207, %208, %cst_77 {dimension_numbers = #tpu.dot_dimension_numbers<[1], [0], [0], [1], [0, 0, 1, 1], [], []>} : vector<8x256xbf16>, vector<256x512xbf16>, vector<8x512xf32> -> vector<8x512xf32>
    %210 = arith.addf %24, %209 : vector<8x512xf32>
    %211 = vector.extract_strided_slice %210 {offsets = [0, 0], sizes = [8, 128], strides = [1, 1]} : vector<8x512xf32> to vector<8x128xf32>
    %cst_78 = arith.constant 5.000000e-01 : f32
    %212 = vector.broadcast %cst_78 : f32 to vector<8x128xf32>
    %213 = arith.mulf %212, %211 : vector<8x128xf32>
    %214 = math.tanh %213 : vector<8x128xf32>
    %cst_79 = arith.constant 5.000000e-01 : f32
    %215 = vector.broadcast %cst_79 : f32 to vector<8x128xf32>
    %216 = arith.mulf %215, %214 : vector<8x128xf32>
    %cst_80 = arith.constant 5.000000e-01 : f32
    %217 = vector.broadcast %cst_80 : f32 to vector<8x128xf32>
    %218 = arith.addf %216, %217 : vector<8x128xf32>
    %219 = vector.extract_strided_slice %210 {offsets = [0, 128], sizes = [8, 128], strides = [1, 1]} : vector<8x512xf32> to vector<8x128xf32>
    %cst_81 = arith.constant 5.000000e-01 : f32
    %220 = vector.broadcast %cst_81 : f32 to vector<8x128xf32>
    %221 = arith.mulf %220, %219 : vector<8x128xf32>
    %222 = math.tanh %221 : vector<8x128xf32>
    %cst_82 = arith.constant 5.000000e-01 : f32
    %223 = vector.broadcast %cst_82 : f32 to vector<8x128xf32>
    %224 = arith.mulf %223, %222 : vector<8x128xf32>
    %cst_83 = arith.constant 5.000000e-01 : f32
    %225 = vector.broadcast %cst_83 : f32 to vector<8x128xf32>
    %226 = arith.addf %224, %225 : vector<8x128xf32>
    %227 = vector.extract_strided_slice %210 {offsets = [0, 256], sizes = [8, 128], strides = [1, 1]} : vector<8x512xf32> to vector<8x128xf32>
    %228 = math.tanh %227 : vector<8x128xf32>
    %229 = vector.extract_strided_slice %210 {offsets = [0, 384], sizes = [8, 128], strides = [1, 1]} : vector<8x512xf32> to vector<8x128xf32>
    %cst_84 = arith.constant 5.000000e-01 : f32
    %230 = vector.broadcast %cst_84 : f32 to vector<8x128xf32>
    %231 = arith.mulf %230, %229 : vector<8x128xf32>
    %232 = math.tanh %231 : vector<8x128xf32>
    %cst_85 = arith.constant 5.000000e-01 : f32
    %233 = vector.broadcast %cst_85 : f32 to vector<8x128xf32>
    %234 = arith.mulf %233, %232 : vector<8x128xf32>
    %cst_86 = arith.constant 5.000000e-01 : f32
    %235 = vector.broadcast %cst_86 : f32 to vector<8x128xf32>
    %236 = arith.addf %234, %235 : vector<8x128xf32>
    %237 = arith.mulf %226, %167 : vector<8x128xf32>
    %238 = arith.mulf %218, %228 : vector<8x128xf32>
    %239 = arith.addf %237, %238 : vector<8x128xf32>
    %240 = math.tanh %239 : vector<8x128xf32>
    %241 = arith.mulf %236, %240 : vector<8x128xf32>
    %c24 = arith.constant 24 : index
    %c0_87 = arith.constant 0 : index
    %242 = vector.load %arg4[%c24, %c0_87] : memref<64x512xf32, #tpu.memory_space<vmem>>, vector<8x512xf32>
    %243 = arith.truncf %205 : vector<8x128xf32> to vector<8x128xbf16>
    %c256_88 = arith.constant 256 : index
    %c0_89 = arith.constant 0 : index
    %244 = vector.load %arg1[%c256_88, %c0_89] : memref<768x512xbf16, #tpu.memory_space<vmem>>, vector<128x512xbf16>
    %cst_90 = arith.constant dense<0.000000e+00> : vector<8x512xf32>
    %245 = tpu.matmul %243, %244, %cst_90 {dimension_numbers = #tpu.dot_dimension_numbers<[1], [0], [0], [1], [0, 0, 1, 1], [], []>} : vector<8x128xbf16>, vector<128x512xbf16>, vector<8x512xf32> -> vector<8x512xf32>
    %246 = arith.addf %242, %245 : vector<8x512xf32>
    %247 = vector.extract_strided_slice %246 {offsets = [0, 0], sizes = [8, 128], strides = [1, 1]} : vector<8x512xf32> to vector<8x128xf32>
    %cst_91 = arith.constant 5.000000e-01 : f32
    %248 = vector.broadcast %cst_91 : f32 to vector<8x128xf32>
    %249 = arith.mulf %248, %247 : vector<8x128xf32>
    %250 = math.tanh %249 : vector<8x128xf32>
    %cst_92 = arith.constant 5.000000e-01 : f32
    %251 = vector.broadcast %cst_92 : f32 to vector<8x128xf32>
    %252 = arith.mulf %251, %250 : vector<8x128xf32>
    %cst_93 = arith.constant 5.000000e-01 : f32
    %253 = vector.broadcast %cst_93 : f32 to vector<8x128xf32>
    %254 = arith.addf %252, %253 : vector<8x128xf32>
    %255 = vector.extract_strided_slice %246 {offsets = [0, 128], sizes = [8, 128], strides = [1, 1]} : vector<8x512xf32> to vector<8x128xf32>
    %cst_94 = arith.constant 5.000000e-01 : f32
    %256 = vector.broadcast %cst_94 : f32 to vector<8x128xf32>
    %257 = arith.mulf %256, %255 : vector<8x128xf32>
    %258 = math.tanh %257 : vector<8x128xf32>
    %cst_95 = arith.constant 5.000000e-01 : f32
    %259 = vector.broadcast %cst_95 : f32 to vector<8x128xf32>
    %260 = arith.mulf %259, %258 : vector<8x128xf32>
    %cst_96 = arith.constant 5.000000e-01 : f32
    %261 = vector.broadcast %cst_96 : f32 to vector<8x128xf32>
    %262 = arith.addf %260, %261 : vector<8x128xf32>
    %263 = vector.extract_strided_slice %246 {offsets = [0, 256], sizes = [8, 128], strides = [1, 1]} : vector<8x512xf32> to vector<8x128xf32>
    %264 = math.tanh %263 : vector<8x128xf32>
    %265 = vector.extract_strided_slice %246 {offsets = [0, 384], sizes = [8, 128], strides = [1, 1]} : vector<8x512xf32> to vector<8x128xf32>
    %cst_97 = arith.constant 5.000000e-01 : f32
    %266 = vector.broadcast %cst_97 : f32 to vector<8x128xf32>
    %267 = arith.mulf %266, %265 : vector<8x128xf32>
    %268 = math.tanh %267 : vector<8x128xf32>
    %cst_98 = arith.constant 5.000000e-01 : f32
    %269 = vector.broadcast %cst_98 : f32 to vector<8x128xf32>
    %270 = arith.mulf %269, %268 : vector<8x128xf32>
    %cst_99 = arith.constant 5.000000e-01 : f32
    %271 = vector.broadcast %cst_99 : f32 to vector<8x128xf32>
    %272 = arith.addf %270, %271 : vector<8x128xf32>
    %273 = arith.mulf %262, %203 : vector<8x128xf32>
    %274 = arith.mulf %254, %264 : vector<8x128xf32>
    %275 = arith.addf %273, %274 : vector<8x128xf32>
    %276 = math.tanh %275 : vector<8x128xf32>
    %277 = arith.mulf %272, %276 : vector<8x128xf32>
    %278 = tpu.concatenate %277, %241 in 1 : vector<8x128xf32>, vector<8x128xf32> -> vector<8x256xf32>
    %279 = arith.truncf %278 : vector<8x256xf32> to vector<8x256xbf16>
    %c384_100 = arith.constant 384 : index
    %c0_101 = arith.constant 0 : index
    %280 = vector.load %arg1[%c384_100, %c0_101] : memref<768x512xbf16, #tpu.memory_space<vmem>>, vector<256x512xbf16>
    %cst_102 = arith.constant dense<0.000000e+00> : vector<8x512xf32>
    %281 = tpu.matmul %279, %280, %cst_102 {dimension_numbers = #tpu.dot_dimension_numbers<[1], [0], [0], [1], [0, 0, 1, 1], [], []>} : vector<8x256xbf16>, vector<256x512xbf16>, vector<8x512xf32> -> vector<8x512xf32>
    %282 = arith.addf %24, %281 : vector<8x512xf32>
    %283 = vector.extract_strided_slice %282 {offsets = [0, 0], sizes = [8, 128], strides = [1, 1]} : vector<8x512xf32> to vector<8x128xf32>
    %cst_103 = arith.constant 5.000000e-01 : f32
    %284 = vector.broadcast %cst_103 : f32 to vector<8x128xf32>
    %285 = arith.mulf %284, %283 : vector<8x128xf32>
    %286 = math.tanh %285 : vector<8x128xf32>
    %cst_104 = arith.constant 5.000000e-01 : f32
    %287 = vector.broadcast %cst_104 : f32 to vector<8x128xf32>
    %288 = arith.mulf %287, %286 : vector<8x128xf32>
    %cst_105 = arith.constant 5.000000e-01 : f32
    %289 = vector.broadcast %cst_105 : f32 to vector<8x128xf32>
    %290 = arith.addf %288, %289 : vector<8x128xf32>
    %291 = vector.extract_strided_slice %282 {offsets = [0, 128], sizes = [8, 128], strides = [1, 1]} : vector<8x512xf32> to vector<8x128xf32>
    %cst_106 = arith.constant 5.000000e-01 : f32
    %292 = vector.broadcast %cst_106 : f32 to vector<8x128xf32>
    %293 = arith.mulf %292, %291 : vector<8x128xf32>
    %294 = math.tanh %293 : vector<8x128xf32>
    %cst_107 = arith.constant 5.000000e-01 : f32
    %295 = vector.broadcast %cst_107 : f32 to vector<8x128xf32>
    %296 = arith.mulf %295, %294 : vector<8x128xf32>
    %cst_108 = arith.constant 5.000000e-01 : f32
    %297 = vector.broadcast %cst_108 : f32 to vector<8x128xf32>
    %298 = arith.addf %296, %297 : vector<8x128xf32>
    %299 = vector.extract_strided_slice %282 {offsets = [0, 256], sizes = [8, 128], strides = [1, 1]} : vector<8x512xf32> to vector<8x128xf32>
    %300 = math.tanh %299 : vector<8x128xf32>
    %301 = vector.extract_strided_slice %282 {offsets = [0, 384], sizes = [8, 128], strides = [1, 1]} : vector<8x512xf32> to vector<8x128xf32>
    %cst_109 = arith.constant 5.000000e-01 : f32
    %302 = vector.broadcast %cst_109 : f32 to vector<8x128xf32>
    %303 = arith.mulf %302, %301 : vector<8x128xf32>
    %304 = math.tanh %303 : vector<8x128xf32>
    %cst_110 = arith.constant 5.000000e-01 : f32
    %305 = vector.broadcast %cst_110 : f32 to vector<8x128xf32>
    %306 = arith.mulf %305, %304 : vector<8x128xf32>
    %cst_111 = arith.constant 5.000000e-01 : f32
    %307 = vector.broadcast %cst_111 : f32 to vector<8x128xf32>
    %308 = arith.addf %306, %307 : vector<8x128xf32>
    %309 = arith.mulf %298, %239 : vector<8x128xf32>
    %310 = arith.mulf %290, %300 : vector<8x128xf32>
    %311 = arith.addf %309, %310 : vector<8x128xf32>
    %312 = math.tanh %311 : vector<8x128xf32>
    %313 = arith.mulf %308, %312 : vector<8x128xf32>
    %c32 = arith.constant 32 : index
    %c0_112 = arith.constant 0 : index
    %314 = vector.load %arg4[%c32, %c0_112] : memref<64x512xf32, #tpu.memory_space<vmem>>, vector<8x512xf32>
    %315 = arith.truncf %277 : vector<8x128xf32> to vector<8x128xbf16>
    %c256_113 = arith.constant 256 : index
    %c0_114 = arith.constant 0 : index
    %316 = vector.load %arg1[%c256_113, %c0_114] : memref<768x512xbf16, #tpu.memory_space<vmem>>, vector<128x512xbf16>
    %cst_115 = arith.constant dense<0.000000e+00> : vector<8x512xf32>
    %317 = tpu.matmul %315, %316, %cst_115 {dimension_numbers = #tpu.dot_dimension_numbers<[1], [0], [0], [1], [0, 0, 1, 1], [], []>} : vector<8x128xbf16>, vector<128x512xbf16>, vector<8x512xf32> -> vector<8x512xf32>
    %318 = arith.addf %314, %317 : vector<8x512xf32>
    %319 = vector.extract_strided_slice %318 {offsets = [0, 0], sizes = [8, 128], strides = [1, 1]} : vector<8x512xf32> to vector<8x128xf32>
    %cst_116 = arith.constant 5.000000e-01 : f32
    %320 = vector.broadcast %cst_116 : f32 to vector<8x128xf32>
    %321 = arith.mulf %320, %319 : vector<8x128xf32>
    %322 = math.tanh %321 : vector<8x128xf32>
    %cst_117 = arith.constant 5.000000e-01 : f32
    %323 = vector.broadcast %cst_117 : f32 to vector<8x128xf32>
    %324 = arith.mulf %323, %322 : vector<8x128xf32>
    %cst_118 = arith.constant 5.000000e-01 : f32
    %325 = vector.broadcast %cst_118 : f32 to vector<8x128xf32>
    %326 = arith.addf %324, %325 : vector<8x128xf32>
    %327 = vector.extract_strided_slice %318 {offsets = [0, 128], sizes = [8, 128], strides = [1, 1]} : vector<8x512xf32> to vector<8x128xf32>
    %cst_119 = arith.constant 5.000000e-01 : f32
    %328 = vector.broadcast %cst_119 : f32 to vector<8x128xf32>
    %329 = arith.mulf %328, %327 : vector<8x128xf32>
    %330 = math.tanh %329 : vector<8x128xf32>
    %cst_120 = arith.constant 5.000000e-01 : f32
    %331 = vector.broadcast %cst_120 : f32 to vector<8x128xf32>
    %332 = arith.mulf %331, %330 : vector<8x128xf32>
    %cst_121 = arith.constant 5.000000e-01 : f32
    %333 = vector.broadcast %cst_121 : f32 to vector<8x128xf32>
    %334 = arith.addf %332, %333 : vector<8x128xf32>
    %335 = vector.extract_strided_slice %318 {offsets = [0, 256], sizes = [8, 128], strides = [1, 1]} : vector<8x512xf32> to vector<8x128xf32>
    %336 = math.tanh %335 : vector<8x128xf32>
    %337 = vector.extract_strided_slice %318 {offsets = [0, 384], sizes = [8, 128], strides = [1, 1]} : vector<8x512xf32> to vector<8x128xf32>
    %cst_122 = arith.constant 5.000000e-01 : f32
    %338 = vector.broadcast %cst_122 : f32 to vector<8x128xf32>
    %339 = arith.mulf %338, %337 : vector<8x128xf32>
    %340 = math.tanh %339 : vector<8x128xf32>
    %cst_123 = arith.constant 5.000000e-01 : f32
    %341 = vector.broadcast %cst_123 : f32 to vector<8x128xf32>
    %342 = arith.mulf %341, %340 : vector<8x128xf32>
    %cst_124 = arith.constant 5.000000e-01 : f32
    %343 = vector.broadcast %cst_124 : f32 to vector<8x128xf32>
    %344 = arith.addf %342, %343 : vector<8x128xf32>
    %345 = arith.mulf %334, %275 : vector<8x128xf32>
    %346 = arith.mulf %326, %336 : vector<8x128xf32>
    %347 = arith.addf %345, %346 : vector<8x128xf32>
    %348 = math.tanh %347 : vector<8x128xf32>
    %349 = arith.mulf %344, %348 : vector<8x128xf32>
    %350 = tpu.concatenate %349, %313 in 1 : vector<8x128xf32>, vector<8x128xf32> -> vector<8x256xf32>
    %351 = arith.truncf %350 : vector<8x256xf32> to vector<8x256xbf16>
    %c384_125 = arith.constant 384 : index
    %c0_126 = arith.constant 0 : index
    %352 = vector.load %arg1[%c384_125, %c0_126] : memref<768x512xbf16, #tpu.memory_space<vmem>>, vector<256x512xbf16>
    %cst_127 = arith.constant dense<0.000000e+00> : vector<8x512xf32>
    %353 = tpu.matmul %351, %352, %cst_127 {dimension_numbers = #tpu.dot_dimension_numbers<[1], [0], [0], [1], [0, 0, 1, 1], [], []>} : vector<8x256xbf16>, vector<256x512xbf16>, vector<8x512xf32> -> vector<8x512xf32>
    %354 = arith.addf %24, %353 : vector<8x512xf32>
    %355 = vector.extract_strided_slice %354 {offsets = [0, 0], sizes = [8, 128], strides = [1, 1]} : vector<8x512xf32> to vector<8x128xf32>
    %cst_128 = arith.constant 5.000000e-01 : f32
    %356 = vector.broadcast %cst_128 : f32 to vector<8x128xf32>
    %357 = arith.mulf %356, %355 : vector<8x128xf32>
    %358 = math.tanh %357 : vector<8x128xf32>
    %cst_129 = arith.constant 5.000000e-01 : f32
    %359 = vector.broadcast %cst_129 : f32 to vector<8x128xf32>
    %360 = arith.mulf %359, %358 : vector<8x128xf32>
    %cst_130 = arith.constant 5.000000e-01 : f32
    %361 = vector.broadcast %cst_130 : f32 to vector<8x128xf32>
    %362 = arith.addf %360, %361 : vector<8x128xf32>
    %363 = vector.extract_strided_slice %354 {offsets = [0, 128], sizes = [8, 128], strides = [1, 1]} : vector<8x512xf32> to vector<8x128xf32>
    %cst_131 = arith.constant 5.000000e-01 : f32
    %364 = vector.broadcast %cst_131 : f32 to vector<8x128xf32>
    %365 = arith.mulf %364, %363 : vector<8x128xf32>
    %366 = math.tanh %365 : vector<8x128xf32>
    %cst_132 = arith.constant 5.000000e-01 : f32
    %367 = vector.broadcast %cst_132 : f32 to vector<8x128xf32>
    %368 = arith.mulf %367, %366 : vector<8x128xf32>
    %cst_133 = arith.constant 5.000000e-01 : f32
    %369 = vector.broadcast %cst_133 : f32 to vector<8x128xf32>
    %370 = arith.addf %368, %369 : vector<8x128xf32>
    %371 = vector.extract_strided_slice %354 {offsets = [0, 256], sizes = [8, 128], strides = [1, 1]} : vector<8x512xf32> to vector<8x128xf32>
    %372 = math.tanh %371 : vector<8x128xf32>
    %373 = vector.extract_strided_slice %354 {offsets = [0, 384], sizes = [8, 128], strides = [1, 1]} : vector<8x512xf32> to vector<8x128xf32>
    %cst_134 = arith.constant 5.000000e-01 : f32
    %374 = vector.broadcast %cst_134 : f32 to vector<8x128xf32>
    %375 = arith.mulf %374, %373 : vector<8x128xf32>
    %376 = math.tanh %375 : vector<8x128xf32>
    %cst_135 = arith.constant 5.000000e-01 : f32
    %377 = vector.broadcast %cst_135 : f32 to vector<8x128xf32>
    %378 = arith.mulf %377, %376 : vector<8x128xf32>
    %cst_136 = arith.constant 5.000000e-01 : f32
    %379 = vector.broadcast %cst_136 : f32 to vector<8x128xf32>
    %380 = arith.addf %378, %379 : vector<8x128xf32>
    %381 = arith.mulf %370, %311 : vector<8x128xf32>
    %382 = arith.mulf %362, %372 : vector<8x128xf32>
    %383 = arith.addf %381, %382 : vector<8x128xf32>
    %384 = math.tanh %383 : vector<8x128xf32>
    %385 = arith.mulf %380, %384 : vector<8x128xf32>
    %c40 = arith.constant 40 : index
    %c0_137 = arith.constant 0 : index
    %386 = vector.load %arg4[%c40, %c0_137] : memref<64x512xf32, #tpu.memory_space<vmem>>, vector<8x512xf32>
    %387 = arith.truncf %349 : vector<8x128xf32> to vector<8x128xbf16>
    %c256_138 = arith.constant 256 : index
    %c0_139 = arith.constant 0 : index
    %388 = vector.load %arg1[%c256_138, %c0_139] : memref<768x512xbf16, #tpu.memory_space<vmem>>, vector<128x512xbf16>
    %cst_140 = arith.constant dense<0.000000e+00> : vector<8x512xf32>
    %389 = tpu.matmul %387, %388, %cst_140 {dimension_numbers = #tpu.dot_dimension_numbers<[1], [0], [0], [1], [0, 0, 1, 1], [], []>} : vector<8x128xbf16>, vector<128x512xbf16>, vector<8x512xf32> -> vector<8x512xf32>
    %390 = arith.addf %386, %389 : vector<8x512xf32>
    %391 = vector.extract_strided_slice %390 {offsets = [0, 0], sizes = [8, 128], strides = [1, 1]} : vector<8x512xf32> to vector<8x128xf32>
    %cst_141 = arith.constant 5.000000e-01 : f32
    %392 = vector.broadcast %cst_141 : f32 to vector<8x128xf32>
    %393 = arith.mulf %392, %391 : vector<8x128xf32>
    %394 = math.tanh %393 : vector<8x128xf32>
    %cst_142 = arith.constant 5.000000e-01 : f32
    %395 = vector.broadcast %cst_142 : f32 to vector<8x128xf32>
    %396 = arith.mulf %395, %394 : vector<8x128xf32>
    %cst_143 = arith.constant 5.000000e-01 : f32
    %397 = vector.broadcast %cst_143 : f32 to vector<8x128xf32>
    %398 = arith.addf %396, %397 : vector<8x128xf32>
    %399 = vector.extract_strided_slice %390 {offsets = [0, 128], sizes = [8, 128], strides = [1, 1]} : vector<8x512xf32> to vector<8x128xf32>
    %cst_144 = arith.constant 5.000000e-01 : f32
    %400 = vector.broadcast %cst_144 : f32 to vector<8x128xf32>
    %401 = arith.mulf %400, %399 : vector<8x128xf32>
    %402 = math.tanh %401 : vector<8x128xf32>
    %cst_145 = arith.constant 5.000000e-01 : f32
    %403 = vector.broadcast %cst_145 : f32 to vector<8x128xf32>
    %404 = arith.mulf %403, %402 : vector<8x128xf32>
    %cst_146 = arith.constant 5.000000e-01 : f32
    %405 = vector.broadcast %cst_146 : f32 to vector<8x128xf32>
    %406 = arith.addf %404, %405 : vector<8x128xf32>
    %407 = vector.extract_strided_slice %390 {offsets = [0, 256], sizes = [8, 128], strides = [1, 1]} : vector<8x512xf32> to vector<8x128xf32>
    %408 = math.tanh %407 : vector<8x128xf32>
    %409 = vector.extract_strided_slice %390 {offsets = [0, 384], sizes = [8, 128], strides = [1, 1]} : vector<8x512xf32> to vector<8x128xf32>
    %cst_147 = arith.constant 5.000000e-01 : f32
    %410 = vector.broadcast %cst_147 : f32 to vector<8x128xf32>
    %411 = arith.mulf %410, %409 : vector<8x128xf32>
    %412 = math.tanh %411 : vector<8x128xf32>
    %cst_148 = arith.constant 5.000000e-01 : f32
    %413 = vector.broadcast %cst_148 : f32 to vector<8x128xf32>
    %414 = arith.mulf %413, %412 : vector<8x128xf32>
    %cst_149 = arith.constant 5.000000e-01 : f32
    %415 = vector.broadcast %cst_149 : f32 to vector<8x128xf32>
    %416 = arith.addf %414, %415 : vector<8x128xf32>
    %417 = arith.mulf %406, %347 : vector<8x128xf32>
    %418 = arith.mulf %398, %408 : vector<8x128xf32>
    %419 = arith.addf %417, %418 : vector<8x128xf32>
    %420 = math.tanh %419 : vector<8x128xf32>
    %421 = arith.mulf %416, %420 : vector<8x128xf32>
    %422 = tpu.concatenate %421, %385 in 1 : vector<8x128xf32>, vector<8x128xf32> -> vector<8x256xf32>
    %423 = arith.truncf %422 : vector<8x256xf32> to vector<8x256xbf16>
    %c384_150 = arith.constant 384 : index
    %c0_151 = arith.constant 0 : index
    %424 = vector.load %arg1[%c384_150, %c0_151] : memref<768x512xbf16, #tpu.memory_space<vmem>>, vector<256x512xbf16>
    %cst_152 = arith.constant dense<0.000000e+00> : vector<8x512xf32>
    %425 = tpu.matmul %423, %424, %cst_152 {dimension_numbers = #tpu.dot_dimension_numbers<[1], [0], [0], [1], [0, 0, 1, 1], [], []>} : vector<8x256xbf16>, vector<256x512xbf16>, vector<8x512xf32> -> vector<8x512xf32>
    %426 = arith.addf %24, %425 : vector<8x512xf32>
    %427 = vector.extract_strided_slice %426 {offsets = [0, 0], sizes = [8, 128], strides = [1, 1]} : vector<8x512xf32> to vector<8x128xf32>
    %cst_153 = arith.constant 5.000000e-01 : f32
    %428 = vector.broadcast %cst_153 : f32 to vector<8x128xf32>
    %429 = arith.mulf %428, %427 : vector<8x128xf32>
    %430 = math.tanh %429 : vector<8x128xf32>
    %cst_154 = arith.constant 5.000000e-01 : f32
    %431 = vector.broadcast %cst_154 : f32 to vector<8x128xf32>
    %432 = arith.mulf %431, %430 : vector<8x128xf32>
    %cst_155 = arith.constant 5.000000e-01 : f32
    %433 = vector.broadcast %cst_155 : f32 to vector<8x128xf32>
    %434 = arith.addf %432, %433 : vector<8x128xf32>
    %435 = vector.extract_strided_slice %426 {offsets = [0, 128], sizes = [8, 128], strides = [1, 1]} : vector<8x512xf32> to vector<8x128xf32>
    %cst_156 = arith.constant 5.000000e-01 : f32
    %436 = vector.broadcast %cst_156 : f32 to vector<8x128xf32>
    %437 = arith.mulf %436, %435 : vector<8x128xf32>
    %438 = math.tanh %437 : vector<8x128xf32>
    %cst_157 = arith.constant 5.000000e-01 : f32
    %439 = vector.broadcast %cst_157 : f32 to vector<8x128xf32>
    %440 = arith.mulf %439, %438 : vector<8x128xf32>
    %cst_158 = arith.constant 5.000000e-01 : f32
    %441 = vector.broadcast %cst_158 : f32 to vector<8x128xf32>
    %442 = arith.addf %440, %441 : vector<8x128xf32>
    %443 = vector.extract_strided_slice %426 {offsets = [0, 256], sizes = [8, 128], strides = [1, 1]} : vector<8x512xf32> to vector<8x128xf32>
    %444 = math.tanh %443 : vector<8x128xf32>
    %445 = vector.extract_strided_slice %426 {offsets = [0, 384], sizes = [8, 128], strides = [1, 1]} : vector<8x512xf32> to vector<8x128xf32>
    %cst_159 = arith.constant 5.000000e-01 : f32
    %446 = vector.broadcast %cst_159 : f32 to vector<8x128xf32>
    %447 = arith.mulf %446, %445 : vector<8x128xf32>
    %448 = math.tanh %447 : vector<8x128xf32>
    %cst_160 = arith.constant 5.000000e-01 : f32
    %449 = vector.broadcast %cst_160 : f32 to vector<8x128xf32>
    %450 = arith.mulf %449, %448 : vector<8x128xf32>
    %cst_161 = arith.constant 5.000000e-01 : f32
    %451 = vector.broadcast %cst_161 : f32 to vector<8x128xf32>
    %452 = arith.addf %450, %451 : vector<8x128xf32>
    %453 = arith.mulf %442, %383 : vector<8x128xf32>
    %454 = arith.mulf %434, %444 : vector<8x128xf32>
    %455 = arith.addf %453, %454 : vector<8x128xf32>
    %456 = math.tanh %455 : vector<8x128xf32>
    %457 = arith.mulf %452, %456 : vector<8x128xf32>
    %c48 = arith.constant 48 : index
    %c0_162 = arith.constant 0 : index
    %458 = vector.load %arg4[%c48, %c0_162] : memref<64x512xf32, #tpu.memory_space<vmem>>, vector<8x512xf32>
    %459 = arith.truncf %421 : vector<8x128xf32> to vector<8x128xbf16>
    %c256_163 = arith.constant 256 : index
    %c0_164 = arith.constant 0 : index
    %460 = vector.load %arg1[%c256_163, %c0_164] : memref<768x512xbf16, #tpu.memory_space<vmem>>, vector<128x512xbf16>
    %cst_165 = arith.constant dense<0.000000e+00> : vector<8x512xf32>
    %461 = tpu.matmul %459, %460, %cst_165 {dimension_numbers = #tpu.dot_dimension_numbers<[1], [0], [0], [1], [0, 0, 1, 1], [], []>} : vector<8x128xbf16>, vector<128x512xbf16>, vector<8x512xf32> -> vector<8x512xf32>
    %462 = arith.addf %458, %461 : vector<8x512xf32>
    %463 = vector.extract_strided_slice %462 {offsets = [0, 0], sizes = [8, 128], strides = [1, 1]} : vector<8x512xf32> to vector<8x128xf32>
    %cst_166 = arith.constant 5.000000e-01 : f32
    %464 = vector.broadcast %cst_166 : f32 to vector<8x128xf32>
    %465 = arith.mulf %464, %463 : vector<8x128xf32>
    %466 = math.tanh %465 : vector<8x128xf32>
    %cst_167 = arith.constant 5.000000e-01 : f32
    %467 = vector.broadcast %cst_167 : f32 to vector<8x128xf32>
    %468 = arith.mulf %467, %466 : vector<8x128xf32>
    %cst_168 = arith.constant 5.000000e-01 : f32
    %469 = vector.broadcast %cst_168 : f32 to vector<8x128xf32>
    %470 = arith.addf %468, %469 : vector<8x128xf32>
    %471 = vector.extract_strided_slice %462 {offsets = [0, 128], sizes = [8, 128], strides = [1, 1]} : vector<8x512xf32> to vector<8x128xf32>
    %cst_169 = arith.constant 5.000000e-01 : f32
    %472 = vector.broadcast %cst_169 : f32 to vector<8x128xf32>
    %473 = arith.mulf %472, %471 : vector<8x128xf32>
    %474 = math.tanh %473 : vector<8x128xf32>
    %cst_170 = arith.constant 5.000000e-01 : f32
    %475 = vector.broadcast %cst_170 : f32 to vector<8x128xf32>
    %476 = arith.mulf %475, %474 : vector<8x128xf32>
    %cst_171 = arith.constant 5.000000e-01 : f32
    %477 = vector.broadcast %cst_171 : f32 to vector<8x128xf32>
    %478 = arith.addf %476, %477 : vector<8x128xf32>
    %479 = vector.extract_strided_slice %462 {offsets = [0, 256], sizes = [8, 128], strides = [1, 1]} : vector<8x512xf32> to vector<8x128xf32>
    %480 = math.tanh %479 : vector<8x128xf32>
    %481 = vector.extract_strided_slice %462 {offsets = [0, 384], sizes = [8, 128], strides = [1, 1]} : vector<8x512xf32> to vector<8x128xf32>
    %cst_172 = arith.constant 5.000000e-01 : f32
    %482 = vector.broadcast %cst_172 : f32 to vector<8x128xf32>
    %483 = arith.mulf %482, %481 : vector<8x128xf32>
    %484 = math.tanh %483 : vector<8x128xf32>
    %cst_173 = arith.constant 5.000000e-01 : f32
    %485 = vector.broadcast %cst_173 : f32 to vector<8x128xf32>
    %486 = arith.mulf %485, %484 : vector<8x128xf32>
    %cst_174 = arith.constant 5.000000e-01 : f32
    %487 = vector.broadcast %cst_174 : f32 to vector<8x128xf32>
    %488 = arith.addf %486, %487 : vector<8x128xf32>
    %489 = arith.mulf %478, %419 : vector<8x128xf32>
    %490 = arith.mulf %470, %480 : vector<8x128xf32>
    %491 = arith.addf %489, %490 : vector<8x128xf32>
    %492 = math.tanh %491 : vector<8x128xf32>
    %493 = arith.mulf %488, %492 : vector<8x128xf32>
    %494 = tpu.concatenate %493, %457 in 1 : vector<8x128xf32>, vector<8x128xf32> -> vector<8x256xf32>
    %495 = arith.truncf %494 : vector<8x256xf32> to vector<8x256xbf16>
    %c384_175 = arith.constant 384 : index
    %c0_176 = arith.constant 0 : index
    %496 = vector.load %arg1[%c384_175, %c0_176] : memref<768x512xbf16, #tpu.memory_space<vmem>>, vector<256x512xbf16>
    %cst_177 = arith.constant dense<0.000000e+00> : vector<8x512xf32>
    %497 = tpu.matmul %495, %496, %cst_177 {dimension_numbers = #tpu.dot_dimension_numbers<[1], [0], [0], [1], [0, 0, 1, 1], [], []>} : vector<8x256xbf16>, vector<256x512xbf16>, vector<8x512xf32> -> vector<8x512xf32>
    %498 = arith.addf %24, %497 : vector<8x512xf32>
    %499 = vector.extract_strided_slice %498 {offsets = [0, 0], sizes = [8, 128], strides = [1, 1]} : vector<8x512xf32> to vector<8x128xf32>
    %cst_178 = arith.constant 5.000000e-01 : f32
    %500 = vector.broadcast %cst_178 : f32 to vector<8x128xf32>
    %501 = arith.mulf %500, %499 : vector<8x128xf32>
    %502 = math.tanh %501 : vector<8x128xf32>
    %cst_179 = arith.constant 5.000000e-01 : f32
    %503 = vector.broadcast %cst_179 : f32 to vector<8x128xf32>
    %504 = arith.mulf %503, %502 : vector<8x128xf32>
    %cst_180 = arith.constant 5.000000e-01 : f32
    %505 = vector.broadcast %cst_180 : f32 to vector<8x128xf32>
    %506 = arith.addf %504, %505 : vector<8x128xf32>
    %507 = vector.extract_strided_slice %498 {offsets = [0, 128], sizes = [8, 128], strides = [1, 1]} : vector<8x512xf32> to vector<8x128xf32>
    %cst_181 = arith.constant 5.000000e-01 : f32
    %508 = vector.broadcast %cst_181 : f32 to vector<8x128xf32>
    %509 = arith.mulf %508, %507 : vector<8x128xf32>
    %510 = math.tanh %509 : vector<8x128xf32>
    %cst_182 = arith.constant 5.000000e-01 : f32
    %511 = vector.broadcast %cst_182 : f32 to vector<8x128xf32>
    %512 = arith.mulf %511, %510 : vector<8x128xf32>
    %cst_183 = arith.constant 5.000000e-01 : f32
    %513 = vector.broadcast %cst_183 : f32 to vector<8x128xf32>
    %514 = arith.addf %512, %513 : vector<8x128xf32>
    %515 = vector.extract_strided_slice %498 {offsets = [0, 256], sizes = [8, 128], strides = [1, 1]} : vector<8x512xf32> to vector<8x128xf32>
    %516 = math.tanh %515 : vector<8x128xf32>
    %517 = vector.extract_strided_slice %498 {offsets = [0, 384], sizes = [8, 128], strides = [1, 1]} : vector<8x512xf32> to vector<8x128xf32>
    %cst_184 = arith.constant 5.000000e-01 : f32
    %518 = vector.broadcast %cst_184 : f32 to vector<8x128xf32>
    %519 = arith.mulf %518, %517 : vector<8x128xf32>
    %520 = math.tanh %519 : vector<8x128xf32>
    %cst_185 = arith.constant 5.000000e-01 : f32
    %521 = vector.broadcast %cst_185 : f32 to vector<8x128xf32>
    %522 = arith.mulf %521, %520 : vector<8x128xf32>
    %cst_186 = arith.constant 5.000000e-01 : f32
    %523 = vector.broadcast %cst_186 : f32 to vector<8x128xf32>
    %524 = arith.addf %522, %523 : vector<8x128xf32>
    %525 = arith.mulf %514, %455 : vector<8x128xf32>
    %526 = arith.mulf %506, %516 : vector<8x128xf32>
    %527 = arith.addf %525, %526 : vector<8x128xf32>
    %528 = math.tanh %527 : vector<8x128xf32>
    %529 = arith.mulf %524, %528 : vector<8x128xf32>
    %c56 = arith.constant 56 : index
    %c0_187 = arith.constant 0 : index
    %530 = vector.load %arg4[%c56, %c0_187] : memref<64x512xf32, #tpu.memory_space<vmem>>, vector<8x512xf32>
    %531 = arith.truncf %493 : vector<8x128xf32> to vector<8x128xbf16>
    %c256_188 = arith.constant 256 : index
    %c0_189 = arith.constant 0 : index
    %532 = vector.load %arg1[%c256_188, %c0_189] : memref<768x512xbf16, #tpu.memory_space<vmem>>, vector<128x512xbf16>
    %cst_190 = arith.constant dense<0.000000e+00> : vector<8x512xf32>
    %533 = tpu.matmul %531, %532, %cst_190 {dimension_numbers = #tpu.dot_dimension_numbers<[1], [0], [0], [1], [0, 0, 1, 1], [], []>} : vector<8x128xbf16>, vector<128x512xbf16>, vector<8x512xf32> -> vector<8x512xf32>
    %534 = arith.addf %530, %533 : vector<8x512xf32>
    %535 = vector.extract_strided_slice %534 {offsets = [0, 0], sizes = [8, 128], strides = [1, 1]} : vector<8x512xf32> to vector<8x128xf32>
    %cst_191 = arith.constant 5.000000e-01 : f32
    %536 = vector.broadcast %cst_191 : f32 to vector<8x128xf32>
    %537 = arith.mulf %536, %535 : vector<8x128xf32>
    %538 = math.tanh %537 : vector<8x128xf32>
    %cst_192 = arith.constant 5.000000e-01 : f32
    %539 = vector.broadcast %cst_192 : f32 to vector<8x128xf32>
    %540 = arith.mulf %539, %538 : vector<8x128xf32>
    %cst_193 = arith.constant 5.000000e-01 : f32
    %541 = vector.broadcast %cst_193 : f32 to vector<8x128xf32>
    %542 = arith.addf %540, %541 : vector<8x128xf32>
    %543 = vector.extract_strided_slice %534 {offsets = [0, 128], sizes = [8, 128], strides = [1, 1]} : vector<8x512xf32> to vector<8x128xf32>
    %cst_194 = arith.constant 5.000000e-01 : f32
    %544 = vector.broadcast %cst_194 : f32 to vector<8x128xf32>
    %545 = arith.mulf %544, %543 : vector<8x128xf32>
    %546 = math.tanh %545 : vector<8x128xf32>
    %cst_195 = arith.constant 5.000000e-01 : f32
    %547 = vector.broadcast %cst_195 : f32 to vector<8x128xf32>
    %548 = arith.mulf %547, %546 : vector<8x128xf32>
    %cst_196 = arith.constant 5.000000e-01 : f32
    %549 = vector.broadcast %cst_196 : f32 to vector<8x128xf32>
    %550 = arith.addf %548, %549 : vector<8x128xf32>
    %551 = vector.extract_strided_slice %534 {offsets = [0, 256], sizes = [8, 128], strides = [1, 1]} : vector<8x512xf32> to vector<8x128xf32>
    %552 = math.tanh %551 : vector<8x128xf32>
    %553 = vector.extract_strided_slice %534 {offsets = [0, 384], sizes = [8, 128], strides = [1, 1]} : vector<8x512xf32> to vector<8x128xf32>
    %cst_197 = arith.constant 5.000000e-01 : f32
    %554 = vector.broadcast %cst_197 : f32 to vector<8x128xf32>
    %555 = arith.mulf %554, %553 : vector<8x128xf32>
    %556 = math.tanh %555 : vector<8x128xf32>
    %cst_198 = arith.constant 5.000000e-01 : f32
    %557 = vector.broadcast %cst_198 : f32 to vector<8x128xf32>
    %558 = arith.mulf %557, %556 : vector<8x128xf32>
    %cst_199 = arith.constant 5.000000e-01 : f32
    %559 = vector.broadcast %cst_199 : f32 to vector<8x128xf32>
    %560 = arith.addf %558, %559 : vector<8x128xf32>
    %561 = arith.mulf %550, %491 : vector<8x128xf32>
    %562 = arith.mulf %542, %552 : vector<8x128xf32>
    %563 = arith.addf %561, %562 : vector<8x128xf32>
    %564 = math.tanh %563 : vector<8x128xf32>
    %565 = arith.mulf %560, %564 : vector<8x128xf32>
    %566 = tpu.concatenate %565, %529 in 1 : vector<8x128xf32>, vector<8x128xf32> -> vector<8x256xf32>
    %567 = arith.truncf %566 : vector<8x256xf32> to vector<8x256xbf16>
    %c384_200 = arith.constant 384 : index
    %c0_201 = arith.constant 0 : index
    %568 = vector.load %arg1[%c384_200, %c0_201] : memref<768x512xbf16, #tpu.memory_space<vmem>>, vector<256x512xbf16>
    %cst_202 = arith.constant dense<0.000000e+00> : vector<8x512xf32>
    %569 = tpu.matmul %567, %568, %cst_202 {dimension_numbers = #tpu.dot_dimension_numbers<[1], [0], [0], [1], [0, 0, 1, 1], [], []>} : vector<8x256xbf16>, vector<256x512xbf16>, vector<8x512xf32> -> vector<8x512xf32>
    %570 = arith.addf %24, %569 : vector<8x512xf32>
    %571 = vector.extract_strided_slice %570 {offsets = [0, 0], sizes = [8, 128], strides = [1, 1]} : vector<8x512xf32> to vector<8x128xf32>
    %cst_203 = arith.constant 5.000000e-01 : f32
    %572 = vector.broadcast %cst_203 : f32 to vector<8x128xf32>
    %573 = arith.mulf %572, %571 : vector<8x128xf32>
    %574 = math.tanh %573 : vector<8x128xf32>
    %cst_204 = arith.constant 5.000000e-01 : f32
    %575 = vector.broadcast %cst_204 : f32 to vector<8x128xf32>
    %576 = arith.mulf %575, %574 : vector<8x128xf32>
    %cst_205 = arith.constant 5.000000e-01 : f32
    %577 = vector.broadcast %cst_205 : f32 to vector<8x128xf32>
    %578 = arith.addf %576, %577 : vector<8x128xf32>
    %579 = vector.extract_strided_slice %570 {offsets = [0, 128], sizes = [8, 128], strides = [1, 1]} : vector<8x512xf32> to vector<8x128xf32>
    %cst_206 = arith.constant 5.000000e-01 : f32
    %580 = vector.broadcast %cst_206 : f32 to vector<8x128xf32>
    %581 = arith.mulf %580, %579 : vector<8x128xf32>
    %582 = math.tanh %581 : vector<8x128xf32>
    %cst_207 = arith.constant 5.000000e-01 : f32
    %583 = vector.broadcast %cst_207 : f32 to vector<8x128xf32>
    %584 = arith.mulf %583, %582 : vector<8x128xf32>
    %cst_208 = arith.constant 5.000000e-01 : f32
    %585 = vector.broadcast %cst_208 : f32 to vector<8x128xf32>
    %586 = arith.addf %584, %585 : vector<8x128xf32>
    %587 = vector.extract_strided_slice %570 {offsets = [0, 256], sizes = [8, 128], strides = [1, 1]} : vector<8x512xf32> to vector<8x128xf32>
    %588 = math.tanh %587 : vector<8x128xf32>
    %589 = vector.extract_strided_slice %570 {offsets = [0, 384], sizes = [8, 128], strides = [1, 1]} : vector<8x512xf32> to vector<8x128xf32>
    %cst_209 = arith.constant 5.000000e-01 : f32
    %590 = vector.broadcast %cst_209 : f32 to vector<8x128xf32>
    %591 = arith.mulf %590, %589 : vector<8x128xf32>
    %592 = math.tanh %591 : vector<8x128xf32>
    %cst_210 = arith.constant 5.000000e-01 : f32
    %593 = vector.broadcast %cst_210 : f32 to vector<8x128xf32>
    %594 = arith.mulf %593, %592 : vector<8x128xf32>
    %cst_211 = arith.constant 5.000000e-01 : f32
    %595 = vector.broadcast %cst_211 : f32 to vector<8x128xf32>
    %596 = arith.addf %594, %595 : vector<8x128xf32>
    %597 = arith.mulf %586, %527 : vector<8x128xf32>
    %598 = arith.mulf %578, %588 : vector<8x128xf32>
    %599 = arith.addf %597, %598 : vector<8x128xf32>
    %600 = math.tanh %599 : vector<8x128xf32>
    %601 = arith.mulf %596, %600 : vector<8x128xf32>
    %602 = arith.truncf %601 : vector<8x128xf32> to vector<8x128xbf16>
    %c640 = arith.constant 640 : index
    %c0_212 = arith.constant 0 : index
    %603 = vector.load %arg1[%c640, %c0_212] : memref<768x512xbf16, #tpu.memory_space<vmem>>, vector<128x128xbf16>
    %cst_213 = arith.constant dense<0.000000e+00> : vector<8x128xf32>
    %604 = tpu.matmul %602, %603, %cst_213 {dimension_numbers = #tpu.dot_dimension_numbers<[1], [0], [0], [1], [0, 0, 1, 1], [], []>} : vector<8x128xbf16>, vector<128x128xbf16>, vector<8x128xf32> -> vector<8x128xf32>
    %c3 = arith.constant 3 : index
    %c0_214 = arith.constant 0 : index
    %605 = vector.load %arg2[%c3, %c0_214] : memref<8x512xf32, #tpu.memory_space<vmem>>, vector<1x128xf32>
    %606 = vector.broadcast %605 : vector<1x128xf32> to vector<8x128xf32>
    %607 = arith.addf %604, %606 : vector<8x128xf32>
    %cst_215 = arith.constant dense<0xFF800000> : vector<8xf32>
    %608 = vector.multi_reduction <maximumf>, %607, %cst_215 [1] : vector<8x128xf32> to vector<8xf32>
    %609 = vector.shape_cast %608 : vector<8xf32> to vector<8x1xf32>
    %610 = vector.broadcast %609 : vector<8x1xf32> to vector<8x128xf32>
    %611 = arith.subf %607, %610 : vector<8x128xf32>
    %612 = math.exp %611 : vector<8x128xf32>
    %cst_216 = arith.constant dense<0.000000e+00> : vector<8xf32>
    %613 = vector.multi_reduction <add>, %612, %cst_216 [1] : vector<8x128xf32> to vector<8xf32>
    %614 = vector.shape_cast %613 : vector<8xf32> to vector<8x1xf32>
    %615 = math.log %614 : vector<8x1xf32>
    %616 = vector.broadcast %615 : vector<8x1xf32> to vector<8x128xf32>
    %617 = arith.subf %611, %616 : vector<8x128xf32>
    %c0_217 = arith.constant 0 : index
    %c0_218 = arith.constant 0 : index
    %618 = vector.load %arg3[%c0_217, %c0_218] : memref<8x128xf32, #tpu.memory_space<vmem>>, vector<8x128xf32>
    tpu.vector_store %arg3[%c0_217, %c0_218], %617 {strides = array<i32>} : memref<8x128xf32, #tpu.memory_space<vmem>>, vector<8x128xf32>,
    return
  }
}

</mosaic_0001>

<bundles_post_ra>
// kernel: cnn_lstm_forward.1
= control target key start
LH: loop header
LB: loop body
LE: loop exit
PB: predicated region body
PF: predicated region fallthrough
CT: control target
= control target key end

     0   :  { %v6801_v1 = vmov 0   ;;  %vm4073_vm0 = vmmov 0   ;;  %s6797_s1 = inlined_call_operand.vmem [shape: bf16[768,512], index: 1, kind: input, shape index: {}]   ;;  %s6798_s0 = inlined_call_operand.vmem [shape: bf16[64,128], index: 0, kind: input, shape index: {}]   ;;  %s6799_s2 = inlined_call_operand.vmem [shape: f32[8,512], index: 2, kind: input, shape index: {}]   ;;  %s6800_s3 = inlined_call_operand.vmem [shape: f32[8,128], index: 3, kind: output, shape index: {}]  }
   0x1   :  { %v3462_v0 = vld [vmem:[%s6797_s1 + $0x4] ss:$16 sps:$4 sm:$0xff]   ;;  %271 = vmatprep.mubr.bf16.mxu0 %v6801_v1  ;;  %344 = vmatprep.mubr.bf16.mxu1 %v6801_v1  ;;  %v3464_v2 = vld [vmem:[%s6797_s1 + $0xc] ss:$16 sps:$4 sm:$0xff]   ;;  %v3466_v3 = vld [vmem:[%s6797_s1] ss:$16 sps:$4 sm:$0xff]  }
   0x2   :  { %239 = vmatprep.subr.bf16.mxu0 %v3462_v0  ;;  %v3467_v4 = vld [vmem:[%s6797_s1 + $0x8] ss:$16 sps:$4 sm:$0xff]   ;;  %312 = vmatprep.subr.bf16.mxu1 %v3464_v2  ;;  %v3468_v5 = vld [vmem:[%s6797_s1 + $0x24] ss:$16 sps:$4 sm:$0xff]   ;;  %v3470_v6 = vld [vmem:[%s6797_s1 + $0x2c] ss:$16 sps:$4 sm:$0xff]  }
   0x3   :  { %240 = vmatpush1.bf16.msra.mxu0 %v3466_v3  ;;  %313 = vmatpush1.bf16.msra.mxu1 %v3467_v4  ;;  %v3472_v7 = vld [vmem:[%s6797_s1 + $0x20] ss:$16 sps:$4 sm:$0xff]   ;;  %v3473_v8 = vld [vmem:[%s6797_s1 + $0x28] ss:$16 sps:$4 sm:$0xff]   ;;  %v3474_v9 = vld [vmem:[%s6797_s1 + $0x44] ss:$16 sps:$4 sm:$0xff]  }
   0x4   :  { %241 = vmatprep.subr.bf16.mxu0 %v3468_v5  ;;  %314 = vmatprep.subr.bf16.mxu1 %v3470_v6  ;;  %v3476_v10 = vld [vmem:[%s6797_s1 + $0x4c] ss:$16 sps:$4 sm:$0xff]   ;;  %v3478_v11 = vld [vmem:[%s6797_s1 + $0x40] ss:$16 sps:$4 sm:$0xff]   ;;  %v3479_v12 = vld [vmem:[%s6797_s1 + $0x48] ss:$16 sps:$4 sm:$0xff]  }
   0x5   :  { %v3480_v13 = vld [vmem:[%s6797_s1 + $0x64] ss:$16 sps:$4 sm:$0xff]   ;;  %v3482_v14 = vld [vmem:[%s6797_s1 + $0x6c] ss:$16 sps:$4 sm:$0xff]   ;;  %v3484_v15 = vld [vmem:[%s6797_s1 + $0x60] ss:$16 sps:$4 sm:$0xff]  }
   0x6   :  { %v3485_v16 = vld [vmem:[%s6797_s1 + $0x68] ss:$16 sps:$4 sm:$0xff]   ;;  %v3486_v17 = vld [vmem:[%s6797_s1 + $0x84] ss:$16 sps:$4 sm:$0xff]   ;;  %v3488_v18 = vld [vmem:[%s6797_s1 + $0x8c] ss:$16 sps:$4 sm:$0xff]  }
   0x7   :  { %242 = vmatpush1.bf16.msra.mxu0 %v3472_v7  ;;  %315 = vmatpush1.bf16.msra.mxu1 %v3473_v8  ;;  %v3490_v19 = vld [vmem:[%s6797_s1 + $0x80] ss:$16 sps:$4 sm:$0xff]   ;;  %v3491_v20 = vld [vmem:[%s6797_s1 + $0x88] ss:$16 sps:$4 sm:$0xff]   ;;  %v3492_v21 = vld [vmem:[%s6797_s1 + $0xa4] ss:$16 sps:$4 sm:$0xff]  }
   0x8   :  { %243 = vmatprep.subr.bf16.mxu0 %v3474_v9  ;;  %316 = vmatprep.subr.bf16.mxu1 %v3476_v10  ;;  %v3494_v22 = vld [vmem:[%s6797_s1 + $0xac] ss:$16 sps:$4 sm:$0xff]   ;;  %v3496_v23 = vld [vmem:[%s6797_s1 + $0xa0] ss:$16 sps:$4 sm:$0xff]   ;;  %v3497_v24 = vld [vmem:[%s6797_s1 + $0xa8] ss:$16 sps:$4 sm:$0xff]  }
   0x9   :  { %v3498_v25 = vld [vmem:[%s6797_s1 + $0xc4] ss:$16 sps:$4 sm:$0xff]   ;;  %v3500_v26 = vld [vmem:[%s6797_s1 + $0xcc] ss:$16 sps:$4 sm:$0xff]   ;;  %v3502_v27 = vld [vmem:[%s6797_s1 + $0xc0] ss:$16 sps:$4 sm:$0xff]  }
   0xa   :  { %v3503_v28 = vld [vmem:[%s6797_s1 + $0xc8] ss:$16 sps:$4 sm:$0xff]   ;;  %v3504_v29 = vld [vmem:[%s6797_s1 + $0xe4] ss:$16 sps:$4 sm:$0xff]   ;;  %v3506_v30 = vld [vmem:[%s6797_s1 + $0xec] ss:$16 sps:$4 sm:$0xff]  }
   0xb   :  { %244 = vmatpush1.bf16.msra.mxu0 %v3478_v11  ;;  %317 = vmatpush1.bf16.msra.mxu1 %v3479_v12  ;;  %v3508_v31 = vld [vmem:[%s6797_s1 + $0xe0] ss:$16 sps:$4 sm:$0xff]   ;;  %v3509_v32 = vld [vmem:[%s6797_s1 + $0xe8] ss:$16 sps:$4 sm:$0xff]   ;;  %v3516_v33 = vld [vmem:[%s6797_s1 + $0x104] ss:$16 sps:$4 sm:$0xff]  }
   0xc   :  { %245 = vmatprep.subr.bf16.mxu0 %v3480_v13  ;;  %318 = vmatprep.subr.bf16.mxu1 %v3482_v14  ;;  %v3519_v34 = vld [vmem:[%s6797_s1 + $0x10c] ss:$16 sps:$4 sm:$0xff]   ;;  %v3510_v35 = vld [vmem:[%s6798_s0] sm:$0xff]   ;;  %v3517_v37 = vld [vmem:[%s6797_s1 + $0x108] ss:$16 sps:$4 sm:$0xff]  }
   0xd   :  { %v3514_v36 = vld [vmem:[%s6797_s1 + $0x100] ss:$16 sps:$4 sm:$0xff]   ;;  %v3522_v38 = vld [vmem:[%s6797_s1 + $0x124] ss:$16 sps:$4 sm:$0xff]   ;;  %v3525_v39 = vld [vmem:[%s6797_s1 + $0x12c] ss:$16 sps:$4 sm:$0xff]  }
   0xe   :  { %v3520_v40 = vld [vmem:[%s6797_s1 + $0x120] ss:$16 sps:$4 sm:$0xff]   ;;  %v3511_v41 = vld [vmem:[%s6798_s0 + $0x8] sm:$0xff]   ;;  %v3528_v43 = vld [vmem:[%s6797_s1 + $0x144] ss:$16 sps:$4 sm:$0xff]  }
   0xf   :  { %246 = vmatpush1.bf16.msra.mxu0 %v3484_v15  ;;  %319 = vmatpush1.bf16.msra.mxu1 %v3485_v16  ;;  %v3523_v42 = vld [vmem:[%s6797_s1 + $0x128] ss:$16 sps:$4 sm:$0xff]   ;;  %v3531_v44 = vld [vmem:[%s6797_s1 + $0x14c] ss:$16 sps:$4 sm:$0xff]   ;;  %v3526_v45 = vld [vmem:[%s6797_s1 + $0x140] ss:$16 sps:$4 sm:$0xff]  }
  0x10   :  { %247 = vmatprep.subr.bf16.mxu0 %v3486_v17  ;;  %320 = vmatprep.subr.bf16.mxu1 %v3488_v18  ;;  %v3529_v46 = vld [vmem:[%s6797_s1 + $0x148] ss:$16 sps:$4 sm:$0xff]   ;;  %v3534_v47 = vld [vmem:[%s6797_s1 + $0x164] ss:$16 sps:$4 sm:$0xff]   ;;  %v3537_v48 = vld [vmem:[%s6797_s1 + $0x16c] ss:$16 sps:$4 sm:$0xff]  }
  0x11   :  { %v3532_v49 = vld [vmem:[%s6797_s1 + $0x160] ss:$16 sps:$4 sm:$0xff]   ;;  %v3535_v50 = vld [vmem:[%s6797_s1 + $0x168] ss:$16 sps:$4 sm:$0xff]   ;;  %v3540_v51 = vld [vmem:[%s6797_s1 + $0x184] ss:$16 sps:$4 sm:$0xff]  }
  0x12   :  { %v3543_v52 = vld [vmem:[%s6797_s1 + $0x18c] ss:$16 sps:$4 sm:$0xff]   ;;  %v3512_v53 = vld [vmem:[%s6798_s0 + $0x10] sm:$0xff]   ;;  %v3541_v55 = vld [vmem:[%s6797_s1 + $0x188] ss:$16 sps:$4 sm:$0xff]  }
  0x13   :  { %248 = vmatpush1.bf16.msra.mxu0 %v3490_v19  ;;  %321 = vmatpush1.bf16.msra.mxu1 %v3491_v20  ;;  %v3538_v54 = vld [vmem:[%s6797_s1 + $0x180] ss:$16 sps:$4 sm:$0xff]   ;;  %v3513_v56 = vld [vmem:[%s6798_s0 + $0x18] sm:$0xff]   ;;  %v3546_v57 = vld [vmem:[%s6797_s1 + $0x1a4] ss:$16 sps:$4 sm:$0xff]  }
  0x14   :  { %249 = vmatprep.subr.bf16.mxu0 %v3492_v21  ;;  %322 = vmatprep.subr.bf16.mxu1 %v3494_v22  ;;  %v3549_v58 = vld [vmem:[%s6797_s1 + $0x1ac] ss:$16 sps:$4 sm:$0xff]   ;;  %v3544_v59 = vld [vmem:[%s6797_s1 + $0x1a0] ss:$16 sps:$4 sm:$0xff]   ;;  %v3547_v60 = vld [vmem:[%s6797_s1 + $0x1a8] ss:$16 sps:$4 sm:$0xff]  }
  0x15   :  { %v3552_v61 = vld [vmem:[%s6797_s1 + $0x1c4] ss:$16 sps:$4 sm:$0xff]   ;;  %v3555_v62 = vld [vmem:[%s6797_s1 + $0x1cc] ss:$16 sps:$4 sm:$0xff]   ;;  %v3550_v63 = vld [vmem:[%s6797_s1 + $0x1c0] ss:$16 sps:$4 sm:$0xff]  }
  0x16   :  { %v3553_v0 = vld [vmem:[%s6797_s1 + $0x1c8] ss:$16 sps:$4 sm:$0xff]   ;;  %v3558_v2 = vld [vmem:[%s6797_s1 + $0x1e4] ss:$16 sps:$4 sm:$0xff]   ;;  %v3561_v3 = vld [vmem:[%s6797_s1 + $0x1ec] ss:$16 sps:$4 sm:$0xff]  }
  0x17   :  { %250 = vmatpush1.bf16.msra.mxu0 %v3496_v23  ;;  %323 = vmatpush1.bf16.msra.mxu1 %v3497_v24  ;;  %v3556_v4 = vld [vmem:[%s6797_s1 + $0x1e0] ss:$16 sps:$4 sm:$0xff]   ;;  %v3559_v5 = vld [vmem:[%s6797_s1 + $0x1e8] ss:$16 sps:$4 sm:$0xff]   ;;  %v4311_v6 = vld [vmem:[%s6797_s1 + $0x204] ss:$16 sps:$4 sm:$0xff]  }
  0x18   :  { %251 = vmatprep.subr.bf16.mxu0 %v3498_v25  ;;  %324 = vmatprep.subr.bf16.mxu1 %v3500_v26  ;;  %7107 = vst [vmem:[#allocation3_spill] sm:$0xff] %v4311_v6  ;;  %v4316_v7 = vld [vmem:[%s6797_s1 + $0x20c] ss:$16 sps:$4 sm:$0xff]   ;;  %v4323_v16 = vld [vmem:[%s6799_s2] ss:$0 sm:$0xff] }
  0x19   :  { %7108 = vst [vmem:[#allocation4_spill] sm:$0xff] %v4316_v7 }
  0x1b   :  { %252 = vmatpush1.bf16.msra.mxu0 %v3502_v27  ;;  %325 = vmatpush1.bf16.msra.mxu1 %v3503_v28 }
  0x1c   :  { %253 = vmatprep.subr.bf16.mxu0 %v3504_v29  ;;  %326 = vmatprep.subr.bf16.mxu1 %v3506_v30 }
  0x1f   :  { %254 = vmatpush1.bf16.msra.mxu0 %v3508_v31  ;;  %327 = vmatpush1.bf16.msra.mxu1 %v3509_v32 }
  0x20   :  { %645 = vmatprep.subr.bf16.mxu0 %v3516_v33  ;;  %718 = vmatprep.subr.bf16.mxu1 %v3519_v34 }
  0x22   :  { %272 = vmatmul.mubr.bf16.vlgmr.msra.gmra.mrb[0].mxu0 %v3510_v35  ;;  %345 = vmatmul.mubr.bf16.vlgmr.msra.gmra.mrb[0].mxu1 %v3510_v35 }
  0x23   :  { %281 = vmatprep.mubr.bf16.mxu0 %v6801_v1  ;;  %354 = vmatprep.mubr.bf16.mxu1 %v6801_v1 }
  0x24   :  { %646 = vmatpush1.bf16.msra.mxu0 %v3514_v36  ;;  %719 = vmatpush1.bf16.msra.mxu1 %v3517_v37  ;;  %v4330_v37 = vld [vmem:[%s6797_s1 + $0x200] ss:$16 sps:$4 sm:$0xff]  }
  0x25   :  { %647 = vmatprep.subr.bf16.mxu0 %v3522_v38  ;;  %720 = vmatprep.subr.bf16.mxu1 %v3525_v39  ;;  %v4335_v38 = vld [vmem:[%s6797_s1 + $0x208] ss:$16 sps:$4 sm:$0xff]  }
  0x28   :  { %648 = vmatpush1.bf16.msra.mxu0 %v3520_v40  ;;  %721 = vmatpush1.bf16.msra.mxu1 %v3523_v42 }
  0x29   :  { %649 = vmatprep.subr.bf16.mxu0 %v3528_v43  ;;  %722 = vmatprep.subr.bf16.mxu1 %v3531_v44  ;;  %v4340_v43 = vld [vmem:[%s6797_s1 + $0x224] ss:$16 sps:$4 sm:$0xff]   ;;  %v4345_v44 = vld [vmem:[%s6797_s1 + $0x22c] ss:$16 sps:$4 sm:$0xff]  }
  0x2a   :  { %282 = vmatmul.mubr.bf16.gmra.mrb[4].mxu0 %v3511_v41  ;;  %355 = vmatmul.mubr.bf16.gmra.mrb[4].mxu1 %v3511_v41 }
  0x2b   :  { %291 = vmatprep.mubr.bf16.mxu0 %v6801_v1  ;;  %364 = vmatprep.mubr.bf16.mxu1 %v6801_v1 }
  0x2c   :  { %650 = vmatpush1.bf16.msra.mxu0 %v3526_v45  ;;  %723 = vmatpush1.bf16.msra.mxu1 %v3529_v46 }
  0x2d   :  { %651 = vmatprep.subr.bf16.mxu0 %v3534_v47  ;;  %724 = vmatprep.subr.bf16.mxu1 %v3537_v48  ;;  %v4353_v47 = vld [vmem:[%s6797_s1 + $0x220] ss:$16 sps:$4 sm:$0xff]   ;;  %v4358_v48 = vld [vmem:[%s6797_s1 + $0x228] ss:$16 sps:$4 sm:$0xff]  }
  0x30   :  { %652 = vmatpush1.bf16.msra.mxu0 %v3532_v49  ;;  %725 = vmatpush1.bf16.msra.mxu1 %v3535_v50 }
  0x31   :  { %653 = vmatprep.subr.bf16.mxu0 %v3540_v51  ;;  %726 = vmatprep.subr.bf16.mxu1 %v3543_v52  ;;  %v4366_v52 = vld [vmem:[%s6797_s1 + $0x244] ss:$16 sps:$4 sm:$0xff]  }
  0x32   :  { %292 = vmatmul.mubr.bf16.gmra.mrb[8].mxu0 %v3512_v53  ;;  %365 = vmatmul.mubr.bf16.gmra.mrb[8].mxu1 %v3512_v53 }
  0x33   :  { %301 = vmatprep.mubr.bf16.mxu0 %v6801_v1  ;;  %374 = vmatprep.mubr.bf16.mxu1 %v6801_v1 }
  0x34   :  { %654 = vmatpush1.bf16.msra.mxu0 %v3538_v54  ;;  %727 = vmatpush1.bf16.msra.mxu1 %v3541_v55  ;;  %v4373_v55 = vld [vmem:[%s6797_s1 + $0x24c] ss:$16 sps:$4 sm:$0xff]  }
  0x35   :  { %655 = vmatprep.subr.bf16.mxu0 %v3546_v57  ;;  %728 = vmatprep.subr.bf16.mxu1 %v3549_v58 }
  0x38   :  { %656 = vmatpush1.bf16.msra.mxu0 %v3544_v59  ;;  %729 = vmatpush1.bf16.msra.mxu1 %v3547_v60 }
  0x39   :  { %657 = vmatprep.subr.bf16.mxu0 %v3552_v61  ;;  %730 = vmatprep.subr.bf16.mxu1 %v3555_v62 }
  0x3a   :  { %302 = vmatmul.mubr.bf16.gmra.mrb[12].mxu0 %v3513_v56  ;;  %375 = vmatmul.mubr.bf16.gmra.mrb[12].mxu1 %v3513_v56 }
  0x3b   :  { %677 = vmatprep.mubr.bf16.mxu0 %v6801_v1  ;;  %750 = vmatprep.mubr.bf16.mxu1 %v6801_v1 }
  0x3c   :  { %658 = vmatpush1.bf16.msra.mxu0 %v3550_v63  ;;  %731 = vmatpush1.bf16.msra.mxu1 %v3553_v0  ;;  %v4380_v0 = vld [vmem:[%s6797_s1 + $0x240] ss:$16 sps:$4 sm:$0xff]  }
  0x3d   :  { %659 = vmatprep.subr.bf16.mxu0 %v3558_v2  ;;  %732 = vmatprep.subr.bf16.mxu1 %v3561_v3  ;;  %v4385_v2 = vld [vmem:[%s6797_s1 + $0x248] ss:$16 sps:$4 sm:$0xff]  }
  0x40   :  { %660 = vmatpush1.bf16.msra.mxu0 %v3556_v4  ;;  %733 = vmatpush1.bf16.msra.mxu1 %v3559_v5 }
  0x41   :  { %1042 = vmatprep.subr.bf16.mxu0 %v4311_v6  ;;  %1083 = vmatprep.subr.bf16.mxu1 %v4316_v7 }
  0xf5   :  { %v273_v8 = vpop.f32.mrb[0].mxu0  ;;  %v346_v9 = vpop.f32.mrb[0].mxu1 }
  0xf6   :  { %v275_v10 = vpop.f32.mrb[1].mxu0  ;;  %v348_v11 = vpop.f32.mrb[1].mxu1 }
  0xf7   :  { %v385_v12 = vmax.f32 %v273_v8, %v275_v10  ;;  %v393_v13 = vmax.f32 %v346_v9, %v348_v11  ;;  %v277_v14 = vpop.f32.mrb[2].mxu0  ;;  %v350_v15 = vpop.f32.mrb[2].mxu1  ;;  %v4391_v9 = vld [vmem:[%s6797_s1 + $0x264] ss:$16 sps:$4 sm:$0xff]   ;;  %v4396_v10 = vld [vmem:[%s6797_s1 + $0x26c] ss:$16 sps:$4 sm:$0xff]  }
  0xf8   :  { %v279_v17 = vpop.f32.mrb[3].mxu0  ;;  %v352_v18 = vpop.f32.mrb[3].mxu1 }
  0xf9   :  { %v401_v19 = vmax.f32 %v385_v12, %v393_v13  ;;  %v386_v20 = vmax.f32 %v277_v14, %v279_v17  ;;  %v394_v21 = vmax.f32 %v350_v15, %v352_v18  ;;  %v4405_v13 = vld [vmem:[%s6797_s1 + $0x260] ss:$16 sps:$4 sm:$0xff]   ;;  %v4410_v14 = vld [vmem:[%s6797_s1 + $0x268] ss:$16 sps:$4 sm:$0xff]  }
  0xfb   :  { %v410_v22 = vadd.f32 %v4323_v16, %v401_v19  ;;  %v402_v23 = vmax.f32 %v386_v20, %v394_v21  ;;  %v4418_v19 = vld [vmem:[%s6797_s1 + $0x284] ss:$16 sps:$4 sm:$0xff]  }
  0xfd   :  { %v411_v24 = vadd.f32 %v4323_v16, %v402_v23  ;;  %v283_v25 = vpop.f32.mrb[4].mxu0  ;;  %v356_v26 = vpop.f32.mrb[4].mxu1  ;;  %v418_v29 = vmax.f32 %v410_v22, 0.0  ;;  %v4425_v22 = vld [vmem:[%s6797_s1 + $0x28c] ss:$16 sps:$4 sm:$0xff]  }
  0xfe   :  { %v285_v27 = vpop.f32.mrb[5].mxu0  ;;  %v358_v28 = vpop.f32.mrb[5].mxu1 }
  0xff   :  { %v419_v30 = vmax.f32 %v411_v24, 0.0  ;;  %v387_v31 = vmax.f32 %v283_v25, %v285_v27  ;;  %v395_v32 = vmax.f32 %v356_v26, %v358_v28  ;;  %v287_v33 = vpop.f32.mrb[6].mxu0  ;;  %v360_v34 = vpop.f32.mrb[6].mxu1 }
 0x100   :  { %v289_v35 = vpop.f32.mrb[7].mxu0  ;;  %v362_v36 = vpop.f32.mrb[7].mxu1 }
 0x101   :  { %v426_v39 = vpack.c.bf16 %v419_v30, %v418_v29  ;;  %v403_v40 = vmax.f32 %v387_v31, %v395_v32  ;;  %v388_v41 = vmax.f32 %v287_v33, %v289_v35  ;;  %v396_v42 = vmax.f32 %v360_v34, %v362_v36  ;;  %v4432_v31 = vld [vmem:[%s6797_s1 + $0x280] ss:$16 sps:$4 sm:$0xff]   ;;  %v4437_v32 = vld [vmem:[%s6797_s1 + $0x288] ss:$16 sps:$4 sm:$0xff]  }
 0x103   :  { %v412_v45 = vadd.f32 %v4323_v16, %v403_v40  ;;  %v404_v46 = vmax.f32 %v388_v41, %v396_v42  ;;  %678 = vmatmul.mubr.bf16.vlgmr.msra.gmra.mrb[16].mxu0 %v426_v39  ;;  %751 = vmatmul.mubr.bf16.vlgmr.msra.gmra.mrb[16].mxu1 %v426_v39  ;;  %v4443_v39 = vld [vmem:[%s6797_s1 + $0x2a4] ss:$16 sps:$4 sm:$0xff]   ;;  %v4448_v40 = vld [vmem:[%s6797_s1 + $0x2ac] ss:$16 sps:$4 sm:$0xff]  }
 0x104   :  { %1043 = vmatpush1.bf16.msra.mxu0 %v4330_v37  ;;  %1084 = vmatpush1.bf16.msra.mxu1 %v4335_v38 }
 0x105   :  { %v413_v49 = vadd.f32 %v4323_v16, %v404_v46  ;;  %v293_v50 = vpop.f32.mrb[8].mxu0  ;;  %v366_v51 = vpop.f32.mrb[8].mxu1  ;;  %1044 = vmatprep.subr.bf16.mxu0 %v4340_v43  ;;  %1085 = vmatprep.subr.bf16.mxu1 %v4345_v44  ;;  %v420_v56 = vmax.f32 %v412_v45, 0.0  ;;  %v4457_v45 = vld [vmem:[%s6797_s1 + $0x2a0] ss:$16 sps:$4 sm:$0xff]  }
 0x106   :  { %v295_v53 = vpop.f32.mrb[9].mxu0  ;;  %v368_v54 = vpop.f32.mrb[9].mxu1  ;;  %687 = vmatprep.mubr.bf16.mxu0 %v6801_v1  ;;  %760 = vmatprep.mubr.bf16.mxu1 %v6801_v1  ;;  %v4462_v46 = vld [vmem:[%s6797_s1 + $0x2a8] ss:$16 sps:$4 sm:$0xff]  }
 0x107   :  { %v421_v57 = vmax.f32 %v413_v49, 0.0  ;;  %v389_v58 = vmax.f32 %v293_v50, %v295_v53  ;;  %v397_v59 = vmax.f32 %v366_v51, %v368_v54  ;;  %v297_v60 = vpop.f32.mrb[10].mxu0  ;;  %v370_v61 = vpop.f32.mrb[10].mxu1  ;;  %v4470_v50 = vld [vmem:[%s6797_s1 + $0x2c4] ss:$16 sps:$4 sm:$0xff]  }
 0x108   :  { %1045 = vmatpush1.bf16.msra.mxu0 %v4353_v47  ;;  %v299_v62 = vpop.f32.mrb[11].mxu0  ;;  %v372_v63 = vpop.f32.mrb[11].mxu1  ;;  %1086 = vmatpush1.bf16.msra.mxu1 %v4358_v48  ;;  %v4475_v51 = vld [vmem:[%s6797_s1 + $0x2cc] ss:$16 sps:$4 sm:$0xff]   ;;  %v4484_v54 = vld [vmem:[%s6797_s1 + $0x2c0] ss:$16 sps:$4 sm:$0xff]  }
 0x109   :  { %v405_v3 = vmax.f32 %v389_v58, %v397_v59  ;;  %v390_v4 = vmax.f32 %v297_v60, %v299_v62  ;;  %v398_v5 = vmax.f32 %v370_v61, %v372_v63  ;;  %1046 = vmatprep.subr.bf16.mxu0 %v4366_v52  ;;  %v427_v8 = vpack.c.bf16 %v421_v57, %v420_v56  ;;  %v4489_v56 = vld [vmem:[%s6797_s1 + $0x2c8] ss:$16 sps:$4 sm:$0xff]   ;;  %v4496_v58 = vld [vmem:[%s6797_s1 + $0x2e4] ss:$16 sps:$4 sm:$0xff]   ;;  %v4501_v59 = vld [vmem:[%s6797_s1 + $0x2ec] ss:$16 sps:$4 sm:$0xff]  }
 0x10a   :  { %1087 = vmatprep.subr.bf16.mxu1 %v4373_v55  ;;  %v4508_v60 = vld [vmem:[%s6797_s1 + $0x2e0] ss:$16 sps:$4 sm:$0xff]   ;;  %v4513_v61 = vld [vmem:[%s6797_s1 + $0x2e8] ss:$16 sps:$4 sm:$0xff]   ;;  %v4526_v62 = vld [vmem:[%s6797_s1 + $0x304] ss:$16 sps:$4 sm:$0xff]  }
 0x10b   :  { %v414_v11 = vadd.f32 %v4323_v16, %v405_v3  ;;  %v406_v12 = vmax.f32 %v390_v4, %v398_v5  ;;  %688 = vmatmul.mubr.bf16.gmra.mrb[20].mxu0 %v427_v8  ;;  %761 = vmatmul.mubr.bf16.gmra.mrb[20].mxu1 %v427_v8  ;;  %v4531_v63 = vld [vmem:[%s6797_s1 + $0x30c] ss:$16 sps:$4 sm:$0xff]   ;;  %v4538_v3 = vld [vmem:[%s6797_s1 + $0x300] ss:$16 sps:$4 sm:$0xff]   ;;  %v4543_v4 = vld [vmem:[%s6797_s1 + $0x308] ss:$16 sps:$4 sm:$0xff]  }
 0x10c   :  { %1047 = vmatpush1.bf16.msra.mxu0 %v4380_v0  ;;  %1088 = vmatpush1.bf16.msra.mxu1 %v4385_v2  ;;  %v4550_v5 = vld [vmem:[%s6797_s1 + $0x324] ss:$16 sps:$4 sm:$0xff]   ;;  %v4555_v8 = vld [vmem:[%s6797_s1 + $0x32c] ss:$16 sps:$4 sm:$0xff]  }
 0x10d   :  { %v415_v15 = vadd.f32 %v4323_v16, %v406_v12  ;;  %v303_v17 = vpop.f32.mrb[12].mxu0  ;;  %v376_v18 = vpop.f32.mrb[12].mxu1  ;;  %1048 = vmatprep.subr.bf16.mxu0 %v4391_v9  ;;  %1089 = vmatprep.subr.bf16.mxu1 %v4396_v10  ;;  %v422_v23 = vmax.f32 %v414_v11, 0.0  ;;  %v4560_v11 = vld [vmem:[%s6797_s1 + $0x320] ss:$16 sps:$4 sm:$0xff]  }
 0x10e   :  { %v305_v20 = vpop.f32.mrb[13].mxu0  ;;  %v378_v21 = vpop.f32.mrb[13].mxu1  ;;  %697 = vmatprep.mubr.bf16.mxu0 %v6801_v1  ;;  %770 = vmatprep.mubr.bf16.mxu1 %v6801_v1  ;;  %v4565_v12 = vld [vmem:[%s6797_s1 + $0x328] ss:$16 sps:$4 sm:$0xff]  }
 0x10f   :  { %v423_v24 = vmax.f32 %v415_v15, 0.0  ;;  %v391_v25 = vmax.f32 %v303_v17, %v305_v20  ;;  %v399_v26 = vmax.f32 %v376_v18, %v378_v21  ;;  %v307_v27 = vpop.f32.mrb[14].mxu0  ;;  %v380_v28 = vpop.f32.mrb[14].mxu1  ;;  %v4574_v15 = vld [vmem:[%s6797_s1 + $0x344] ss:$16 sps:$4 sm:$0xff]  }
 0x110   :  { %1049 = vmatpush1.bf16.msra.mxu0 %v4405_v13  ;;  %v309_v29 = vpop.f32.mrb[15].mxu0  ;;  %v382_v30 = vpop.f32.mrb[15].mxu1  ;;  %1090 = vmatpush1.bf16.msra.mxu1 %v4410_v14  ;;  %7109 = vst [vmem:[#allocation5_spill] sm:$0xff] %v4574_v15  ;;  %v4579_v17 = vld [vmem:[%s6797_s1 + $0x34c] ss:$16 sps:$4 sm:$0xff]  }
 0x111   :  { %v407_v33 = vmax.f32 %v391_v25, %v399_v26  ;;  %v392_v34 = vmax.f32 %v307_v27, %v309_v29  ;;  %v400_v35 = vmax.f32 %v380_v28, %v382_v30  ;;  %1050 = vmatprep.subr.bf16.mxu0 %v4418_v19  ;;  %v428_v36 = vpack.c.bf16 %v423_v24, %v422_v23  ;;  %v4586_v18 = vld [vmem:[%s6797_s1 + $0x340] ss:$16 sps:$4 sm:$0xff]   ;;  %v4591_v20 = vld [vmem:[%s6797_s1 + $0x348] ss:$16 sps:$4 sm:$0xff]   ;;  %v4598_v21 = vld [vmem:[%s6797_s1 + $0x364] ss:$16 sps:$4 sm:$0xff]  }
 0x112   :  { %1091 = vmatprep.subr.bf16.mxu1 %v4425_v22  ;;  %7110 = vst [vmem:[#allocation6_spill] sm:$0xff] %v4579_v17  ;;  %7111 = vst [vmem:[#allocation7_spill] sm:$0xff] %v4586_v18  ;;  %v4603_v23 = vld [vmem:[%s6797_s1 + $0x36c] ss:$16 sps:$4 sm:$0xff]   ;;  %v4608_v24 = vld [vmem:[%s6797_s1 + $0x360] ss:$16 sps:$4 sm:$0xff]  }
 0x113   :  { %v416_v41 = vadd.f32 %v4323_v16, %v407_v33  ;;  %v408_v42 = vmax.f32 %v392_v34, %v400_v35  ;;  %698 = vmatmul.mubr.bf16.gmra.mrb[24].mxu0 %v428_v36  ;;  %771 = vmatmul.mubr.bf16.gmra.mrb[24].mxu1 %v428_v36  ;;  %7112 = vst [vmem:[#allocation8_spill] sm:$0xff] %v4591_v20  ;;  %7113 = vst [vmem:[#allocation9_spill] sm:$0xff] %v4598_v21  ;;  %v4613_v25 = vld [vmem:[%s6797_s1 + $0x368] ss:$16 sps:$4 sm:$0xff]   ;;  %v4622_v26 = vld [vmem:[%s6797_s1 + $0x384] ss:$16 sps:$4 sm:$0xff]  }
 0x114   :  { %1051 = vmatpush1.bf16.msra.mxu0 %v4432_v31  ;;  %1092 = vmatpush1.bf16.msra.mxu1 %v4437_v32  ;;  %7114 = vst [vmem:[#allocation10_spill] sm:$0xff] %v4603_v23  ;;  %7115 = vst [vmem:[#allocation11_spill] sm:$0xff] %v4608_v24  ;;  %v4627_v27 = vld [vmem:[%s6797_s1 + $0x38c] ss:$16 sps:$4 sm:$0xff]   ;;  %v4634_v28 = vld [vmem:[%s6797_s1 + $0x380] ss:$16 sps:$4 sm:$0xff]  }
 0x115   :  { %v417_v49 = vadd.f32 %v4323_v16, %v408_v42  ;;  %1052 = vmatprep.subr.bf16.mxu0 %v4443_v39  ;;  %1093 = vmatprep.subr.bf16.mxu1 %v4448_v40  ;;  %v424_v53 = vmax.f32 %v416_v41, 0.0  ;;  %7116 = vst [vmem:[#allocation12_spill] sm:$0xff] %v4613_v25  ;;  %7117 = vst [vmem:[#allocation13_spill] sm:$0xff] %v4622_v26  ;;  %v4639_v29 = vld [vmem:[%s6797_s1 + $0x388] ss:$16 sps:$4 sm:$0xff]  }
 0x116   :  { %707 = vmatprep.mubr.bf16.mxu0 %v6801_v1  ;;  %780 = vmatprep.mubr.bf16.mxu1 %v6801_v1  ;;  %7118 = vst [vmem:[#allocation14_spill] sm:$0xff] %v4627_v27  ;;  %7119 = vst [vmem:[#allocation15_spill] sm:$0xff] %v4634_v28  ;;  %v4646_v30 = vld [vmem:[%s6797_s1 + $0x3a4] ss:$16 sps:$4 sm:$0xff]   ;;  %v4651_v33 = vld [vmem:[%s6797_s1 + $0x3ac] ss:$16 sps:$4 sm:$0xff]  }
 0x117   :  { %v425_v16 = vmax.f32 %v417_v49, 0.0  ;;  %7120 = vst [vmem:[#allocation16_spill] sm:$0xff] %v4639_v29  ;;  %7121 = vst [vmem:[#allocation17_spill] sm:$0xff] %v4646_v30  ;;  %v4656_v34 = vld [vmem:[%s6797_s1 + $0x3a0] ss:$16 sps:$4 sm:$0xff]  }
 0x118   :  { %1053 = vmatpush1.bf16.msra.mxu0 %v4457_v45  ;;  %1094 = vmatpush1.bf16.msra.mxu1 %v4462_v46  ;;  %7122 = vst [vmem:[#allocation18_spill] sm:$0xff] %v4651_v33  ;;  %7123 = vst [vmem:[#allocation19_spill] sm:$0xff] %v4656_v34  ;;  %v4661_v35 = vld [vmem:[%s6797_s1 + $0x3a8] ss:$16 sps:$4 sm:$0xff]   ;;  %v4670_v36 = vld [vmem:[%s6797_s1 + $0x3c4] ss:$16 sps:$4 sm:$0xff]  }
 0x119   :  { %1054 = vmatprep.subr.bf16.mxu0 %v4470_v50  ;;  %v429_v57 = vpack.c.bf16 %v425_v16, %v424_v53  ;;  %1095 = vmatprep.subr.bf16.mxu1 %v4475_v51  ;;  %7124 = vst [vmem:[#allocation20_spill] sm:$0xff] %v4661_v35  ;;  %7125 = vst [vmem:[#allocation21_spill] sm:$0xff] %v4670_v36  ;;  %v4675_v41 = vld [vmem:[%s6797_s1 + $0x3cc] ss:$16 sps:$4 sm:$0xff]   ;;  %v4682_v42 = vld [vmem:[%s6797_s1 + $0x3c0] ss:$16 sps:$4 sm:$0xff]  }
 0x11a   :  { %7126 = vst [vmem:[#allocation22_spill] sm:$0xff] %v4675_v41  ;;  %7127 = vst [vmem:[#allocation23_spill] sm:$0xff] %v4682_v42  ;;  %v4687_v49 = vld [vmem:[%s6797_s1 + $0x3c8] ss:$16 sps:$4 sm:$0xff]   ;;  %v4694_v53 = vld [vmem:[%s6797_s1 + $0x3e4] ss:$16 sps:$4 sm:$0xff]  }
 0x11b   :  { %708 = vmatmul.mubr.bf16.gmra.mrb[28].mxu0 %v429_v57  ;;  %781 = vmatmul.mubr.bf16.gmra.mrb[28].mxu1 %v429_v57  ;;  %7128 = vst [vmem:[#allocation24_spill] sm:$0xff] %v4687_v49  ;;  %7129 = vst [vmem:[#allocation25_spill] sm:$0xff] %v4694_v53  ;;  %v4699_v16 = vld [vmem:[%s6797_s1 + $0x3ec] ss:$16 sps:$4 sm:$0xff]   ;;  %v4704_v57 = vld [vmem:[%s6797_s1 + $0x3e0] ss:$16 sps:$4 sm:$0xff]  }
 0x11c   :  { %1055 = vmatpush1.bf16.msra.mxu0 %v4484_v54  ;;  %1096 = vmatpush1.bf16.msra.mxu1 %v4489_v56  ;;  %7130 = vst [vmem:[#allocation26_spill] sm:$0xff] %v4699_v16  ;;  %7131 = vst [vmem:[#allocation27_spill] sm:$0xff] %v4704_v57 }
 0x11d   :  { %1056 = vmatprep.subr.bf16.mxu0 %v4496_v58  ;;  %1097 = vmatprep.subr.bf16.mxu1 %v4501_v59 }
 0x11e   :  { %1074 = vmatprep.mubr.bf16.mxu0 %v6801_v1  ;;  %1115 = vmatprep.mubr.bf16.mxu1 %v6801_v1 }
 0x120   :  { %1057 = vmatpush1.bf16.msra.mxu0 %v4508_v60  ;;  %1098 = vmatpush1.bf16.msra.mxu1 %v4513_v61 }
 0x121   :  { %1532 = vmatprep.subr.bf16.mxu0 %v4526_v62  ;;  %1573 = vmatprep.subr.bf16.mxu1 %v4531_v63 }
 0x123   :  { %1075 = vmatmul.mubr.bf16.vlgmr.msra.gmra.mrb[32].mxu0 %v6801_v1  ;;  %1116 = vmatmul.mubr.bf16.vlgmr.msra.gmra.mrb[32].mxu1 %v6801_v1  ;;  %v4709_v1 = vld [vmem:[%s6797_s1 + $0x3e8] ss:$16 sps:$4 sm:$0xff]  }
 0x124   :  { %1533 = vmatpush1.bf16.msra.mxu0 %v4538_v3  ;;  %1574 = vmatpush1.bf16.msra.mxu1 %v4543_v4  ;;  %7132 = vst [vmem:[#allocation28_spill] sm:$0xff] %v4709_v1 }
 0x125   :  { %1534 = vmatprep.subr.bf16.mxu0 %v4550_v5  ;;  %1575 = vmatprep.subr.bf16.mxu1 %v4555_v8 }
 0x128   :  { %1535 = vmatpush1.bf16.msra.mxu0 %v4560_v11  ;;  %1576 = vmatpush1.bf16.msra.mxu1 %v4565_v12 }
 0x129   :  { %1536 = vmatprep.subr.bf16.mxu0 %v4574_v15  ;;  %1577 = vmatprep.subr.bf16.mxu1 %v4579_v17 }
 0x12c   :  { %1537 = vmatpush1.bf16.msra.mxu0 %v4586_v18  ;;  %1578 = vmatpush1.bf16.msra.mxu1 %v4591_v20 }
 0x12d   :  { %1538 = vmatprep.subr.bf16.mxu0 %v4598_v21  ;;  %1579 = vmatprep.subr.bf16.mxu1 %v4603_v23 }
 0x130   :  { %1539 = vmatpush1.bf16.msra.mxu0 %v4608_v24  ;;  %1580 = vmatpush1.bf16.msra.mxu1 %v4613_v25 }
 0x131   :  { %1540 = vmatprep.subr.bf16.mxu0 %v4622_v26  ;;  %1581 = vmatprep.subr.bf16.mxu1 %v4627_v27 }
 0x134   :  { %1541 = vmatpush1.bf16.msra.mxu0 %v4634_v28  ;;  %1582 = vmatpush1.bf16.msra.mxu1 %v4639_v29 }
 0x135   :  { %1542 = vmatprep.subr.bf16.mxu0 %v4646_v30  ;;  %1583 = vmatprep.subr.bf16.mxu1 %v4651_v33 }
 0x138   :  { %1543 = vmatpush1.bf16.msra.mxu0 %v4656_v34  ;;  %1584 = vmatpush1.bf16.msra.mxu1 %v4661_v35 }
 0x139   :  { %1544 = vmatprep.subr.bf16.mxu0 %v4670_v36  ;;  %1585 = vmatprep.subr.bf16.mxu1 %v4675_v41 }
 0x13c   :  { %1545 = vmatpush1.bf16.msra.mxu0 %v4682_v42  ;;  %1586 = vmatpush1.bf16.msra.mxu1 %v4687_v49  ;;  %v4718_v49 = vld [vmem:[%s6797_s1 + $0x404] ss:$16 sps:$4 sm:$0xff]   ;;  %v4723_v42 = vld [vmem:[%s6797_s1 + $0x40c] ss:$16 sps:$4 sm:$0xff]  }
 0x13d   :  { %1546 = vmatprep.subr.bf16.mxu0 %v4694_v53  ;;  %1587 = vmatprep.subr.bf16.mxu1 %v4699_v16  ;;  %7133 = vst [vmem:[#allocation29_spill] sm:$0xff] %v4718_v49  ;;  %7134 = vst [vmem:[#allocation30_spill] sm:$0xff] %v4723_v42  ;;  %v4728_v53 = vld [vmem:[%s6797_s1 + $0x400] ss:$16 sps:$4 sm:$0xff]   ;;  %v4747_v16 = vld [vmem:[%s6797_s1 + $0x42c] ss:$16 sps:$4 sm:$0xff]  }
 0x13e   :  { %7135 = vst [vmem:[#allocation31_spill] sm:$0xff] %v4728_v53  ;;  %7138 = vst [vmem:[#allocation34_spill] sm:$0xff] %v4747_v16 }
 0x140   :  { %1547 = vmatpush1.bf16.msra.mxu0 %v4704_v57  ;;  %1588 = vmatpush1.bf16.msra.mxu1 %v4709_v1  ;;  %v4733_v57 = vld [vmem:[%s6797_s1 + $0x408] ss:$16 sps:$4 sm:$0xff]   ;;  %v4742_v1 = vld [vmem:[%s6797_s1 + $0x424] ss:$16 sps:$4 sm:$0xff]  }
 0x141   :  { %7136 = vst [vmem:[#allocation32_spill] sm:$0xff] %v4733_v57  ;;  %1548 = vmatprep.subr.bf16.mxu0 %v4718_v49  ;;  %1589 = vmatprep.subr.bf16.mxu1 %v4723_v42  ;;  %7137 = vst [vmem:[#allocation33_spill] sm:$0xff] %v4742_v1  ;;  %v4752_v49 = vld [vmem:[%s6797_s1 + $0x420] ss:$16 sps:$4 sm:$0xff]   ;;  %v4771_v42 = vld [vmem:[%s6797_s1 + $0x44c] ss:$16 sps:$4 sm:$0xff]  }
 0x142   :  { %7139 = vst [vmem:[#allocation35_spill] sm:$0xff] %v4752_v49  ;;  %7142 = vst [vmem:[#allocation38_spill] sm:$0xff] %v4771_v42 }
 0x144   :  { %1549 = vmatpush1.bf16.msra.mxu0 %v4728_v53  ;;  %1590 = vmatpush1.bf16.msra.mxu1 %v4733_v57  ;;  %v4757_v53 = vld [vmem:[%s6797_s1 + $0x428] ss:$16 sps:$4 sm:$0xff]   ;;  %v4766_v57 = vld [vmem:[%s6797_s1 + $0x444] ss:$16 sps:$4 sm:$0xff]  }
 0x145   :  { %7140 = vst [vmem:[#allocation36_spill] sm:$0xff] %v4757_v53  ;;  %1550 = vmatprep.subr.bf16.mxu0 %v4742_v1  ;;  %1591 = vmatprep.subr.bf16.mxu1 %v4747_v16  ;;  %7141 = vst [vmem:[#allocation37_spill] sm:$0xff] %v4766_v57  ;;  %v4776_v1 = vld [vmem:[%s6797_s1 + $0x440] ss:$16 sps:$4 sm:$0xff]   ;;  %v4795_v16 = vld [vmem:[%s6797_s1 + $0x46c] ss:$16 sps:$4 sm:$0xff]  }
 0x146   :  { %7143 = vst [vmem:[#allocation39_spill] sm:$0xff] %v4776_v1  ;;  %7146 = vst [vmem:[#allocation42_spill] sm:$0xff] %v4795_v16 }
 0x148   :  { %1551 = vmatpush1.bf16.msra.mxu0 %v4752_v49  ;;  %1592 = vmatpush1.bf16.msra.mxu1 %v4757_v53  ;;  %v4781_v49 = vld [vmem:[%s6797_s1 + $0x448] ss:$16 sps:$4 sm:$0xff]   ;;  %v4790_v53 = vld [vmem:[%s6797_s1 + $0x464] ss:$16 sps:$4 sm:$0xff]  }
 0x149   :  { %7144 = vst [vmem:[#allocation40_spill] sm:$0xff] %v4781_v49  ;;  %1552 = vmatprep.subr.bf16.mxu0 %v4766_v57  ;;  %1593 = vmatprep.subr.bf16.mxu1 %v4771_v42  ;;  %7145 = vst [vmem:[#allocation41_spill] sm:$0xff] %v4790_v53  ;;  %v4800_v57 = vld [vmem:[%s6797_s1 + $0x460] ss:$16 sps:$4 sm:$0xff]   ;;  %v4819_v42 = vld [vmem:[%s6797_s1 + $0x48c] ss:$16 sps:$4 sm:$0xff]  }
 0x14a   :  { %7147 = vst [vmem:[#allocation43_spill] sm:$0xff] %v4800_v57  ;;  %7150 = vst [vmem:[#allocation46_spill] sm:$0xff] %v4819_v42 }
 0x14c   :  { %1553 = vmatpush1.bf16.msra.mxu0 %v4776_v1  ;;  %1594 = vmatpush1.bf16.msra.mxu1 %v4781_v49  ;;  %v4805_v1 = vld [vmem:[%s6797_s1 + $0x468] ss:$16 sps:$4 sm:$0xff]   ;;  %v4814_v49 = vld [vmem:[%s6797_s1 + $0x484] ss:$16 sps:$4 sm:$0xff]  }
 0x14d   :  { %7148 = vst [vmem:[#allocation44_spill] sm:$0xff] %v4805_v1  ;;  %1554 = vmatprep.subr.bf16.mxu0 %v4790_v53  ;;  %1595 = vmatprep.subr.bf16.mxu1 %v4795_v16  ;;  %7149 = vst [vmem:[#allocation45_spill] sm:$0xff] %v4814_v49  ;;  %v4824_v53 = vld [vmem:[%s6797_s1 + $0x480] ss:$16 sps:$4 sm:$0xff]   ;;  %v4843_v16 = vld [vmem:[%s6797_s1 + $0x4ac] ss:$16 sps:$4 sm:$0xff]  }
 0x14e   :  { %7151 = vst [vmem:[#allocation47_spill] sm:$0xff] %v4824_v53  ;;  %7154 = vst [vmem:[#allocation50_spill] sm:$0xff] %v4843_v16 }
 0x150   :  { %1555 = vmatpush1.bf16.msra.mxu0 %v4800_v57  ;;  %1596 = vmatpush1.bf16.msra.mxu1 %v4805_v1  ;;  %v4829_v57 = vld [vmem:[%s6797_s1 + $0x488] ss:$16 sps:$4 sm:$0xff]   ;;  %v4838_v1 = vld [vmem:[%s6797_s1 + $0x4a4] ss:$16 sps:$4 sm:$0xff]  }
 0x151   :  { %7152 = vst [vmem:[#allocation48_spill] sm:$0xff] %v4829_v57  ;;  %1556 = vmatprep.subr.bf16.mxu0 %v4814_v49  ;;  %1597 = vmatprep.subr.bf16.mxu1 %v4819_v42  ;;  %7153 = vst [vmem:[#allocation49_spill] sm:$0xff] %v4838_v1  ;;  %v4848_v49 = vld [vmem:[%s6797_s1 + $0x4a0] ss:$16 sps:$4 sm:$0xff]   ;;  %v4867_v42 = vld [vmem:[%s6797_s1 + $0x4cc] ss:$16 sps:$4 sm:$0xff]  }
 0x152   :  { %7155 = vst [vmem:[#allocation51_spill] sm:$0xff] %v4848_v49  ;;  %7158 = vst [vmem:[#allocation54_spill] sm:$0xff] %v4867_v42 }
 0x154   :  { %1557 = vmatpush1.bf16.msra.mxu0 %v4824_v53  ;;  %1598 = vmatpush1.bf16.msra.mxu1 %v4829_v57  ;;  %v4853_v53 = vld [vmem:[%s6797_s1 + $0x4a8] ss:$16 sps:$4 sm:$0xff]   ;;  %v4862_v57 = vld [vmem:[%s6797_s1 + $0x4c4] ss:$16 sps:$4 sm:$0xff]  }
 0x155   :  { %7156 = vst [vmem:[#allocation52_spill] sm:$0xff] %v4853_v53  ;;  %1558 = vmatprep.subr.bf16.mxu0 %v4838_v1  ;;  %1599 = vmatprep.subr.bf16.mxu1 %v4843_v16  ;;  %7157 = vst [vmem:[#allocation53_spill] sm:$0xff] %v4862_v57  ;;  %v4872_v1 = vld [vmem:[%s6797_s1 + $0x4c0] ss:$16 sps:$4 sm:$0xff]   ;;  %v4891_v16 = vld [vmem:[%s6797_s1 + $0x4ec] ss:$16 sps:$4 sm:$0xff]  }
 0x156   :  { %7159 = vst [vmem:[#allocation55_spill] sm:$0xff] %v4872_v1  ;;  %7162 = vst [vmem:[#allocation58_spill] sm:$0xff] %v4891_v16 }
 0x158   :  { %1559 = vmatpush1.bf16.msra.mxu0 %v4848_v49  ;;  %1600 = vmatpush1.bf16.msra.mxu1 %v4853_v53  ;;  %v4877_v49 = vld [vmem:[%s6797_s1 + $0x4c8] ss:$16 sps:$4 sm:$0xff]   ;;  %v4886_v53 = vld [vmem:[%s6797_s1 + $0x4e4] ss:$16 sps:$4 sm:$0xff]  }
 0x159   :  { %7160 = vst [vmem:[#allocation56_spill] sm:$0xff] %v4877_v49  ;;  %1560 = vmatprep.subr.bf16.mxu0 %v4862_v57  ;;  %1601 = vmatprep.subr.bf16.mxu1 %v4867_v42  ;;  %7161 = vst [vmem:[#allocation57_spill] sm:$0xff] %v4886_v53  ;;  %v4896_v57 = vld [vmem:[%s6797_s1 + $0x4e0] ss:$16 sps:$4 sm:$0xff]   ;;  %v465_v42 = vlaneseq }
 0x15a   :  { %7163 = vst [vmem:[#allocation59_spill] sm:$0xff] %v4896_v57 }
 0x15b   :  { %v4909_v41 = vshrl.u32 %v465_v42, 7 }
 0x15c   :  { %1561 = vmatpush1.bf16.msra.mxu0 %v4872_v1  ;;  %1602 = vmatpush1.bf16.msra.mxu1 %v4877_v49  ;;  %v4901_v1 = vld [vmem:[%s6797_s1 + $0x4e8] ss:$16 sps:$4 sm:$0xff]   ;;  %v4071_v49 = vmov 0.0|0.0  }
 0x15d   :  { %7164 = vst [vmem:[#allocation60_spill] sm:$0xff] %v4901_v1  ;;  %1562 = vmatprep.subr.bf16.mxu0 %v4886_v53  ;;  %1603 = vmatprep.subr.bf16.mxu1 %v4891_v16  ;;  %7165 = vst [vmem:[#allocation61_spill] sm:$0xff] %v4909_v41  ;;  %v6905_v36 = vsub.s32 0, %v4909_v41  ;;  %v6908_v53 = vsub.s32 2, %v4909_v41 }
 0x15e   :  { %1564 = vmatprep.mubr.bf16.mxu0 %v4071_v49  ;;  %1605 = vmatprep.mubr.bf16.mxu1 %v4071_v49 }
 0x160   :  { %1563 = vmatpush1.bf16.msra.mxu0 %v4896_v57  ;;  %1604 = vmatpush1.bf16.msra.mxu1 %v4901_v1  ;;  %v3291_v57 = vld [vmem:[%s6799_s2 + $0x1] ss:$8 sm:$0xf]  ;;  %v6913_v1 = vsub.s32 1, %v4909_v41 }
 0x161   :  { %1640 = vmatprep.subr.bf16.mxu0 %v4311_v6  ;;  %1681 = vmatprep.subr.bf16.mxu1 %v4316_v7  ;;  %v6916_v6 = vsub.s32 3, %v4909_v41  ;;  %v468_v42 = vrot.slane %v3291_v57, %v6905_v36  ;;  %v476_v49 = vrot.slane %v3291_v57, %v6908_v53 }
 0x162   :  { %v472_v33 = vrot.slane %v3291_v57, %v6913_v1 }
 0x163   :  { %v480_v30 = vrot.slane %v3291_v57, %v6916_v6 }
 0x1d6   :  { %v4918_v16 = vpop.f32.mrb[16].mxu0  ;;  %v4920_v7 = vpop.f32.mrb[16].mxu1 }
 0x1d7   :  { %v681_v35 = vpop.f32.mrb[17].mxu0  ;;  %v754_v34 = vpop.f32.mrb[17].mxu1 }
 0x1d8   :  { %v683_v29 = vpop.f32.mrb[18].mxu0  ;;  %v756_v28 = vpop.f32.mrb[18].mxu1 }
 0x1d9   :  { %v4930_v27 = vadd.f32 %v683_v29, %v468_v42  ;;  %v4932_v26 = vadd.f32 %v756_v28, %v476_v49  ;;  %v685_v25 = vpop.f32.mrb[19].mxu0  ;;  %v758_v24 = vpop.f32.mrb[19].mxu1 }
 0x1da   :  { %v4934_v36 = vadd.f32 %v685_v25, %v472_v33  ;;  %v4936_v23 = vadd.f32 %v758_v24, %v480_v30 }
 0x1db   :  { %7166 = vst [vmem:[#allocation62_spill] sm:$0xff] %v4930_v27  ;;  %7167 = vst [vmem:[#allocation63_spill] sm:$0xff] %v4932_v26 }
 0x1dc   :  { %7168 = vst [vmem:[#allocation64_spill] sm:$0xff] %v4934_v36  ;;  %7169 = vst [vmem:[#allocation65_spill] sm:$0xff] %v4936_v23 }
 0x1de   :  { %v689_v53 = vpop.f32.mrb[20].mxu0  ;;  %v762_v21 = vpop.f32.mrb[20].mxu1 }
 0x1df   :  { %v4938_v20 = vadd.f32 %v689_v53, %v468_v42  ;;  %v4940_v1 = vadd.f32 %v762_v21, %v476_v49  ;;  %v691_v41 = vpop.f32.mrb[21].mxu0  ;;  %v764_v57 = vpop.f32.mrb[21].mxu1 }
 0x1e0   :  { %v4942_v6 = vadd.f32 %v691_v41, %v472_v33  ;;  %v4944_v29 = vadd.f32 %v764_v57, %v480_v30  ;;  %v693_v28 = vpop.f32.mrb[22].mxu0  ;;  %v766_v26 = vpop.f32.mrb[22].mxu1 }
 0x1e1   :  { %7170 = vst [vmem:[#allocation66_spill] sm:$0xff] %v4938_v20  ;;  %7171 = vst [vmem:[#allocation67_spill] sm:$0xff] %v4940_v1  ;;  %v4946_v27 = vadd.f32 %v693_v28, %v468_v42  ;;  %v4948_v25 = vadd.f32 %v766_v26, %v476_v49  ;;  %v695_v24 = vpop.f32.mrb[23].mxu0  ;;  %v768_v23 = vpop.f32.mrb[23].mxu1 }
 0x1e2   :  { %7172 = vst [vmem:[#allocation68_spill] sm:$0xff] %v4942_v6  ;;  %7173 = vst [vmem:[#allocation69_spill] sm:$0xff] %v4944_v29  ;;  %v4950_v36 = vadd.f32 %v695_v24, %v472_v33  ;;  %v4952_v53 = vadd.f32 %v768_v23, %v480_v30 }
 0x1e3   :  { %7174 = vst [vmem:[#allocation70_spill] sm:$0xff] %v4946_v27  ;;  %7175 = vst [vmem:[#allocation71_spill] sm:$0xff] %v4948_v25 }
 0x1e4   :  { %7176 = vst [vmem:[#allocation72_spill] sm:$0xff] %v4950_v36  ;;  %7177 = vst [vmem:[#allocation73_spill] sm:$0xff] %v4952_v53 }
 0x1e6   :  { %v699_v21 = vpop.f32.mrb[24].mxu0  ;;  %v772_v1 = vpop.f32.mrb[24].mxu1 }
 0x1e7   :  { %v4954_v20 = vadd.f32 %v699_v21, %v468_v42  ;;  %v4956_v41 = vadd.f32 %v772_v1, %v476_v49  ;;  %v701_v57 = vpop.f32.mrb[25].mxu0  ;;  %v774_v29 = vpop.f32.mrb[25].mxu1 }
 0x1e8   :  { %v4958_v6 = vadd.f32 %v701_v57, %v472_v33  ;;  %v4960_v28 = vadd.f32 %v774_v29, %v480_v30  ;;  %v703_v26 = vpop.f32.mrb[26].mxu0  ;;  %v776_v25 = vpop.f32.mrb[26].mxu1 }
 0x1e9   :  { %7178 = vst [vmem:[#allocation74_spill] sm:$0xff] %v4954_v20  ;;  %7179 = vst [vmem:[#allocation75_spill] sm:$0xff] %v4956_v41  ;;  %v4962_v27 = vadd.f32 %v703_v26, %v468_v42  ;;  %v4964_v24 = vadd.f32 %v776_v25, %v476_v49  ;;  %v705_v23 = vpop.f32.mrb[27].mxu0  ;;  %v778_v53 = vpop.f32.mrb[27].mxu1 }
 0x1ea   :  { %7180 = vst [vmem:[#allocation76_spill] sm:$0xff] %v4958_v6  ;;  %7181 = vst [vmem:[#allocation77_spill] sm:$0xff] %v4960_v28  ;;  %v4966_v36 = vadd.f32 %v705_v23, %v472_v33  ;;  %v4968_v21 = vadd.f32 %v778_v53, %v480_v30 }
 0x1eb   :  { %7182 = vst [vmem:[#allocation78_spill] sm:$0xff] %v4962_v27  ;;  %7183 = vst [vmem:[#allocation79_spill] sm:$0xff] %v4964_v24 }
 0x1ec   :  { %7184 = vst [vmem:[#allocation80_spill] sm:$0xff] %v4966_v36  ;;  %7185 = vst [vmem:[#allocation81_spill] sm:$0xff] %v4968_v21 }
 0x1ee   :  { %v709_v1 = vpop.f32.mrb[28].mxu0  ;;  %v782_v41 = vpop.f32.mrb[28].mxu1 }
 0x1ef   :  { %v4970_v20 = vadd.f32 %v709_v1, %v468_v42  ;;  %v4972_v57 = vadd.f32 %v782_v41, %v476_v49  ;;  %v711_v29 = vpop.f32.mrb[29].mxu0  ;;  %v784_v28 = vpop.f32.mrb[29].mxu1  ;;  %v680_v41 = vadd.f32 %v4918_v16, %v468_v42 }
 0x1f0   :  { %v4974_v6 = vadd.f32 %v711_v29, %v472_v33  ;;  %v4976_v26 = vadd.f32 %v784_v28, %v480_v30  ;;  %v713_v25 = vpop.f32.mrb[30].mxu0  ;;  %v786_v24 = vpop.f32.mrb[30].mxu1  ;;  %v682_v29 = vadd.f32 %v681_v35, %v472_v33 }
 0x1f1   :  { %7186 = vst [vmem:[#allocation82_spill] sm:$0xff] %v4970_v20  ;;  %7187 = vst [vmem:[#allocation83_spill] sm:$0xff] %v4972_v57  ;;  %v4978_v27 = vadd.f32 %v713_v25, %v468_v42  ;;  %v4980_v23 = vadd.f32 %v786_v24, %v476_v49  ;;  %v715_v53 = vpop.f32.mrb[31].mxu0  ;;  %v788_v21 = vpop.f32.mrb[31].mxu1  ;;  %v753_v57 = vadd.f32 %v4920_v7, %v476_v49 }
 0x1f2   :  { %7188 = vst [vmem:[#allocation84_spill] sm:$0xff] %v4974_v6  ;;  %7189 = vst [vmem:[#allocation85_spill] sm:$0xff] %v4976_v26  ;;  %v4982_v36 = vadd.f32 %v715_v53, %v472_v33  ;;  %v4984_v1 = vadd.f32 %v788_v21, %v480_v30  ;;  %v755_v6 = vadd.f32 %v754_v34, %v480_v30 }
 0x1f3   :  { %7190 = vst [vmem:[#allocation86_spill] sm:$0xff] %v4978_v27  ;;  %7191 = vst [vmem:[#allocation87_spill] sm:$0xff] %v4980_v23 }
 0x1f4   :  { %7192 = vst [vmem:[#allocation88_spill] sm:$0xff] %v4982_v36  ;;  %7193 = vst [vmem:[#allocation89_spill] sm:$0xff] %v4984_v1 }
 0x1f6   :  { %v1076_v28 = vpop.f32.mrb[32].mxu0  ;;  %v1117_v26 = vpop.f32.mrb[32].mxu1 }
 0x1f7   :  { %v1124_v20 = vadd.f32 %v1076_v28, %v680_v41  ;;  %v1126_v18 = vadd.f32 %v1117_v26, %v753_v57  ;;  %v1078_v25 = vpop.f32.mrb[33].mxu0  ;;  %v1119_v27 = vpop.f32.mrb[33].mxu1  ;;  %v7210_v41 = vld [vmem:[#allocation20_spill] sm:$0xff]  ;;  %v7212_v28 = vld [vmem:[#allocation22_spill] sm:$0xff] }
 0x1f8   :  { %v1125_v24 = vadd.f32 %v1078_v25, %v682_v29  ;;  %v1127_v23 = vadd.f32 %v1119_v27, %v755_v6  ;;  %v1080_v17 = vpop.f32.mrb[34].mxu0  ;;  %v1121_v15 = vpop.f32.mrb[34].mxu1  ;;  %v7211_v29 = vld [vmem:[#allocation21_spill] sm:$0xff]  ;;  %v7213_v25 = vld [vmem:[#allocation23_spill] sm:$0xff] }
 0x1f9   :  { %v1128_v53 = vmul.f32 0.5, %v1124_v20  ;;  %v1081_v36 = vpop.f32.mrb[35].mxu0  ;;  %v1122_v21 = vpop.f32.mrb[35].mxu1 }
 0x1fa   :  { %v1132_v1 = vmul.f32 0.5, %v1125_v24  ;;  %v1137_v7 = vmul.f32 0.5, %v1127_v23  ;;  %v7194_v23 = vmov 0   ;;  %v7214_v24 = vld [vmem:[#allocation24_spill] sm:$0xff]  ;;  %v7216_v21 = vld [vmem:[#allocation26_spill] sm:$0xff] }
 0x1fb   :  { %3714 = vtanh.f32 %v1128_v53  ;;  %v7215_v53 = vld [vmem:[#allocation25_spill] sm:$0xff] }
 0x1fc   :  { %3716 = vtanh.f32 %v1132_v1  ;;  %v7209_v1 = vld [vmem:[#allocation19_spill] sm:$0xff] }
 0x1fd   :  { %3718 = vtanh.f32 %v1126_v18 }
 0x1fe   :  { %3720 = vtanh.f32 %v1137_v7  ;;  %v7217_v7 = vld [vmem:[#allocation27_spill] sm:$0xff] }
 0x205   :  { %v3715_v33 = vpop.eup %3714 }
 0x206   :  { %v3717_v30 = vpop.eup %3716  ;;  %v1130_v34 = vmul.f32 0.5, %v3715_v33  ;;  %v7218_v33 = vld [vmem:[#allocation28_spill] sm:$0xff] }
 0x207   :  { %v1134_v35 = vmul.f32 0.5, %v3717_v30  ;;  %v3719_v42 = vpop.eup %3718  ;;  %v7219_v30 = vld [vmem:[#allocation29_spill] sm:$0xff] }
 0x208   :  { %v1131_v16 = vadd.f32 0.5, %v1130_v34  ;;  %v3721_v15 = vpop.eup %3720  ;;  %v7220_v34 = vld [vmem:[#allocation30_spill] sm:$0xff] }
 0x209   :  { %v1135_v49 = vadd.f32 0.5, %v1134_v35  ;;  %v1139_v20 = vmul.f32 0.5, %v3721_v15  ;;  %v7221_v35 = vld [vmem:[#allocation31_spill] sm:$0xff]  ;;  %v7227_v15 = vld [vmem:[#allocation37_spill] sm:$0xff] }
 0x20a   :  { %v1142_v57 = vmul.f32 %v3719_v42, %v1131_v16  ;;  %v7222_v16 = vld [vmem:[#allocation32_spill] sm:$0xff]  ;;  %v7223_v42 = vld [vmem:[#allocation33_spill] sm:$0xff] }
 0x20b   :  { %v1141_v6 = vmul.f32 0.0, %v1135_v49  ;;  %v1140_v27 = vadd.f32 0.5, %v1139_v20  ;;  %v7224_v49 = vld [vmem:[#allocation34_spill] sm:$0xff] }
 0x20c   :  { %v7228_v20 = vld [vmem:[#allocation38_spill] sm:$0xff] }
 0x20d   :  { %v4988_v17 = vadd.f32 %v1142_v57, %v1141_v6  ;;  %v7225_v57 = vld [vmem:[#allocation35_spill] sm:$0xff]  ;;  %v7226_v6 = vld [vmem:[#allocation36_spill] sm:$0xff] }
 0x20f   :  { %3722 = vtanh.f32 %v4988_v17 }
 0x219   :  { %v3723_v36 = vpop.eup %3722 }
 0x21a   :  { %v1145_v18 = vmul.f32 %v3723_v36, %v1140_v27  ;;  %v7229_v27 = vld [vmem:[#allocation39_spill] sm:$0xff]  ;;  %v7230_v36 = vld [vmem:[#allocation40_spill] sm:$0xff] }
 0x21c   :  { %v1146_v26 = vpack.c.bf16 %v1145_v18, %v1145_v18  ;;  %v7231_v18 = vld [vmem:[#allocation41_spill] sm:$0xff] }
 0x21e   :  { %1565 = vmatmul.mubr.bf16.vlgmr.msra.gmra.mrb[36].mxu0 %v1146_v26  ;;  %1606 = vmatmul.mubr.bf16.vlgmr.msra.gmra.mrb[36].mxu1 %v1146_v26 }
 0x21f   :  { %1641 = vmatpush1.bf16.msra.mxu0 %v4330_v37  ;;  %1682 = vmatpush1.bf16.msra.mxu1 %v4335_v38  ;;  %v7195_v37 = vld [vmem:[#allocation5_spill] sm:$0xff]  ;;  %v7196_v38 = vld [vmem:[#allocation6_spill] sm:$0xff] }
 0x220   :  { %1642 = vmatprep.subr.bf16.mxu0 %v4340_v43  ;;  %1683 = vmatprep.subr.bf16.mxu1 %v4345_v44  ;;  %v7197_v43 = vld [vmem:[#allocation7_spill] sm:$0xff]  ;;  %v7198_v44 = vld [vmem:[#allocation8_spill] sm:$0xff] }
 0x221   :  { %1672 = vmatprep.mubr.bf16.mxu0 %v7194_v23  ;;  %1713 = vmatprep.mubr.bf16.mxu1 %v7194_v23 }
 0x223   :  { %1643 = vmatpush1.bf16.msra.mxu0 %v4353_v47  ;;  %1684 = vmatpush1.bf16.msra.mxu1 %v4358_v48  ;;  %v7199_v47 = vld [vmem:[#allocation9_spill] sm:$0xff]  ;;  %v7200_v48 = vld [vmem:[#allocation10_spill] sm:$0xff] }
 0x224   :  { %1644 = vmatprep.subr.bf16.mxu0 %v4366_v52  ;;  %1685 = vmatprep.subr.bf16.mxu1 %v4373_v55  ;;  %v7201_v52 = vld [vmem:[#allocation11_spill] sm:$0xff]  ;;  %v7202_v55 = vld [vmem:[#allocation12_spill] sm:$0xff] }
 0x227   :  { %1645 = vmatpush1.bf16.msra.mxu0 %v4380_v0  ;;  %1686 = vmatpush1.bf16.msra.mxu1 %v4385_v2  ;;  %v7203_v0 = vld [vmem:[#allocation13_spill] sm:$0xff]  ;;  %v7204_v2 = vld [vmem:[#allocation14_spill] sm:$0xff] }
 0x228   :  { %1646 = vmatprep.subr.bf16.mxu0 %v4391_v9  ;;  %1687 = vmatprep.subr.bf16.mxu1 %v4396_v10  ;;  %v7205_v9 = vld [vmem:[#allocation15_spill] sm:$0xff]  ;;  %v7206_v10 = vld [vmem:[#allocation16_spill] sm:$0xff] }
 0x22b   :  { %1647 = vmatpush1.bf16.msra.mxu0 %v4405_v13  ;;  %1688 = vmatpush1.bf16.msra.mxu1 %v4410_v14  ;;  %v7207_v13 = vld [vmem:[#allocation17_spill] sm:$0xff]  ;;  %v7208_v14 = vld [vmem:[#allocation18_spill] sm:$0xff] }
 0x22c   :  { %1648 = vmatprep.subr.bf16.mxu0 %v4418_v19  ;;  %1689 = vmatprep.subr.bf16.mxu1 %v4425_v22 }
 0x22f   :  { %1649 = vmatpush1.bf16.msra.mxu0 %v4432_v31  ;;  %1690 = vmatpush1.bf16.msra.mxu1 %v4437_v32 }
 0x230   :  { %1650 = vmatprep.subr.bf16.mxu0 %v4443_v39  ;;  %1691 = vmatprep.subr.bf16.mxu1 %v4448_v40 }
 0x233   :  { %1651 = vmatpush1.bf16.msra.mxu0 %v4457_v45  ;;  %1692 = vmatpush1.bf16.msra.mxu1 %v4462_v46 }
 0x234   :  { %1652 = vmatprep.subr.bf16.mxu0 %v4470_v50  ;;  %1693 = vmatprep.subr.bf16.mxu1 %v4475_v51 }
 0x237   :  { %1653 = vmatpush1.bf16.msra.mxu0 %v4484_v54  ;;  %1694 = vmatpush1.bf16.msra.mxu1 %v4489_v56 }
 0x238   :  { %1654 = vmatprep.subr.bf16.mxu0 %v4496_v58  ;;  %1695 = vmatprep.subr.bf16.mxu1 %v4501_v59 }
 0x23b   :  { %1655 = vmatpush1.bf16.msra.mxu0 %v4508_v60  ;;  %1696 = vmatpush1.bf16.msra.mxu1 %v4513_v61 }
 0x23c   :  { %1746 = vmatprep.subr.bf16.mxu0 %v4526_v62  ;;  %1787 = vmatprep.subr.bf16.mxu1 %v4531_v63 }
 0x23e   :  { %1673 = vmatmul.mubr.bf16.vlgmr.msra.gmra.mrb[40].mxu0 %v1146_v26  ;;  %1714 = vmatmul.mubr.bf16.vlgmr.msra.gmra.mrb[40].mxu1 %v1146_v26  ;;  %v7232_v26 = vld [vmem:[#allocation42_spill] sm:$0xff] }
 0x23f   :  { %1747 = vmatpush1.bf16.msra.mxu0 %v4538_v3  ;;  %1788 = vmatpush1.bf16.msra.mxu1 %v4543_v4 }
 0x240   :  { %1748 = vmatprep.subr.bf16.mxu0 %v4550_v5  ;;  %1789 = vmatprep.subr.bf16.mxu1 %v4555_v8 }
 0x243   :  { %1749 = vmatpush1.bf16.msra.mxu0 %v4560_v11  ;;  %1790 = vmatpush1.bf16.msra.mxu1 %v4565_v12 }
 0x244   :  { %1750 = vmatprep.subr.bf16.mxu0 %v7195_v37  ;;  %1791 = vmatprep.subr.bf16.mxu1 %v7196_v38 }
 0x247   :  { %1751 = vmatpush1.bf16.msra.mxu0 %v7197_v43  ;;  %1792 = vmatpush1.bf16.msra.mxu1 %v7198_v44 }
 0x248   :  { %1752 = vmatprep.subr.bf16.mxu0 %v7199_v47  ;;  %1793 = vmatprep.subr.bf16.mxu1 %v7200_v48 }
 0x24b   :  { %1753 = vmatpush1.bf16.msra.mxu0 %v7201_v52  ;;  %1794 = vmatpush1.bf16.msra.mxu1 %v7202_v55 }
 0x24c   :  { %1754 = vmatprep.subr.bf16.mxu0 %v7203_v0  ;;  %1795 = vmatprep.subr.bf16.mxu1 %v7204_v2 }
 0x24f   :  { %1755 = vmatpush1.bf16.msra.mxu0 %v7205_v9  ;;  %1796 = vmatpush1.bf16.msra.mxu1 %v7206_v10 }
 0x250   :  { %1756 = vmatprep.subr.bf16.mxu0 %v7207_v13  ;;  %1797 = vmatprep.subr.bf16.mxu1 %v7208_v14 }
 0x253   :  { %1757 = vmatpush1.bf16.msra.mxu0 %v7209_v1  ;;  %1798 = vmatpush1.bf16.msra.mxu1 %v7210_v41 }
 0x254   :  { %1758 = vmatprep.subr.bf16.mxu0 %v7211_v29  ;;  %1799 = vmatprep.subr.bf16.mxu1 %v7212_v28 }
 0x257   :  { %1759 = vmatpush1.bf16.msra.mxu0 %v7213_v25  ;;  %1800 = vmatpush1.bf16.msra.mxu1 %v7214_v24 }
 0x258   :  { %1760 = vmatprep.subr.bf16.mxu0 %v7215_v53  ;;  %1801 = vmatprep.subr.bf16.mxu1 %v7216_v21 }
 0x25b   :  { %1761 = vmatpush1.bf16.msra.mxu0 %v7217_v7  ;;  %1802 = vmatpush1.bf16.msra.mxu1 %v7218_v33 }
 0x25c   :  { %1762 = vmatprep.subr.bf16.mxu0 %v7219_v30  ;;  %1803 = vmatprep.subr.bf16.mxu1 %v7220_v34 }
 0x25f   :  { %1763 = vmatpush1.bf16.msra.mxu0 %v7221_v35  ;;  %1804 = vmatpush1.bf16.msra.mxu1 %v7222_v16  ;;  %v7233_v16 = vld [vmem:[#allocation43_spill] sm:$0xff] }
 0x260   :  { %1764 = vmatprep.subr.bf16.mxu0 %v7223_v42  ;;  %1805 = vmatprep.subr.bf16.mxu1 %v7224_v49  ;;  %v7234_v42 = vld [vmem:[#allocation44_spill] sm:$0xff]  ;;  %v7235_v49 = vld [vmem:[#allocation45_spill] sm:$0xff] }
 0x263   :  { %1765 = vmatpush1.bf16.msra.mxu0 %v7225_v57  ;;  %1806 = vmatpush1.bf16.msra.mxu1 %v7226_v6  ;;  %v7236_v57 = vld [vmem:[#allocation46_spill] sm:$0xff]  ;;  %v7237_v6 = vld [vmem:[#allocation47_spill] sm:$0xff] }
 0x264   :  { %1766 = vmatprep.subr.bf16.mxu0 %v7227_v15  ;;  %1807 = vmatprep.subr.bf16.mxu1 %v7228_v20  ;;  %v7238_v15 = vld [vmem:[#allocation48_spill] sm:$0xff]  ;;  %v7239_v20 = vld [vmem:[#allocation49_spill] sm:$0xff] }
 0x267   :  { %1767 = vmatpush1.bf16.msra.mxu0 %v7229_v27  ;;  %1808 = vmatpush1.bf16.msra.mxu1 %v7230_v36  ;;  %v7240_v27 = vld [vmem:[#allocation50_spill] sm:$0xff]  ;;  %v7241_v36 = vld [vmem:[#allocation51_spill] sm:$0xff] }
 0x268   :  { %1768 = vmatprep.subr.bf16.mxu0 %v7231_v18  ;;  %1809 = vmatprep.subr.bf16.mxu1 %v7232_v26  ;;  %v7242_v18 = vld [vmem:[#allocation52_spill] sm:$0xff]  ;;  %v7243_v26 = vld [vmem:[#allocation53_spill] sm:$0xff] }
 0x26b   :  { %1769 = vmatpush1.bf16.msra.mxu0 %v7233_v16  ;;  %1810 = vmatpush1.bf16.msra.mxu1 %v7234_v42  ;;  %v7244_v16 = vld [vmem:[#allocation54_spill] sm:$0xff]  ;;  %v7245_v42 = vld [vmem:[#allocation55_spill] sm:$0xff] }
 0x26c   :  { %1770 = vmatprep.subr.bf16.mxu0 %v7235_v49  ;;  %1811 = vmatprep.subr.bf16.mxu1 %v7236_v57  ;;  %v7246_v49 = vld [vmem:[#allocation56_spill] sm:$0xff]  ;;  %v7247_v57 = vld [vmem:[#allocation57_spill] sm:$0xff] }
 0x26f   :  { %1771 = vmatpush1.bf16.msra.mxu0 %v7237_v6  ;;  %1812 = vmatpush1.bf16.msra.mxu1 %v7238_v15  ;;  %v7248_v6 = vld [vmem:[#allocation58_spill] sm:$0xff]  ;;  %v7249_v15 = vld [vmem:[#allocation59_spill] sm:$0xff] }
 0x270   :  { %1772 = vmatprep.subr.bf16.mxu0 %v7239_v20  ;;  %1813 = vmatprep.subr.bf16.mxu1 %v7240_v27  ;;  %v7250_v20 = vld [vmem:[#allocation60_spill] sm:$0xff]  ;;  %v7251_v27 = vld [vmem:[#allocation3_spill] sm:$0xff] }
 0x273   :  { %1773 = vmatpush1.bf16.msra.mxu0 %v7241_v36  ;;  %1814 = vmatpush1.bf16.msra.mxu1 %v7242_v18  ;;  %v7252_v36 = vld [vmem:[#allocation4_spill] sm:$0xff] }
 0x274   :  { %1774 = vmatprep.subr.bf16.mxu0 %v7243_v26  ;;  %1815 = vmatprep.subr.bf16.mxu1 %v7244_v16  ;;  %v3324_v16 = vld [vmem:[%s6799_s2 + $0x2] ss:$8 sm:$0xf] }
 0x275   :  { %v7253_v26 = vld [vmem:[#allocation61_spill] sm:$0xff] }
 0x276   :  { %v7260_v25 = vsub.s32 3, %v7253_v26 }
 0x277   :  { %1775 = vmatpush1.bf16.msra.mxu0 %v7245_v42  ;;  %1816 = vmatpush1.bf16.msra.mxu1 %v7246_v49  ;;  %v7254_v42 = vsub.s32 0, %v7253_v26 }
 0x278   :  { %1776 = vmatprep.subr.bf16.mxu0 %v7247_v57  ;;  %1817 = vmatprep.subr.bf16.mxu1 %v7248_v6  ;;  %v7256_v57 = vsub.s32 1, %v7253_v26 }
 0x279   :  { %v5094_v18 = vrot.slane %v3324_v16, %v7254_v42 }
 0x27a   :  { %v5098_v49 = vrot.slane %v3324_v16, %v7256_v57 }
 0x27b   :  { %1777 = vmatpush1.bf16.msra.mxu0 %v7249_v15  ;;  %1818 = vmatpush1.bf16.msra.mxu1 %v7250_v20  ;;  %7255 = vst [vmem:[#allocation5_spill] sm:$0xff] %v5094_v18 }
 0x27c   :  { %1854 = vmatprep.subr.bf16.mxu0 %v7251_v27  ;;  %1895 = vmatprep.subr.bf16.mxu1 %v7252_v36  ;;  %7257 = vst [vmem:[#allocation6_spill] sm:$0xff] %v5098_v49  ;;  %v7258_v27 = vsub.s32 2, %v7253_v26 }
 0x27e   :  { %v5103_v35 = vrot.slane %v3324_v16, %v7258_v27 }
 0x280   :  { %7259 = vst [vmem:[#allocation7_spill] sm:$0xff] %v5103_v35 }
 0x2f1   :  { %v1566_v6 = vpop.f32.mrb[36].mxu0  ;;  %v1607_v15 = vpop.f32.mrb[36].mxu1 }
 0x2f2   :  { %v1614_v20 = vadd.f32 %v1566_v6, %v5094_v18  ;;  %v1568_v36 = vpop.f32.mrb[37].mxu0  ;;  %v1609_v34 = vpop.f32.mrb[37].mxu1  ;;  %v1616_v57 = vadd.f32 %v1607_v15, %v5103_v35  ;;  %v5109_v6 = vrot.slane %v3324_v16, %v7260_v25 }
 0x2f3   :  { %v1615_v30 = vadd.f32 %v1568_v36, %v5098_v49  ;;  %v1570_v33 = vpop.f32.mrb[38].mxu0  ;;  %v1611_v7 = vpop.f32.mrb[38].mxu1 }
 0x2f4   :  { %v1618_v42 = vmul.f32 0.5, %v1614_v20  ;;  %v1571_v21 = vpop.f32.mrb[39].mxu0  ;;  %v1612_v53 = vpop.f32.mrb[39].mxu1  ;;  %7261 = vst [vmem:[#allocation8_spill] sm:$0xff] %v5109_v6  ;;  %v1617_v27 = vadd.f32 %v1609_v34, %v5109_v6  ;;  %v7263_v34 = vld [vmem:[#allocation62_spill] sm:$0xff] }
 0x2f5   :  { %v1622_v24 = vmul.f32 0.5, %v1615_v30 }
 0x2f6   :  { %3724 = vtanh.f32 %v1618_v42  ;;  %v1627_v18 = vmul.f32 0.5, %v1617_v27  ;;  %v7264_v27 = vld [vmem:[#allocation63_spill] sm:$0xff] }
 0x2f7   :  { %3726 = vtanh.f32 %v1622_v24 }
 0x2f8   :  { %3728 = vtanh.f32 %v1616_v57 }
 0x2f9   :  { %3730 = vtanh.f32 %v1627_v18 }
 0x300   :  { %v3725_v28 = vpop.eup %3724 }
 0x301   :  { %v3727_v36 = vpop.eup %3726  ;;  %v1620_v33 = vmul.f32 0.5, %v3725_v28 }
 0x302   :  { %v1624_v7 = vmul.f32 0.5, %v3727_v36  ;;  %v3729_v53 = vpop.eup %3728 }
 0x303   :  { %v1621_v21 = vadd.f32 0.5, %v1620_v33  ;;  %v3731_v25 = vpop.eup %3730  ;;  %v7265_v33 = vld [vmem:[#allocation64_spill] sm:$0xff] }
 0x304   :  { %v1625_v30 = vadd.f32 0.5, %v1624_v7  ;;  %v1629_v24 = vmul.f32 0.5, %v3731_v25  ;;  %v7266_v7 = vld [vmem:[#allocation65_spill] sm:$0xff] }
 0x305   :  { %v1632_v20 = vmul.f32 %v3729_v53, %v1621_v21 }
 0x306   :  { %v1631_v42 = vmul.f32 0.0, %v1625_v30  ;;  %v1630_v18 = vadd.f32 0.5, %v1629_v24 }
 0x308   :  { %v5112_v15 = vadd.f32 %v1632_v20, %v1631_v42 }
 0x30a   :  { %7262 = vst [vmem:[#allocation9_spill] sm:$0xff] %v5112_v15  ;;  %3732 = vtanh.f32 %v5112_v15 }
 0x311   :  { %v1674_v16 = vpop.f32.mrb[40].mxu0  ;;  %v1715_v26 = vpop.f32.mrb[40].mxu1 }
 0x312   :  { %v1722_v57 = vadd.f32 %v1674_v16, %v7263_v34  ;;  %v1724_v6 = vadd.f32 %v1715_v26, %v7264_v27  ;;  %v1676_v28 = vpop.f32.mrb[41].mxu0  ;;  %v1717_v36 = vpop.f32.mrb[41].mxu1 }
 0x313   :  { %v1723_v35 = vadd.f32 %v1676_v28, %v7265_v33  ;;  %v1725_v21 = vadd.f32 %v1717_v36, %v7266_v7  ;;  %v1678_v53 = vpop.f32.mrb[42].mxu0  ;;  %v1719_v30 = vpop.f32.mrb[42].mxu1 }
 0x314   :  { %v3733_v20 = vpop.eup %3732  ;;  %v1726_v42 = vmul.f32 0.5, %v1722_v57  ;;  %v1679_v15 = vpop.f32.mrb[43].mxu0  ;;  %v5126_v30 = vld [vmem:[%s6797_s1 + $0x200] ss:$16 sps:$4 sm:$0xff]  }
 0x315   :  { %v1720_v49 = vpop.f32.mrb[43].mxu1  ;;  %v1730_v25 = vmul.f32 0.5, %v1723_v35  ;;  %v1635_v29 = vmul.f32 %v3733_v20, %v1630_v18  ;;  %v1735_v26 = vmul.f32 0.5, %v1725_v21  ;;  %v5138_v20 = vld [vmem:[%s6797_s1 + $0x224] ss:$16 sps:$4 sm:$0xff]  }
 0x316   :  { %3734 = vtanh.f32 %v1726_v42  ;;  %v5144_v42 = vld [vmem:[%s6797_s1 + $0x22c] ss:$16 sps:$4 sm:$0xff]  }
 0x317   :  { %3736 = vtanh.f32 %v1730_v25  ;;  %v1745_v16 = vpack.c.bf16 %v1635_v29, %v1635_v29  ;;  %v5152_v25 = vld [vmem:[%s6797_s1 + $0x220] ss:$16 sps:$4 sm:$0xff]  }
 0x318   :  { %3738 = vtanh.f32 %v1724_v6 }
 0x319   :  { %1778 = vmatprep.mubr.bf16.mxu0 %v1745_v16  ;;  %1819 = vmatprep.mubr.bf16.mxu1 %v1745_v16  ;;  %3740 = vtanh.f32 %v1735_v26  ;;  %v5158_v16 = vld [vmem:[%s6797_s1 + $0x228] ss:$16 sps:$4 sm:$0xff]   ;;  %v5164_v26 = vld [vmem:[%s6797_s1 + $0x244] ss:$16 sps:$4 sm:$0xff]  }
 0x320   :  { %v3735_v24 = vpop.eup %3734 }
 0x321   :  { %v3737_v34 = vpop.eup %3736  ;;  %v1728_v27 = vmul.f32 0.5, %v3735_v24  ;;  %v5170_v24 = vld [vmem:[%s6797_s1 + $0x24c] ss:$16 sps:$4 sm:$0xff]  }
 0x322   :  { %v1732_v28 = vmul.f32 0.5, %v3737_v34  ;;  %v3739_v33 = vpop.eup %3738  ;;  %v5176_v34 = vld [vmem:[%s6797_s1 + $0x240] ss:$16 sps:$4 sm:$0xff]  }
 0x323   :  { %v1729_v36 = vadd.f32 0.5, %v1728_v27  ;;  %v3741_v29 = vpop.eup %3740  ;;  %v5182_v27 = vld [vmem:[%s6797_s1 + $0x248] ss:$16 sps:$4 sm:$0xff]  }
 0x324   :  { %v1733_v7 = vadd.f32 0.5, %v1732_v28  ;;  %v1737_v15 = vmul.f32 0.5, %v3741_v29  ;;  %v5188_v28 = vld [vmem:[%s6797_s1 + $0x264] ss:$16 sps:$4 sm:$0xff]  }
 0x325   :  { %v1740_v57 = vmul.f32 %v3739_v33, %v1729_v36  ;;  %v5194_v36 = vld [vmem:[%s6797_s1 + $0x26c] ss:$16 sps:$4 sm:$0xff]   ;;  %v5200_v33 = vld [vmem:[%s6797_s1 + $0x260] ss:$16 sps:$4 sm:$0xff]  }
 0x326   :  { %v1739_v49 = vmul.f32 %v1733_v7, %v4988_v17  ;;  %v1738_v18 = vadd.f32 0.5, %v1737_v15  ;;  %v5132_v17 = vld [vmem:[%s6797_s1 + $0x208] ss:$16 sps:$4 sm:$0xff]  }
 0x327   :  { %v5206_v7 = vld [vmem:[%s6797_s1 + $0x268] ss:$16 sps:$4 sm:$0xff]  }
 0x328   :  { %v5120_v35 = vadd.f32 %v1740_v57, %v1739_v49  ;;  %v5292_v57 = vld [vmem:[%s6797_s1 + $0x204] ss:$16 sps:$4 sm:$0xff]   ;;  %v5298_v49 = vld [vmem:[%s6797_s1 + $0x20c] ss:$16 sps:$4 sm:$0xff]  }
 0x329   :  { %7307 = vst [vmem:[#allocation10_spill] sm:$0xff] %v5292_v57  ;;  %7308 = vst [vmem:[#allocation11_spill] sm:$0xff] %v5298_v49 }
 0x32a   :  { %3742 = vtanh.f32 %v5120_v35 }
 0x334   :  { %v3743_v6 = vpop.eup %3742 }
 0x335   :  { %v1743_v21 = vmul.f32 %v3743_v6, %v1738_v18  ;;  %v7309_v18 = vld [vmem:[#allocation5_spill] sm:$0xff] }
 0x337   :  { %v1744_v53 = vpack.c.bf16 %v1743_v21, %v1743_v21 }
 0x339   :  { %1779 = vmatmul.mubr.bf16.vlgmr.msra.gmra.mrb[44].mxu0 %v1744_v53  ;;  %1820 = vmatmul.mubr.bf16.vlgmr.msra.gmra.mrb[44].mxu1 %v1744_v53 }
 0x33a   :  { %1855 = vmatpush1.bf16.msra.mxu0 %v5126_v30  ;;  %1896 = vmatpush1.bf16.msra.mxu1 %v5132_v17 }
 0x33b   :  { %1856 = vmatprep.subr.bf16.mxu0 %v5138_v20  ;;  %1897 = vmatprep.subr.bf16.mxu1 %v5144_v42 }
 0x33c   :  { %1886 = vmatprep.mubr.bf16.mxu0 %v7194_v23  ;;  %1927 = vmatprep.mubr.bf16.mxu1 %v7194_v23 }
 0x33e   :  { %1857 = vmatpush1.bf16.msra.mxu0 %v5152_v25  ;;  %1898 = vmatpush1.bf16.msra.mxu1 %v5158_v16 }
 0x33f   :  { %1858 = vmatprep.subr.bf16.mxu0 %v5164_v26  ;;  %1899 = vmatprep.subr.bf16.mxu1 %v5170_v24 }
 0x342   :  { %1859 = vmatpush1.bf16.msra.mxu0 %v5176_v34  ;;  %1900 = vmatpush1.bf16.msra.mxu1 %v5182_v27 }
 0x343   :  { %1860 = vmatprep.subr.bf16.mxu0 %v5188_v28  ;;  %1901 = vmatprep.subr.bf16.mxu1 %v5194_v36 }
 0x346   :  { %1861 = vmatpush1.bf16.msra.mxu0 %v5200_v33  ;;  %1902 = vmatpush1.bf16.msra.mxu1 %v5206_v7 }
 0x347   :  { %1862 = vmatprep.subr.bf16.mxu0 %v4418_v19  ;;  %1903 = vmatprep.subr.bf16.mxu1 %v4425_v22  ;;  %v7267_v19 = vld [vmem:[#allocation21_spill] sm:$0xff]  ;;  %v7268_v22 = vld [vmem:[#allocation22_spill] sm:$0xff] }
 0x34a   :  { %1863 = vmatpush1.bf16.msra.mxu0 %v4432_v31  ;;  %1904 = vmatpush1.bf16.msra.mxu1 %v4437_v32  ;;  %v7269_v31 = vld [vmem:[#allocation23_spill] sm:$0xff]  ;;  %v7270_v32 = vld [vmem:[#allocation24_spill] sm:$0xff] }
 0x34b   :  { %1864 = vmatprep.subr.bf16.mxu0 %v4443_v39  ;;  %1905 = vmatprep.subr.bf16.mxu1 %v4448_v40  ;;  %v7271_v39 = vld [vmem:[#allocation25_spill] sm:$0xff]  ;;  %v7272_v40 = vld [vmem:[#allocation26_spill] sm:$0xff] }
 0x34e   :  { %1865 = vmatpush1.bf16.msra.mxu0 %v4457_v45  ;;  %1906 = vmatpush1.bf16.msra.mxu1 %v4462_v46  ;;  %v7273_v45 = vld [vmem:[#allocation27_spill] sm:$0xff]  ;;  %v7274_v46 = vld [vmem:[#allocation28_spill] sm:$0xff] }
 0x34f   :  { %1866 = vmatprep.subr.bf16.mxu0 %v4470_v50  ;;  %1907 = vmatprep.subr.bf16.mxu1 %v4475_v51  ;;  %v7275_v50 = vld [vmem:[#allocation29_spill] sm:$0xff]  ;;  %v7276_v51 = vld [vmem:[#allocation30_spill] sm:$0xff] }
 0x352   :  { %1867 = vmatpush1.bf16.msra.mxu0 %v4484_v54  ;;  %1908 = vmatpush1.bf16.msra.mxu1 %v4489_v56  ;;  %v7277_v54 = vld [vmem:[#allocation31_spill] sm:$0xff]  ;;  %v7278_v56 = vld [vmem:[#allocation32_spill] sm:$0xff] }
 0x353   :  { %1868 = vmatprep.subr.bf16.mxu0 %v4496_v58  ;;  %1909 = vmatprep.subr.bf16.mxu1 %v4501_v59  ;;  %v7279_v58 = vld [vmem:[#allocation33_spill] sm:$0xff]  ;;  %v7280_v59 = vld [vmem:[#allocation34_spill] sm:$0xff] }
 0x356   :  { %1869 = vmatpush1.bf16.msra.mxu0 %v4508_v60  ;;  %1910 = vmatpush1.bf16.msra.mxu1 %v4513_v61  ;;  %v7281_v60 = vld [vmem:[#allocation35_spill] sm:$0xff]  ;;  %v7282_v61 = vld [vmem:[#allocation36_spill] sm:$0xff] }
 0x357   :  { %1960 = vmatprep.subr.bf16.mxu0 %v4526_v62  ;;  %2001 = vmatprep.subr.bf16.mxu1 %v4531_v63  ;;  %v7283_v62 = vld [vmem:[#allocation37_spill] sm:$0xff]  ;;  %v7284_v63 = vld [vmem:[#allocation38_spill] sm:$0xff] }
 0x359   :  { %1887 = vmatmul.mubr.bf16.vlgmr.msra.gmra.mrb[48].mxu0 %v1744_v53  ;;  %1928 = vmatmul.mubr.bf16.vlgmr.msra.gmra.mrb[48].mxu1 %v1744_v53 }
 0x35a   :  { %1961 = vmatpush1.bf16.msra.mxu0 %v4538_v3  ;;  %2002 = vmatpush1.bf16.msra.mxu1 %v4543_v4  ;;  %v7285_v3 = vld [vmem:[#allocation39_spill] sm:$0xff]  ;;  %v7286_v4 = vld [vmem:[#allocation40_spill] sm:$0xff] }
 0x35b   :  { %1962 = vmatprep.subr.bf16.mxu0 %v4550_v5  ;;  %2003 = vmatprep.subr.bf16.mxu1 %v4555_v8  ;;  %v7287_v5 = vld [vmem:[#allocation41_spill] sm:$0xff]  ;;  %v7288_v8 = vld [vmem:[#allocation42_spill] sm:$0xff] }
 0x35e   :  { %1963 = vmatpush1.bf16.msra.mxu0 %v4560_v11  ;;  %2004 = vmatpush1.bf16.msra.mxu1 %v4565_v12  ;;  %v7289_v11 = vld [vmem:[#allocation43_spill] sm:$0xff]  ;;  %v7290_v12 = vld [vmem:[#allocation44_spill] sm:$0xff] }
 0x35f   :  { %1964 = vmatprep.subr.bf16.mxu0 %v7195_v37  ;;  %2005 = vmatprep.subr.bf16.mxu1 %v7196_v38  ;;  %v7291_v37 = vld [vmem:[#allocation45_spill] sm:$0xff]  ;;  %v7292_v38 = vld [vmem:[#allocation46_spill] sm:$0xff] }
 0x362   :  { %1965 = vmatpush1.bf16.msra.mxu0 %v7197_v43  ;;  %2006 = vmatpush1.bf16.msra.mxu1 %v7198_v44  ;;  %v7293_v43 = vld [vmem:[#allocation47_spill] sm:$0xff]  ;;  %v7294_v44 = vld [vmem:[#allocation48_spill] sm:$0xff] }
 0x363   :  { %1966 = vmatprep.subr.bf16.mxu0 %v7199_v47  ;;  %2007 = vmatprep.subr.bf16.mxu1 %v7200_v48  ;;  %v7295_v47 = vld [vmem:[#allocation49_spill] sm:$0xff]  ;;  %v7296_v48 = vld [vmem:[#allocation50_spill] sm:$0xff] }
 0x366   :  { %1967 = vmatpush1.bf16.msra.mxu0 %v7201_v52  ;;  %2008 = vmatpush1.bf16.msra.mxu1 %v7202_v55  ;;  %v7297_v52 = vld [vmem:[#allocation51_spill] sm:$0xff]  ;;  %v7298_v55 = vld [vmem:[#allocation52_spill] sm:$0xff] }
 0x367   :  { %1968 = vmatprep.subr.bf16.mxu0 %v7203_v0  ;;  %2009 = vmatprep.subr.bf16.mxu1 %v7204_v2  ;;  %v7299_v0 = vld [vmem:[#allocation53_spill] sm:$0xff]  ;;  %v7300_v2 = vld [vmem:[#allocation54_spill] sm:$0xff] }
 0x36a   :  { %1969 = vmatpush1.bf16.msra.mxu0 %v7205_v9  ;;  %2010 = vmatpush1.bf16.msra.mxu1 %v7206_v10  ;;  %v7301_v9 = vld [vmem:[#allocation55_spill] sm:$0xff]  ;;  %v7302_v10 = vld [vmem:[#allocation56_spill] sm:$0xff] }
 0x36b   :  { %1970 = vmatprep.subr.bf16.mxu0 %v7207_v13  ;;  %2011 = vmatprep.subr.bf16.mxu1 %v7208_v14  ;;  %v7303_v13 = vld [vmem:[#allocation57_spill] sm:$0xff]  ;;  %v7304_v14 = vld [vmem:[#allocation58_spill] sm:$0xff] }
 0x36e   :  { %1971 = vmatpush1.bf16.msra.mxu0 %v7209_v1  ;;  %2012 = vmatpush1.bf16.msra.mxu1 %v7210_v41  ;;  %v7305_v1 = vld [vmem:[#allocation59_spill] sm:$0xff]  ;;  %v7306_v41 = vld [vmem:[#allocation60_spill] sm:$0xff] }
 0x36f   :  { %1972 = vmatprep.subr.bf16.mxu0 %v7267_v19  ;;  %2013 = vmatprep.subr.bf16.mxu1 %v7268_v22  ;;  %v7310_v19 = vld [vmem:[#allocation6_spill] sm:$0xff] }
 0x372   :  { %1973 = vmatpush1.bf16.msra.mxu0 %v7269_v31  ;;  %2014 = vmatpush1.bf16.msra.mxu1 %v7270_v32 }
 0x373   :  { %1974 = vmatprep.subr.bf16.mxu0 %v7271_v39  ;;  %2015 = vmatprep.subr.bf16.mxu1 %v7272_v40 }
 0x376   :  { %1975 = vmatpush1.bf16.msra.mxu0 %v7273_v45  ;;  %2016 = vmatpush1.bf16.msra.mxu1 %v7274_v46 }
 0x377   :  { %1976 = vmatprep.subr.bf16.mxu0 %v7275_v50  ;;  %2017 = vmatprep.subr.bf16.mxu1 %v7276_v51  ;;  %v7311_v50 = vld [vmem:[#allocation7_spill] sm:$0xff] }
 0x37a   :  { %1977 = vmatpush1.bf16.msra.mxu0 %v7277_v54  ;;  %2018 = vmatpush1.bf16.msra.mxu1 %v7278_v56  ;;  %v7312_v54 = vld [vmem:[#allocation8_spill] sm:$0xff] }
 0x37b   :  { %1978 = vmatprep.subr.bf16.mxu0 %v7279_v58  ;;  %2019 = vmatprep.subr.bf16.mxu1 %v7280_v59 }
 0x37e   :  { %1979 = vmatpush1.bf16.msra.mxu0 %v7281_v60  ;;  %2020 = vmatpush1.bf16.msra.mxu1 %v7282_v61 }
 0x37f   :  { %1980 = vmatprep.subr.bf16.mxu0 %v7283_v62  ;;  %2021 = vmatprep.subr.bf16.mxu1 %v7284_v63 }
 0x382   :  { %1981 = vmatpush1.bf16.msra.mxu0 %v7285_v3  ;;  %2022 = vmatpush1.bf16.msra.mxu1 %v7286_v4 }
 0x383   :  { %1982 = vmatprep.subr.bf16.mxu0 %v7287_v5  ;;  %2023 = vmatprep.subr.bf16.mxu1 %v7288_v8  ;;  %v7313_v8 = vld [vmem:[#allocation9_spill] sm:$0xff] }
 0x386   :  { %1983 = vmatpush1.bf16.msra.mxu0 %v7289_v11  ;;  %2024 = vmatpush1.bf16.msra.mxu1 %v7290_v12 }
 0x387   :  { %1984 = vmatprep.subr.bf16.mxu0 %v7291_v37  ;;  %2025 = vmatprep.subr.bf16.mxu1 %v7292_v38 }
 0x38a   :  { %1985 = vmatpush1.bf16.msra.mxu0 %v7293_v43  ;;  %2026 = vmatpush1.bf16.msra.mxu1 %v7294_v44 }
 0x38b   :  { %1986 = vmatprep.subr.bf16.mxu0 %v7295_v47  ;;  %2027 = vmatprep.subr.bf16.mxu1 %v7296_v48  ;;  %v7314_v47 = vld [vmem:[#allocation66_spill] sm:$0xff] }
 0x38e   :  { %1987 = vmatpush1.bf16.msra.mxu0 %v7297_v52  ;;  %2028 = vmatpush1.bf16.msra.mxu1 %v7298_v55  ;;  %v7315_v52 = vld [vmem:[#allocation67_spill] sm:$0xff] }
 0x38f   :  { %1988 = vmatprep.subr.bf16.mxu0 %v7299_v0  ;;  %2029 = vmatprep.subr.bf16.mxu1 %v7300_v2 }
 0x392   :  { %1989 = vmatpush1.bf16.msra.mxu0 %v7301_v9  ;;  %2030 = vmatpush1.bf16.msra.mxu1 %v7302_v10  ;;  %v7316_v10 = vld [vmem:[#allocation68_spill] sm:$0xff] }
 0x393   :  { %1990 = vmatprep.subr.bf16.mxu0 %v7303_v13  ;;  %2031 = vmatprep.subr.bf16.mxu1 %v7304_v14  ;;  %v7317_v14 = vld [vmem:[#allocation69_spill] sm:$0xff] }
 0x396   :  { %1991 = vmatpush1.bf16.msra.mxu0 %v7305_v1  ;;  %2032 = vmatpush1.bf16.msra.mxu1 %v7306_v41 }
 0x397   :  { %2068 = vmatprep.subr.bf16.mxu0 %v5292_v57  ;;  %2109 = vmatprep.subr.bf16.mxu1 %v5298_v49 }
 0x40c   :  { %v1780_v29 = vpop.f32.mrb[44].mxu0  ;;  %v1821_v15 = vpop.f32.mrb[44].mxu1 }
 0x40d   :  { %v1828_v6 = vadd.f32 %v1780_v29, %v7309_v18  ;;  %v1782_v21 = vpop.f32.mrb[45].mxu0  ;;  %v1823_v53 = vpop.f32.mrb[45].mxu1  ;;  %v1830_v51 = vadd.f32 %v1821_v15, %v7311_v50 }
 0x40e   :  { %v1829_v22 = vadd.f32 %v1782_v21, %v7310_v19  ;;  %v1784_v31 = vpop.f32.mrb[46].mxu0  ;;  %v1825_v32 = vpop.f32.mrb[46].mxu1  ;;  %v1831_v56 = vadd.f32 %v1823_v53, %v7312_v54 }
 0x40f   :  { %v1832_v39 = vmul.f32 0.5, %v1828_v6  ;;  %v1785_v40 = vpop.f32.mrb[47].mxu0  ;;  %v1826_v45 = vpop.f32.mrb[47].mxu1 }
 0x410   :  { %v1836_v46 = vmul.f32 0.5, %v1829_v22  ;;  %v1841_v58 = vmul.f32 0.5, %v1831_v56 }
 0x411   :  { %3744 = vtanh.f32 %v1832_v39 }
 0x412   :  { %3746 = vtanh.f32 %v1836_v46 }
 0x413   :  { %3748 = vtanh.f32 %v1830_v51 }
 0x414   :  { %3750 = vtanh.f32 %v1841_v58 }
 0x41b   :  { %v3745_v59 = vpop.eup %3744 }
 0x41c   :  { %v3747_v60 = vpop.eup %3746  ;;  %v1834_v61 = vmul.f32 0.5, %v3745_v59 }
 0x41d   :  { %v1838_v62 = vmul.f32 0.5, %v3747_v60  ;;  %v3749_v3 = vpop.eup %3748 }
 0x41e   :  { %v1835_v63 = vadd.f32 0.5, %v1834_v61  ;;  %v3751_v37 = vpop.eup %3750 }
 0x41f   :  { %v1839_v4 = vadd.f32 0.5, %v1838_v62  ;;  %v1843_v38 = vmul.f32 0.5, %v3751_v37  ;;  %v5342_v37 = vld [vmem:[%s6797_s1 + $0x28c] ss:$16 sps:$4 sm:$0xff]  }
 0x420   :  { %v1846_v5 = vmul.f32 %v3749_v3, %v1835_v63 }
 0x421   :  { %v1845_v11 = vmul.f32 %v1839_v4, %v7313_v8  ;;  %v1844_v9 = vadd.f32 0.5, %v1843_v38  ;;  %v5348_v38 = vld [vmem:[%s6797_s1 + $0x280] ss:$16 sps:$4 sm:$0xff]  }
 0x423   :  { %v5306_v12 = vadd.f32 %v1846_v5, %v1845_v11 }
 0x425   :  { %3752 = vtanh.f32 %v5306_v12 }
 0x42c   :  { %v1888_v43 = vpop.f32.mrb[48].mxu0  ;;  %v1929_v44 = vpop.f32.mrb[48].mxu1 }
 0x42d   :  { %v1936_v48 = vadd.f32 %v1888_v43, %v7314_v47  ;;  %v1938_v55 = vadd.f32 %v1929_v44, %v7315_v52  ;;  %v1890_v0 = vpop.f32.mrb[49].mxu0  ;;  %v1931_v2 = vpop.f32.mrb[49].mxu1  ;;  %v5354_v43 = vld [vmem:[%s6797_s1 + $0x288] ss:$16 sps:$4 sm:$0xff]   ;;  %v5360_v44 = vld [vmem:[%s6797_s1 + $0x2a4] ss:$16 sps:$4 sm:$0xff]  }
 0x42e   :  { %v1937_v13 = vadd.f32 %v1890_v0, %v7316_v10  ;;  %v1939_v1 = vadd.f32 %v1931_v2, %v7317_v14  ;;  %v1892_v41 = vpop.f32.mrb[50].mxu0  ;;  %v1933_v29 = vpop.f32.mrb[50].mxu1  ;;  %v5366_v47 = vld [vmem:[%s6797_s1 + $0x2ac] ss:$16 sps:$4 sm:$0xff]   ;;  %v5378_v52 = vld [vmem:[%s6797_s1 + $0x2a8] ss:$16 sps:$4 sm:$0xff]  }
 0x42f   :  { %v3753_v15 = vpop.eup %3752  ;;  %v1940_v6 = vmul.f32 0.5, %v1936_v48  ;;  %v1893_v21 = vpop.f32.mrb[51].mxu0  ;;  %v5372_v48 = vld [vmem:[%s6797_s1 + $0x2a0] ss:$16 sps:$4 sm:$0xff]   ;;  %v5390_v0 = vld [vmem:[%s6797_s1 + $0x2cc] ss:$16 sps:$4 sm:$0xff]  }
 0x430   :  { %v1934_v53 = vpop.f32.mrb[51].mxu1  ;;  %v1944_v22 = vmul.f32 0.5, %v1937_v13  ;;  %v1849_v31 = vmul.f32 %v3753_v15, %v1844_v9  ;;  %v1949_v39 = vmul.f32 0.5, %v1939_v1  ;;  %v5396_v2 = vld [vmem:[%s6797_s1 + $0x2c0] ss:$16 sps:$4 sm:$0xff]  }
 0x431   :  { %3754 = vtanh.f32 %v1940_v6  ;;  %v5402_v9 = vld [vmem:[%s6797_s1 + $0x2c8] ss:$16 sps:$4 sm:$0xff]   ;;  %v5408_v10 = vld [vmem:[%s6797_s1 + $0x2e4] ss:$16 sps:$4 sm:$0xff]   ;;  %v5414_v13 = vld [vmem:[%s6797_s1 + $0x2ec] ss:$16 sps:$4 sm:$0xff]  }
 0x432   :  { %3756 = vtanh.f32 %v1944_v22  ;;  %v1959_v32 = vpack.c.bf16 %v1849_v31, %v1849_v31  ;;  %v5420_v14 = vld [vmem:[%s6797_s1 + $0x2e0] ss:$16 sps:$4 sm:$0xff]   ;;  %v5426_v1 = vld [vmem:[%s6797_s1 + $0x2e8] ss:$16 sps:$4 sm:$0xff]   ;;  %v5432_v41 = vld [vmem:[%s6797_s1 + $0x304] ss:$16 sps:$4 sm:$0xff]  }
 0x433   :  { %3758 = vtanh.f32 %v1938_v55  ;;  %v5384_v55 = vld [vmem:[%s6797_s1 + $0x2c4] ss:$16 sps:$4 sm:$0xff]   ;;  %v5438_v29 = vld [vmem:[%s6797_s1 + $0x30c] ss:$16 sps:$4 sm:$0xff]   ;;  %v5444_v15 = vld [vmem:[%s6797_s1 + $0x300] ss:$16 sps:$4 sm:$0xff]  }
 0x434   :  { %1992 = vmatprep.mubr.bf16.mxu0 %v1959_v32  ;;  %2033 = vmatprep.mubr.bf16.mxu1 %v1959_v32  ;;  %3760 = vtanh.f32 %v1949_v39  ;;  %v5450_v6 = vld [vmem:[%s6797_s1 + $0x308] ss:$16 sps:$4 sm:$0xff]   ;;  %v5456_v21 = vld [vmem:[%s6797_s1 + $0x324] ss:$16 sps:$4 sm:$0xff]   ;;  %v5462_v53 = vld [vmem:[%s6797_s1 + $0x32c] ss:$16 sps:$4 sm:$0xff]  }
 0x435   :  { %v5468_v22 = vld [vmem:[%s6797_s1 + $0x320] ss:$16 sps:$4 sm:$0xff]   ;;  %v5474_v31 = vld [vmem:[%s6797_s1 + $0x328] ss:$16 sps:$4 sm:$0xff]   ;;  %v5480_v32 = vld [vmem:[%s6797_s1 + $0x344] ss:$16 sps:$4 sm:$0xff]  }
 0x436   :  { %v5486_v39 = vld [vmem:[%s6797_s1 + $0x34c] ss:$16 sps:$4 sm:$0xff]  }
 0x43b   :  { %v3755_v40 = vpop.eup %3754 }
 0x43c   :  { %v3757_v45 = vpop.eup %3756  ;;  %v1942_v46 = vmul.f32 0.5, %v3755_v40  ;;  %v5492_v40 = vld [vmem:[%s6797_s1 + $0x340] ss:$16 sps:$4 sm:$0xff]  }
 0x43d   :  { %v1946_v51 = vmul.f32 0.5, %v3757_v45  ;;  %v3759_v58 = vpop.eup %3758  ;;  %7318 = vst [vmem:[#allocation12_spill] sm:$0xff] %v5492_v40  ;;  %v5498_v45 = vld [vmem:[%s6797_s1 + $0x348] ss:$16 sps:$4 sm:$0xff]  }
 0x43e   :  { %v1943_v56 = vadd.f32 0.5, %v1942_v46  ;;  %v3761_v63 = vpop.eup %3760  ;;  %7319 = vst [vmem:[#allocation13_spill] sm:$0xff] %v5498_v45  ;;  %v5504_v46 = vld [vmem:[%s6797_s1 + $0x364] ss:$16 sps:$4 sm:$0xff]  }
 0x43f   :  { %v1947_v59 = vadd.f32 0.5, %v1946_v51  ;;  %v1951_v3 = vmul.f32 0.5, %v3761_v63  ;;  %7320 = vst [vmem:[#allocation14_spill] sm:$0xff] %v5504_v46  ;;  %v5510_v51 = vld [vmem:[%s6797_s1 + $0x36c] ss:$16 sps:$4 sm:$0xff]  }
 0x440   :  { %v1954_v60 = vmul.f32 %v3759_v58, %v1943_v56  ;;  %7321 = vst [vmem:[#allocation15_spill] sm:$0xff] %v5510_v51  ;;  %v5516_v56 = vld [vmem:[%s6797_s1 + $0x360] ss:$16 sps:$4 sm:$0xff]   ;;  %v5522_v58 = vld [vmem:[%s6797_s1 + $0x368] ss:$16 sps:$4 sm:$0xff]  }
 0x441   :  { %v1953_v61 = vmul.f32 %v1947_v59, %v5120_v35  ;;  %v1952_v4 = vadd.f32 0.5, %v1951_v3  ;;  %v5336_v35 = vld [vmem:[%s6797_s1 + $0x284] ss:$16 sps:$4 sm:$0xff]   ;;  %7322 = vst [vmem:[#allocation16_spill] sm:$0xff] %v5516_v56  ;;  %7323 = vst [vmem:[#allocation17_spill] sm:$0xff] %v5522_v58 }
 0x442   :  { %v5528_v59 = vld [vmem:[%s6797_s1 + $0x384] ss:$16 sps:$4 sm:$0xff]   ;;  %v5546_v63 = vld [vmem:[%s6797_s1 + $0x388] ss:$16 sps:$4 sm:$0xff]  }
 0x443   :  { %v5314_v62 = vadd.f32 %v1954_v60, %v1953_v61  ;;  %7324 = vst [vmem:[#allocation18_spill] sm:$0xff] %v5528_v59  ;;  %v5534_v60 = vld [vmem:[%s6797_s1 + $0x38c] ss:$16 sps:$4 sm:$0xff]   ;;  %v5540_v61 = vld [vmem:[%s6797_s1 + $0x380] ss:$16 sps:$4 sm:$0xff]   ;;  %7327 = vst [vmem:[#allocation3_spill] sm:$0xff] %v5546_v63 }
 0x444   :  { %7325 = vst [vmem:[#allocation19_spill] sm:$0xff] %v5534_v60  ;;  %7326 = vst [vmem:[#allocation20_spill] sm:$0xff] %v5540_v61  ;;  %v5552_v3 = vld [vmem:[%s6797_s1 + $0x3a4] ss:$16 sps:$4 sm:$0xff]  }
 0x445   :  { %3762 = vtanh.f32 %v5314_v62  ;;  %7328 = vst [vmem:[#allocation4_spill] sm:$0xff] %v5552_v3 }
 0x44f   :  { %v3763_v5 = vpop.eup %3762 }
 0x450   :  { %v1957_v8 = vmul.f32 %v3763_v5, %v1952_v4  ;;  %v5558_v4 = vld [vmem:[%s6797_s1 + $0x3ac] ss:$16 sps:$4 sm:$0xff]   ;;  %v5564_v5 = vld [vmem:[%s6797_s1 + $0x3a0] ss:$16 sps:$4 sm:$0xff]  }
 0x451   :  { %7329 = vst [vmem:[#allocation61_spill] sm:$0xff] %v5558_v4  ;;  %7330 = vst [vmem:[#allocation62_spill] sm:$0xff] %v5564_v5 }
 0x452   :  { %v1958_v11 = vpack.c.bf16 %v1957_v8, %v1957_v8  ;;  %v5570_v8 = vld [vmem:[%s6797_s1 + $0x3a8] ss:$16 sps:$4 sm:$0xff]  }
 0x453   :  { %7331 = vst [vmem:[#allocation63_spill] sm:$0xff] %v5570_v8 }
 0x454   :  { %1993 = vmatmul.mubr.bf16.vlgmr.msra.gmra.mrb[52].mxu0 %v1958_v11  ;;  %2034 = vmatmul.mubr.bf16.vlgmr.msra.gmra.mrb[52].mxu1 %v1958_v11 }
 0x455   :  { %2069 = vmatpush1.bf16.msra.mxu0 %v5126_v30  ;;  %2110 = vmatpush1.bf16.msra.mxu1 %v5132_v17 }
 0x456   :  { %2070 = vmatprep.subr.bf16.mxu0 %v5138_v20  ;;  %2111 = vmatprep.subr.bf16.mxu1 %v5144_v42 }
 0x457   :  { %2100 = vmatprep.mubr.bf16.mxu0 %v7194_v23  ;;  %2141 = vmatprep.mubr.bf16.mxu1 %v7194_v23 }
 0x459   :  { %2071 = vmatpush1.bf16.msra.mxu0 %v5152_v25  ;;  %2112 = vmatpush1.bf16.msra.mxu1 %v5158_v16 }
 0x45a   :  { %2072 = vmatprep.subr.bf16.mxu0 %v5164_v26  ;;  %2113 = vmatprep.subr.bf16.mxu1 %v5170_v24 }
 0x45d   :  { %2073 = vmatpush1.bf16.msra.mxu0 %v5176_v34  ;;  %2114 = vmatpush1.bf16.msra.mxu1 %v5182_v27 }
 0x45e   :  { %2074 = vmatprep.subr.bf16.mxu0 %v5188_v28  ;;  %2115 = vmatprep.subr.bf16.mxu1 %v5194_v36 }
 0x461   :  { %2075 = vmatpush1.bf16.msra.mxu0 %v5200_v33  ;;  %2116 = vmatpush1.bf16.msra.mxu1 %v5206_v7 }
 0x462   :  { %2076 = vmatprep.subr.bf16.mxu0 %v5336_v35  ;;  %2117 = vmatprep.subr.bf16.mxu1 %v5342_v37 }
 0x465   :  { %2077 = vmatpush1.bf16.msra.mxu0 %v5348_v38  ;;  %2118 = vmatpush1.bf16.msra.mxu1 %v5354_v43 }
 0x466   :  { %2078 = vmatprep.subr.bf16.mxu0 %v5360_v44  ;;  %2119 = vmatprep.subr.bf16.mxu1 %v5366_v47 }
 0x469   :  { %2079 = vmatpush1.bf16.msra.mxu0 %v5372_v48  ;;  %2120 = vmatpush1.bf16.msra.mxu1 %v5378_v52 }
 0x46a   :  { %2080 = vmatprep.subr.bf16.mxu0 %v5384_v55  ;;  %2121 = vmatprep.subr.bf16.mxu1 %v5390_v0 }
 0x46d   :  { %2081 = vmatpush1.bf16.msra.mxu0 %v5396_v2  ;;  %2122 = vmatpush1.bf16.msra.mxu1 %v5402_v9 }
 0x46e   :  { %2082 = vmatprep.subr.bf16.mxu0 %v5408_v10  ;;  %2123 = vmatprep.subr.bf16.mxu1 %v5414_v13 }
 0x471   :  { %2083 = vmatpush1.bf16.msra.mxu0 %v5420_v14  ;;  %2124 = vmatpush1.bf16.msra.mxu1 %v5426_v1 }
 0x472   :  { %2174 = vmatprep.subr.bf16.mxu0 %v5432_v41  ;;  %2215 = vmatprep.subr.bf16.mxu1 %v5438_v29 }
 0x474   :  { %2101 = vmatmul.mubr.bf16.vlgmr.msra.gmra.mrb[56].mxu0 %v1958_v11  ;;  %2142 = vmatmul.mubr.bf16.vlgmr.msra.gmra.mrb[56].mxu1 %v1958_v11  ;;  %v5576_v11 = vld [vmem:[%s6797_s1 + $0x3c4] ss:$16 sps:$4 sm:$0xff]  }
 0x475   :  { %2175 = vmatpush1.bf16.msra.mxu0 %v5444_v15  ;;  %2216 = vmatpush1.bf16.msra.mxu1 %v5450_v6  ;;  %7332 = vst [vmem:[#allocation64_spill] sm:$0xff] %v5576_v11 }
 0x476   :  { %2176 = vmatprep.subr.bf16.mxu0 %v5456_v21  ;;  %2217 = vmatprep.subr.bf16.mxu1 %v5462_v53 }
 0x479   :  { %2177 = vmatpush1.bf16.msra.mxu0 %v5468_v22  ;;  %2218 = vmatpush1.bf16.msra.mxu1 %v5474_v31 }
 0x47a   :  { %2178 = vmatprep.subr.bf16.mxu0 %v5480_v32  ;;  %2219 = vmatprep.subr.bf16.mxu1 %v5486_v39 }
 0x47d   :  { %2179 = vmatpush1.bf16.msra.mxu0 %v5492_v40  ;;  %2220 = vmatpush1.bf16.msra.mxu1 %v5498_v45 }
 0x47e   :  { %2180 = vmatprep.subr.bf16.mxu0 %v5504_v46  ;;  %2221 = vmatprep.subr.bf16.mxu1 %v5510_v51 }
 0x481   :  { %2181 = vmatpush1.bf16.msra.mxu0 %v5516_v56  ;;  %2222 = vmatpush1.bf16.msra.mxu1 %v5522_v58 }
 0x482   :  { %2182 = vmatprep.subr.bf16.mxu0 %v5528_v59  ;;  %2223 = vmatprep.subr.bf16.mxu1 %v5534_v60 }
 0x485   :  { %2183 = vmatpush1.bf16.msra.mxu0 %v5540_v61  ;;  %2224 = vmatpush1.bf16.msra.mxu1 %v5546_v63 }
 0x486   :  { %2184 = vmatprep.subr.bf16.mxu0 %v5552_v3  ;;  %2225 = vmatprep.subr.bf16.mxu1 %v5558_v4  ;;  %v5582_v4 = vld [vmem:[%s6797_s1 + $0x3cc] ss:$16 sps:$4 sm:$0xff]  }
 0x487   :  { %7333 = vst [vmem:[#allocation65_spill] sm:$0xff] %v5582_v4 }
 0x489   :  { %2185 = vmatpush1.bf16.msra.mxu0 %v5564_v5  ;;  %2226 = vmatpush1.bf16.msra.mxu1 %v5570_v8  ;;  %v5588_v5 = vld [vmem:[%s6797_s1 + $0x3c0] ss:$16 sps:$4 sm:$0xff]   ;;  %v5594_v8 = vld [vmem:[%s6797_s1 + $0x3c8] ss:$16 sps:$4 sm:$0xff]  }
 0x48a   :  { %2186 = vmatprep.subr.bf16.mxu0 %v5576_v11  ;;  %2227 = vmatprep.subr.bf16.mxu1 %v5582_v4  ;;  %7334 = vst [vmem:[#allocation21_spill] sm:$0xff] %v5588_v5  ;;  %7335 = vst [vmem:[#allocation22_spill] sm:$0xff] %v5594_v8  ;;  %v5600_v11 = vld [vmem:[%s6797_s1 + $0x3e4] ss:$16 sps:$4 sm:$0xff]   ;;  %v5606_v4 = vld [vmem:[%s6797_s1 + $0x3ec] ss:$16 sps:$4 sm:$0xff]  }
 0x48b   :  { %7336 = vst [vmem:[#allocation23_spill] sm:$0xff] %v5600_v11  ;;  %7337 = vst [vmem:[#allocation24_spill] sm:$0xff] %v5606_v4 }
 0x48d   :  { %2187 = vmatpush1.bf16.msra.mxu0 %v5588_v5  ;;  %2228 = vmatpush1.bf16.msra.mxu1 %v5594_v8  ;;  %v5612_v5 = vld [vmem:[%s6797_s1 + $0x3e0] ss:$16 sps:$4 sm:$0xff]   ;;  %v5618_v8 = vld [vmem:[%s6797_s1 + $0x3e8] ss:$16 sps:$4 sm:$0xff]  }
 0x48e   :  { %2188 = vmatprep.subr.bf16.mxu0 %v5600_v11  ;;  %2229 = vmatprep.subr.bf16.mxu1 %v5606_v4  ;;  %7338 = vst [vmem:[#allocation25_spill] sm:$0xff] %v5612_v5  ;;  %7339 = vst [vmem:[#allocation26_spill] sm:$0xff] %v5618_v8  ;;  %v5624_v11 = vld [vmem:[%s6797_s1 + $0x404] ss:$16 sps:$4 sm:$0xff]   ;;  %v5630_v4 = vld [vmem:[%s6797_s1 + $0x40c] ss:$16 sps:$4 sm:$0xff]  }
 0x48f   :  { %7340 = vst [vmem:[#allocation27_spill] sm:$0xff] %v5624_v11  ;;  %7341 = vst [vmem:[#allocation28_spill] sm:$0xff] %v5630_v4 }
 0x491   :  { %2189 = vmatpush1.bf16.msra.mxu0 %v5612_v5  ;;  %2230 = vmatpush1.bf16.msra.mxu1 %v5618_v8  ;;  %v5636_v5 = vld [vmem:[%s6797_s1 + $0x400] ss:$16 sps:$4 sm:$0xff]   ;;  %v5642_v8 = vld [vmem:[%s6797_s1 + $0x408] ss:$16 sps:$4 sm:$0xff]  }
 0x492   :  { %2190 = vmatprep.subr.bf16.mxu0 %v5624_v11  ;;  %2231 = vmatprep.subr.bf16.mxu1 %v5630_v4  ;;  %7342 = vst [vmem:[#allocation29_spill] sm:$0xff] %v5636_v5  ;;  %7343 = vst [vmem:[#allocation30_spill] sm:$0xff] %v5642_v8  ;;  %v5648_v11 = vld [vmem:[%s6797_s1 + $0x424] ss:$16 sps:$4 sm:$0xff]   ;;  %v5654_v4 = vld [vmem:[%s6797_s1 + $0x42c] ss:$16 sps:$4 sm:$0xff]  }
 0x493   :  { %7344 = vst [vmem:[#allocation31_spill] sm:$0xff] %v5648_v11  ;;  %7345 = vst [vmem:[#allocation32_spill] sm:$0xff] %v5654_v4 }
 0x495   :  { %2191 = vmatpush1.bf16.msra.mxu0 %v5636_v5  ;;  %2232 = vmatpush1.bf16.msra.mxu1 %v5642_v8  ;;  %v5660_v5 = vld [vmem:[%s6797_s1 + $0x420] ss:$16 sps:$4 sm:$0xff]   ;;  %v5666_v8 = vld [vmem:[%s6797_s1 + $0x428] ss:$16 sps:$4 sm:$0xff]  }
 0x496   :  { %2192 = vmatprep.subr.bf16.mxu0 %v5648_v11  ;;  %2233 = vmatprep.subr.bf16.mxu1 %v5654_v4  ;;  %7346 = vst [vmem:[#allocation33_spill] sm:$0xff] %v5660_v5  ;;  %7347 = vst [vmem:[#allocation34_spill] sm:$0xff] %v5666_v8  ;;  %v5672_v11 = vld [vmem:[%s6797_s1 + $0x444] ss:$16 sps:$4 sm:$0xff]   ;;  %v5678_v4 = vld [vmem:[%s6797_s1 + $0x44c] ss:$16 sps:$4 sm:$0xff]  }
 0x497   :  { %7348 = vst [vmem:[#allocation35_spill] sm:$0xff] %v5672_v11  ;;  %7349 = vst [vmem:[#allocation36_spill] sm:$0xff] %v5678_v4 }
 0x499   :  { %2193 = vmatpush1.bf16.msra.mxu0 %v5660_v5  ;;  %2234 = vmatpush1.bf16.msra.mxu1 %v5666_v8  ;;  %v5684_v5 = vld [vmem:[%s6797_s1 + $0x440] ss:$16 sps:$4 sm:$0xff]   ;;  %v5690_v8 = vld [vmem:[%s6797_s1 + $0x448] ss:$16 sps:$4 sm:$0xff]  }
 0x49a   :  { %2194 = vmatprep.subr.bf16.mxu0 %v5672_v11  ;;  %2235 = vmatprep.subr.bf16.mxu1 %v5678_v4  ;;  %7350 = vst [vmem:[#allocation37_spill] sm:$0xff] %v5684_v5  ;;  %7351 = vst [vmem:[#allocation38_spill] sm:$0xff] %v5690_v8  ;;  %v5696_v11 = vld [vmem:[%s6797_s1 + $0x464] ss:$16 sps:$4 sm:$0xff]   ;;  %v5702_v4 = vld [vmem:[%s6797_s1 + $0x46c] ss:$16 sps:$4 sm:$0xff]  }
 0x49b   :  { %7352 = vst [vmem:[#allocation39_spill] sm:$0xff] %v5696_v11  ;;  %7353 = vst [vmem:[#allocation40_spill] sm:$0xff] %v5702_v4 }
 0x49d   :  { %2195 = vmatpush1.bf16.msra.mxu0 %v5684_v5  ;;  %2236 = vmatpush1.bf16.msra.mxu1 %v5690_v8  ;;  %v5708_v5 = vld [vmem:[%s6797_s1 + $0x460] ss:$16 sps:$4 sm:$0xff]   ;;  %v5714_v8 = vld [vmem:[%s6797_s1 + $0x468] ss:$16 sps:$4 sm:$0xff]  }
 0x49e   :  { %2196 = vmatprep.subr.bf16.mxu0 %v5696_v11  ;;  %2237 = vmatprep.subr.bf16.mxu1 %v5702_v4  ;;  %7354 = vst [vmem:[#allocation41_spill] sm:$0xff] %v5708_v5  ;;  %7355 = vst [vmem:[#allocation42_spill] sm:$0xff] %v5714_v8  ;;  %v5720_v11 = vld [vmem:[%s6797_s1 + $0x484] ss:$16 sps:$4 sm:$0xff]   ;;  %v5726_v4 = vld [vmem:[%s6797_s1 + $0x48c] ss:$16 sps:$4 sm:$0xff]  }
 0x49f   :  { %7356 = vst [vmem:[#allocation43_spill] sm:$0xff] %v5720_v11  ;;  %7357 = vst [vmem:[#allocation44_spill] sm:$0xff] %v5726_v4 }
 0x4a1   :  { %2197 = vmatpush1.bf16.msra.mxu0 %v5708_v5  ;;  %2238 = vmatpush1.bf16.msra.mxu1 %v5714_v8  ;;  %v5732_v5 = vld [vmem:[%s6797_s1 + $0x480] ss:$16 sps:$4 sm:$0xff]   ;;  %v5738_v8 = vld [vmem:[%s6797_s1 + $0x488] ss:$16 sps:$4 sm:$0xff]  }
 0x4a2   :  { %2198 = vmatprep.subr.bf16.mxu0 %v5720_v11  ;;  %2239 = vmatprep.subr.bf16.mxu1 %v5726_v4  ;;  %7358 = vst [vmem:[#allocation45_spill] sm:$0xff] %v5732_v5  ;;  %7359 = vst [vmem:[#allocation46_spill] sm:$0xff] %v5738_v8  ;;  %v5744_v11 = vld [vmem:[%s6797_s1 + $0x4a4] ss:$16 sps:$4 sm:$0xff]   ;;  %v5750_v4 = vld [vmem:[%s6797_s1 + $0x4ac] ss:$16 sps:$4 sm:$0xff]  }
 0x4a3   :  { %7360 = vst [vmem:[#allocation47_spill] sm:$0xff] %v5744_v11  ;;  %7361 = vst [vmem:[#allocation48_spill] sm:$0xff] %v5750_v4 }
 0x4a5   :  { %2199 = vmatpush1.bf16.msra.mxu0 %v5732_v5  ;;  %2240 = vmatpush1.bf16.msra.mxu1 %v5738_v8  ;;  %v5756_v5 = vld [vmem:[%s6797_s1 + $0x4a0] ss:$16 sps:$4 sm:$0xff]   ;;  %v5762_v8 = vld [vmem:[%s6797_s1 + $0x4a8] ss:$16 sps:$4 sm:$0xff]  }
 0x4a6   :  { %2200 = vmatprep.subr.bf16.mxu0 %v5744_v11  ;;  %2241 = vmatprep.subr.bf16.mxu1 %v5750_v4  ;;  %7362 = vst [vmem:[#allocation49_spill] sm:$0xff] %v5756_v5  ;;  %7363 = vst [vmem:[#allocation50_spill] sm:$0xff] %v5762_v8  ;;  %v5768_v11 = vld [vmem:[%s6797_s1 + $0x4c4] ss:$16 sps:$4 sm:$0xff]   ;;  %v5774_v4 = vld [vmem:[%s6797_s1 + $0x4cc] ss:$16 sps:$4 sm:$0xff]  }
 0x4a7   :  { %7364 = vst [vmem:[#allocation51_spill] sm:$0xff] %v5768_v11  ;;  %7365 = vst [vmem:[#allocation52_spill] sm:$0xff] %v5774_v4 }
 0x4a9   :  { %2201 = vmatpush1.bf16.msra.mxu0 %v5756_v5  ;;  %2242 = vmatpush1.bf16.msra.mxu1 %v5762_v8  ;;  %v5780_v5 = vld [vmem:[%s6797_s1 + $0x4c0] ss:$16 sps:$4 sm:$0xff]   ;;  %v5786_v8 = vld [vmem:[%s6797_s1 + $0x4c8] ss:$16 sps:$4 sm:$0xff]  }
 0x4aa   :  { %2202 = vmatprep.subr.bf16.mxu0 %v5768_v11  ;;  %2243 = vmatprep.subr.bf16.mxu1 %v5774_v4  ;;  %7366 = vst [vmem:[#allocation53_spill] sm:$0xff] %v5780_v5  ;;  %7367 = vst [vmem:[#allocation54_spill] sm:$0xff] %v5786_v8  ;;  %v5792_v11 = vld [vmem:[%s6797_s1 + $0x4e4] ss:$16 sps:$4 sm:$0xff]   ;;  %v5798_v4 = vld [vmem:[%s6797_s1 + $0x4ec] ss:$16 sps:$4 sm:$0xff]  }
 0x4ab   :  { %7368 = vst [vmem:[#allocation55_spill] sm:$0xff] %v5792_v11  ;;  %7369 = vst [vmem:[#allocation56_spill] sm:$0xff] %v5798_v4 }
 0x4ad   :  { %2203 = vmatpush1.bf16.msra.mxu0 %v5780_v5  ;;  %2244 = vmatpush1.bf16.msra.mxu1 %v5786_v8  ;;  %v5804_v5 = vld [vmem:[%s6797_s1 + $0x4e0] ss:$16 sps:$4 sm:$0xff]   ;;  %v5810_v8 = vld [vmem:[%s6797_s1 + $0x4e8] ss:$16 sps:$4 sm:$0xff]  }
 0x4ae   :  { %2204 = vmatprep.subr.bf16.mxu0 %v5792_v11  ;;  %2245 = vmatprep.subr.bf16.mxu1 %v5798_v4  ;;  %7370 = vst [vmem:[#allocation57_spill] sm:$0xff] %v5804_v5  ;;  %7371 = vst [vmem:[#allocation58_spill] sm:$0xff] %v5810_v8 }
 0x4b1   :  { %2205 = vmatpush1.bf16.msra.mxu0 %v5804_v5  ;;  %2246 = vmatpush1.bf16.msra.mxu1 %v5810_v8 }
 0x4b2   :  { %2282 = vmatprep.subr.bf16.mxu0 %v5292_v57  ;;  %2323 = vmatprep.subr.bf16.mxu1 %v5298_v49 }
 0x527   :  { %v1994_v11 = vpop.f32.mrb[52].mxu0  ;;  %v2035_v4 = vpop.f32.mrb[52].mxu1 }
 0x528   :  { %v2042_v3 = vadd.f32 %v1994_v11, %v7309_v18  ;;  %v1996_v63 = vpop.f32.mrb[53].mxu0  ;;  %v2037_v61 = vpop.f32.mrb[53].mxu1  ;;  %v2044_v8 = vadd.f32 %v2035_v4, %v7311_v50 }
 0x529   :  { %v2043_v60 = vadd.f32 %v1996_v63, %v7310_v19  ;;  %v1998_v5 = vpop.f32.mrb[54].mxu0  ;;  %v2039_v59 = vpop.f32.mrb[54].mxu1  ;;  %v2045_v49 = vadd.f32 %v2037_v61, %v7312_v54  ;;  %v7375_v54 = vld [vmem:[#allocation72_spill] sm:$0xff] }
 0x52a   :  { %v2046_v58 = vmul.f32 0.5, %v2042_v3  ;;  %v1999_v56 = vpop.f32.mrb[55].mxu0  ;;  %v2040_v51 = vpop.f32.mrb[55].mxu1 }
 0x52b   :  { %v2050_v46 = vmul.f32 0.5, %v2043_v60  ;;  %v2055_v57 = vmul.f32 0.5, %v2045_v49  ;;  %v7373_v49 = vld [vmem:[#allocation70_spill] sm:$0xff] }
 0x52c   :  { %3764 = vtanh.f32 %v2046_v58 }
 0x52d   :  { %3766 = vtanh.f32 %v2050_v46 }
 0x52e   :  { %3768 = vtanh.f32 %v2044_v8  ;;  %v7374_v8 = vld [vmem:[#allocation71_spill] sm:$0xff] }
 0x52f   :  { %3770 = vtanh.f32 %v2055_v57 }
 0x536   :  { %v3765_v45 = vpop.eup %3764 }
 0x537   :  { %v3767_v11 = vpop.eup %3766  ;;  %v2048_v18 = vmul.f32 0.5, %v3765_v45 }
 0x538   :  { %v2052_v40 = vmul.f32 0.5, %v3767_v11  ;;  %v3769_v5 = vpop.eup %3768 }
 0x539   :  { %v2049_v63 = vadd.f32 0.5, %v2048_v18  ;;  %v3771_v46 = vpop.eup %3770 }
 0x53a   :  { %v2053_v59 = vadd.f32 0.5, %v2052_v40  ;;  %v2057_v58 = vmul.f32 0.5, %v3771_v46 }
 0x53b   :  { %v2060_v3 = vmul.f32 %v3769_v5, %v2049_v63  ;;  %v7376_v63 = vld [vmem:[#allocation73_spill] sm:$0xff] }
 0x53c   :  { %v2059_v51 = vmul.f32 %v2053_v59, %v5306_v12  ;;  %v2058_v18 = vadd.f32 0.5, %v2057_v58 }
 0x53e   :  { %v5820_v56 = vadd.f32 %v2060_v3, %v2059_v51 }
 0x540   :  { %7372 = vst [vmem:[#allocation59_spill] sm:$0xff] %v5820_v56  ;;  %3772 = vtanh.f32 %v5820_v56 }
 0x547   :  { %v2102_v60 = vpop.f32.mrb[56].mxu0  ;;  %v2143_v61 = vpop.f32.mrb[56].mxu1 }
 0x548   :  { %v2150_v4 = vadd.f32 %v2102_v60, %v7373_v49  ;;  %v2152_v45 = vadd.f32 %v2143_v61, %v7374_v8  ;;  %v2104_v11 = vpop.f32.mrb[57].mxu0  ;;  %v2145_v57 = vpop.f32.mrb[57].mxu1 }
 0x549   :  { %v2151_v40 = vadd.f32 %v2104_v11, %v7375_v54  ;;  %v2153_v5 = vadd.f32 %v2145_v57, %v7376_v63  ;;  %v2106_v12 = vpop.f32.mrb[58].mxu0  ;;  %v2147_v59 = vpop.f32.mrb[58].mxu1 }
 0x54a   :  { %v3773_v3 = vpop.eup %3772  ;;  %v2154_v51 = vmul.f32 0.5, %v2150_v4  ;;  %v2107_v56 = vpop.f32.mrb[59].mxu0  ;;  %v7392_v59 = vld [vmem:[#allocation65_spill] sm:$0xff] }
 0x54b   :  { %v2148_v50 = vpop.f32.mrb[59].mxu1  ;;  %v2158_v46 = vmul.f32 0.5, %v2151_v40  ;;  %v2063_v19 = vmul.f32 %v3773_v3, %v2058_v18  ;;  %v2163_v61 = vmul.f32 0.5, %v2153_v5  ;;  %v7393_v3 = vld [vmem:[#allocation21_spill] sm:$0xff] }
 0x54c   :  { %3774 = vtanh.f32 %v2154_v51  ;;  %v7394_v51 = vld [vmem:[#allocation22_spill] sm:$0xff] }
 0x54d   :  { %3776 = vtanh.f32 %v2158_v46  ;;  %v2173_v60 = vpack.c.bf16 %v2063_v19, %v2063_v19  ;;  %v7395_v46 = vld [vmem:[#allocation23_spill] sm:$0xff] }
 0x54e   :  { %3778 = vtanh.f32 %v2152_v45 }
 0x54f   :  { %2206 = vmatprep.mubr.bf16.mxu0 %v2173_v60  ;;  %2247 = vmatprep.mubr.bf16.mxu1 %v2173_v60  ;;  %3780 = vtanh.f32 %v2163_v61  ;;  %v7396_v60 = vld [vmem:[#allocation24_spill] sm:$0xff]  ;;  %v7397_v61 = vld [vmem:[#allocation25_spill] sm:$0xff] }
 0x556   :  { %v3775_v58 = vpop.eup %3774 }
 0x557   :  { %v3777_v49 = vpop.eup %3776  ;;  %v2156_v54 = vmul.f32 0.5, %v3775_v58  ;;  %v7398_v58 = vld [vmem:[#allocation26_spill] sm:$0xff] }
 0x558   :  { %v2160_v8 = vmul.f32 0.5, %v3777_v49  ;;  %v3779_v57 = vpop.eup %3778  ;;  %v7399_v49 = vld [vmem:[#allocation27_spill] sm:$0xff] }
 0x559   :  { %v2157_v11 = vadd.f32 0.5, %v2156_v54  ;;  %v3781_v19 = vpop.eup %3780  ;;  %v7400_v54 = vld [vmem:[#allocation28_spill] sm:$0xff] }
 0x55a   :  { %v2161_v63 = vadd.f32 0.5, %v2160_v8  ;;  %v2165_v18 = vmul.f32 0.5, %v3781_v19  ;;  %v7401_v8 = vld [vmem:[#allocation29_spill] sm:$0xff]  ;;  %v7407_v19 = vld [vmem:[#allocation35_spill] sm:$0xff] }
 0x55b   :  { %v2168_v4 = vmul.f32 %v3779_v57, %v2157_v11  ;;  %v7402_v11 = vld [vmem:[#allocation30_spill] sm:$0xff]  ;;  %v7403_v57 = vld [vmem:[#allocation31_spill] sm:$0xff] }
 0x55c   :  { %v2167_v50 = vmul.f32 %v2161_v63, %v5314_v62  ;;  %v2166_v40 = vadd.f32 0.5, %v2165_v18  ;;  %v7391_v62 = vld [vmem:[#allocation64_spill] sm:$0xff] }
 0x55d   :  { %v7404_v63 = vld [vmem:[#allocation32_spill] sm:$0xff] }
 0x55e   :  { %v5828_v56 = vadd.f32 %v2168_v4, %v2167_v50  ;;  %v7405_v4 = vld [vmem:[#allocation33_spill] sm:$0xff]  ;;  %v7406_v50 = vld [vmem:[#allocation34_spill] sm:$0xff]  ;;  %v7408_v18 = vld [vmem:[#allocation36_spill] sm:$0xff] }
 0x560   :  { %3782 = vtanh.f32 %v5828_v56 }
 0x56a   :  { %v3783_v45 = vpop.eup %3782 }
 0x56b   :  { %v2171_v5 = vmul.f32 %v3783_v45, %v2166_v40  ;;  %v7409_v40 = vld [vmem:[#allocation37_spill] sm:$0xff]  ;;  %v7410_v45 = vld [vmem:[#allocation38_spill] sm:$0xff] }
 0x56d   :  { %v2172_v12 = vpack.c.bf16 %v2171_v5, %v2171_v5  ;;  %v7411_v5 = vld [vmem:[#allocation39_spill] sm:$0xff] }
 0x56f   :  { %2207 = vmatmul.mubr.bf16.vlgmr.msra.gmra.mrb[60].mxu0 %v2172_v12  ;;  %2248 = vmatmul.mubr.bf16.vlgmr.msra.gmra.mrb[60].mxu1 %v2172_v12 }
 0x570   :  { %2283 = vmatpush1.bf16.msra.mxu0 %v5126_v30  ;;  %2324 = vmatpush1.bf16.msra.mxu1 %v5132_v17  ;;  %v7377_v30 = vld [vmem:[#allocation12_spill] sm:$0xff]  ;;  %v7378_v17 = vld [vmem:[#allocation13_spill] sm:$0xff] }
 0x571   :  { %2284 = vmatprep.subr.bf16.mxu0 %v5138_v20  ;;  %2325 = vmatprep.subr.bf16.mxu1 %v5144_v42  ;;  %v7379_v20 = vld [vmem:[#allocation14_spill] sm:$0xff]  ;;  %v7380_v42 = vld [vmem:[#allocation15_spill] sm:$0xff] }
 0x572   :  { %2314 = vmatprep.mubr.bf16.mxu0 %v7194_v23  ;;  %2355 = vmatprep.mubr.bf16.mxu1 %v7194_v23 }
 0x574   :  { %2285 = vmatpush1.bf16.msra.mxu0 %v5152_v25  ;;  %2326 = vmatpush1.bf16.msra.mxu1 %v5158_v16  ;;  %v7381_v25 = vld [vmem:[#allocation16_spill] sm:$0xff]  ;;  %v7382_v16 = vld [vmem:[#allocation17_spill] sm:$0xff] }
 0x575   :  { %2286 = vmatprep.subr.bf16.mxu0 %v5164_v26  ;;  %2327 = vmatprep.subr.bf16.mxu1 %v5170_v24  ;;  %v7383_v26 = vld [vmem:[#allocation18_spill] sm:$0xff]  ;;  %v7384_v24 = vld [vmem:[#allocation19_spill] sm:$0xff] }
 0x578   :  { %2287 = vmatpush1.bf16.msra.mxu0 %v5176_v34  ;;  %2328 = vmatpush1.bf16.msra.mxu1 %v5182_v27  ;;  %v7385_v34 = vld [vmem:[#allocation20_spill] sm:$0xff]  ;;  %v7386_v27 = vld [vmem:[#allocation3_spill] sm:$0xff] }
 0x579   :  { %2288 = vmatprep.subr.bf16.mxu0 %v5188_v28  ;;  %2329 = vmatprep.subr.bf16.mxu1 %v5194_v36  ;;  %v7387_v28 = vld [vmem:[#allocation4_spill] sm:$0xff]  ;;  %v7388_v36 = vld [vmem:[#allocation61_spill] sm:$0xff] }
 0x57c   :  { %2289 = vmatpush1.bf16.msra.mxu0 %v5200_v33  ;;  %2330 = vmatpush1.bf16.msra.mxu1 %v5206_v7  ;;  %v7389_v33 = vld [vmem:[#allocation62_spill] sm:$0xff]  ;;  %v7390_v7 = vld [vmem:[#allocation63_spill] sm:$0xff] }
 0x57d   :  { %2290 = vmatprep.subr.bf16.mxu0 %v5336_v35  ;;  %2331 = vmatprep.subr.bf16.mxu1 %v5342_v37 }
 0x580   :  { %2291 = vmatpush1.bf16.msra.mxu0 %v5348_v38  ;;  %2332 = vmatpush1.bf16.msra.mxu1 %v5354_v43 }
 0x581   :  { %2292 = vmatprep.subr.bf16.mxu0 %v5360_v44  ;;  %2333 = vmatprep.subr.bf16.mxu1 %v5366_v47 }
 0x584   :  { %2293 = vmatpush1.bf16.msra.mxu0 %v5372_v48  ;;  %2334 = vmatpush1.bf16.msra.mxu1 %v5378_v52 }
 0x585   :  { %2294 = vmatprep.subr.bf16.mxu0 %v5384_v55  ;;  %2335 = vmatprep.subr.bf16.mxu1 %v5390_v0 }
 0x588   :  { %2295 = vmatpush1.bf16.msra.mxu0 %v5396_v2  ;;  %2336 = vmatpush1.bf16.msra.mxu1 %v5402_v9 }
 0x589   :  { %2296 = vmatprep.subr.bf16.mxu0 %v5408_v10  ;;  %2337 = vmatprep.subr.bf16.mxu1 %v5414_v13 }
 0x58c   :  { %2297 = vmatpush1.bf16.msra.mxu0 %v5420_v14  ;;  %2338 = vmatpush1.bf16.msra.mxu1 %v5426_v1 }
 0x58d   :  { %2388 = vmatprep.subr.bf16.mxu0 %v5432_v41  ;;  %2429 = vmatprep.subr.bf16.mxu1 %v5438_v29 }
 0x58f   :  { %2315 = vmatmul.mubr.bf16.vlgmr.msra.gmra.mrb[64].mxu0 %v2172_v12  ;;  %2356 = vmatmul.mubr.bf16.vlgmr.msra.gmra.mrb[64].mxu1 %v2172_v12  ;;  %v7412_v12 = vld [vmem:[#allocation40_spill] sm:$0xff] }
 0x590   :  { %2389 = vmatpush1.bf16.msra.mxu0 %v5444_v15  ;;  %2430 = vmatpush1.bf16.msra.mxu1 %v5450_v6 }
 0x591   :  { %2390 = vmatprep.subr.bf16.mxu0 %v5456_v21  ;;  %2431 = vmatprep.subr.bf16.mxu1 %v5462_v53 }
 0x594   :  { %2391 = vmatpush1.bf16.msra.mxu0 %v5468_v22  ;;  %2432 = vmatpush1.bf16.msra.mxu1 %v5474_v31 }
 0x595   :  { %2392 = vmatprep.subr.bf16.mxu0 %v5480_v32  ;;  %2433 = vmatprep.subr.bf16.mxu1 %v5486_v39 }
 0x598   :  { %2393 = vmatpush1.bf16.msra.mxu0 %v7377_v30  ;;  %2434 = vmatpush1.bf16.msra.mxu1 %v7378_v17 }
 0x599   :  { %2394 = vmatprep.subr.bf16.mxu0 %v7379_v20  ;;  %2435 = vmatprep.subr.bf16.mxu1 %v7380_v42 }
 0x59c   :  { %2395 = vmatpush1.bf16.msra.mxu0 %v7381_v25  ;;  %2436 = vmatpush1.bf16.msra.mxu1 %v7382_v16 }
 0x59d   :  { %2396 = vmatprep.subr.bf16.mxu0 %v7383_v26  ;;  %2437 = vmatprep.subr.bf16.mxu1 %v7384_v24 }
 0x5a0   :  { %2397 = vmatpush1.bf16.msra.mxu0 %v7385_v34  ;;  %2438 = vmatpush1.bf16.msra.mxu1 %v7386_v27 }
 0x5a1   :  { %2398 = vmatprep.subr.bf16.mxu0 %v7387_v28  ;;  %2439 = vmatprep.subr.bf16.mxu1 %v7388_v36 }
 0x5a4   :  { %2399 = vmatpush1.bf16.msra.mxu0 %v7389_v33  ;;  %2440 = vmatpush1.bf16.msra.mxu1 %v7390_v7 }
 0x5a5   :  { %2400 = vmatprep.subr.bf16.mxu0 %v7391_v62  ;;  %2441 = vmatprep.subr.bf16.mxu1 %v7392_v59 }
 0x5a8   :  { %2401 = vmatpush1.bf16.msra.mxu0 %v7393_v3  ;;  %2442 = vmatpush1.bf16.msra.mxu1 %v7394_v51 }
 0x5a9   :  { %2402 = vmatprep.subr.bf16.mxu0 %v7395_v46  ;;  %2443 = vmatprep.subr.bf16.mxu1 %v7396_v60 }
 0x5ac   :  { %2403 = vmatpush1.bf16.msra.mxu0 %v7397_v61  ;;  %2444 = vmatpush1.bf16.msra.mxu1 %v7398_v58 }
 0x5ad   :  { %2404 = vmatprep.subr.bf16.mxu0 %v7399_v49  ;;  %2445 = vmatprep.subr.bf16.mxu1 %v7400_v54  ;;  %v7434_v49 = vld [vmem:[#allocation6_spill] sm:$0xff] }
 0x5b0   :  { %2405 = vmatpush1.bf16.msra.mxu0 %v7401_v8  ;;  %2446 = vmatpush1.bf16.msra.mxu1 %v7402_v11  ;;  %v7413_v11 = vld [vmem:[#allocation41_spill] sm:$0xff] }
 0x5b1   :  { %2406 = vmatprep.subr.bf16.mxu0 %v7403_v57  ;;  %2447 = vmatprep.subr.bf16.mxu1 %v7404_v63  ;;  %v7414_v57 = vld [vmem:[#allocation42_spill] sm:$0xff]  ;;  %v7415_v63 = vld [vmem:[#allocation43_spill] sm:$0xff]  ;;  %v7433_v8 = vld [vmem:[#allocation5_spill] sm:$0xff] }
 0x5b4   :  { %2407 = vmatpush1.bf16.msra.mxu0 %v7405_v4  ;;  %2448 = vmatpush1.bf16.msra.mxu1 %v7406_v50  ;;  %v7416_v4 = vld [vmem:[#allocation44_spill] sm:$0xff]  ;;  %v7417_v50 = vld [vmem:[#allocation45_spill] sm:$0xff] }
 0x5b5   :  { %2408 = vmatprep.subr.bf16.mxu0 %v7407_v19  ;;  %2449 = vmatprep.subr.bf16.mxu1 %v7408_v18  ;;  %v7418_v19 = vld [vmem:[#allocation46_spill] sm:$0xff]  ;;  %v7419_v18 = vld [vmem:[#allocation47_spill] sm:$0xff] }
 0x5b8   :  { %2409 = vmatpush1.bf16.msra.mxu0 %v7409_v40  ;;  %2450 = vmatpush1.bf16.msra.mxu1 %v7410_v45  ;;  %v7420_v40 = vld [vmem:[#allocation48_spill] sm:$0xff]  ;;  %v7421_v45 = vld [vmem:[#allocation49_spill] sm:$0xff] }
 0x5b9   :  { %2410 = vmatprep.subr.bf16.mxu0 %v7411_v5  ;;  %2451 = vmatprep.subr.bf16.mxu1 %v7412_v12  ;;  %v7422_v5 = vld [vmem:[#allocation50_spill] sm:$0xff]  ;;  %v7423_v12 = vld [vmem:[#allocation51_spill] sm:$0xff] }
 0x5bc   :  { %2411 = vmatpush1.bf16.msra.mxu0 %v7413_v11  ;;  %2452 = vmatpush1.bf16.msra.mxu1 %v7414_v57  ;;  %v7424_v11 = vld [vmem:[#allocation52_spill] sm:$0xff]  ;;  %v7425_v57 = vld [vmem:[#allocation53_spill] sm:$0xff] }
 0x5bd   :  { %2412 = vmatprep.subr.bf16.mxu0 %v7415_v63  ;;  %2453 = vmatprep.subr.bf16.mxu1 %v7416_v4  ;;  %v7426_v63 = vld [vmem:[#allocation54_spill] sm:$0xff]  ;;  %v7427_v4 = vld [vmem:[#allocation55_spill] sm:$0xff] }
 0x5c0   :  { %2413 = vmatpush1.bf16.msra.mxu0 %v7417_v50  ;;  %2454 = vmatpush1.bf16.msra.mxu1 %v7418_v19  ;;  %v7428_v50 = vld [vmem:[#allocation56_spill] sm:$0xff]  ;;  %v7429_v19 = vld [vmem:[#allocation57_spill] sm:$0xff] }
 0x5c1   :  { %2414 = vmatprep.subr.bf16.mxu0 %v7419_v18  ;;  %2455 = vmatprep.subr.bf16.mxu1 %v7420_v40  ;;  %v7430_v18 = vld [vmem:[#allocation58_spill] sm:$0xff] }
 0x5c2   :  { %v7431_v40 = vld [vmem:[#allocation10_spill] sm:$0xff] }
 0x5c4   :  { %2415 = vmatpush1.bf16.msra.mxu0 %v7421_v45  ;;  %2456 = vmatpush1.bf16.msra.mxu1 %v7422_v5  ;;  %v7432_v45 = vld [vmem:[#allocation11_spill] sm:$0xff] }
 0x5c5   :  { %2416 = vmatprep.subr.bf16.mxu0 %v7423_v12  ;;  %2457 = vmatprep.subr.bf16.mxu1 %v7424_v11 }
 0x5c8   :  { %2417 = vmatpush1.bf16.msra.mxu0 %v7425_v57  ;;  %2458 = vmatpush1.bf16.msra.mxu1 %v7426_v63 }
 0x5c9   :  { %2418 = vmatprep.subr.bf16.mxu0 %v7427_v4  ;;  %2459 = vmatprep.subr.bf16.mxu1 %v7428_v50 }
 0x5cc   :  { %2419 = vmatpush1.bf16.msra.mxu0 %v7429_v19  ;;  %2460 = vmatpush1.bf16.msra.mxu1 %v7430_v18  ;;  %v7435_v18 = vld [vmem:[#allocation7_spill] sm:$0xff] }
 0x5cd   :  { %2496 = vmatprep.subr.bf16.mxu0 %v7431_v40  ;;  %2537 = vmatprep.subr.bf16.mxu1 %v7432_v45  ;;  %v7436_v40 = vld [vmem:[#allocation8_spill] sm:$0xff] }
 0x642   :  { %v2208_v5 = vpop.f32.mrb[60].mxu0  ;;  %v2249_v12 = vpop.f32.mrb[60].mxu1 }
 0x643   :  { %v2256_v11 = vadd.f32 %v2208_v5, %v7433_v8  ;;  %v2210_v54 = vpop.f32.mrb[61].mxu0  ;;  %v2251_v57 = vpop.f32.mrb[61].mxu1  ;;  %v2258_v46 = vadd.f32 %v2249_v12, %v7435_v18  ;;  %v7439_v12 = vld [vmem:[#allocation74_spill] sm:$0xff]  ;;  %v7441_v18 = vld [vmem:[#allocation76_spill] sm:$0xff] }
 0x644   :  { %v2257_v63 = vadd.f32 %v2210_v54, %v7434_v49  ;;  %v2212_v58 = vpop.f32.mrb[62].mxu0  ;;  %v2253_v4 = vpop.f32.mrb[62].mxu1  ;;  %v2259_v45 = vadd.f32 %v2251_v57, %v7436_v40  ;;  %v7440_v40 = vld [vmem:[#allocation75_spill] sm:$0xff] }
 0x645   :  { %v2260_v61 = vmul.f32 0.5, %v2256_v11  ;;  %v2213_v50 = vpop.f32.mrb[63].mxu0  ;;  %v2254_v60 = vpop.f32.mrb[63].mxu1 }
 0x646   :  { %v2264_v19 = vmul.f32 0.5, %v2257_v63  ;;  %v2269_v51 = vmul.f32 0.5, %v2259_v45  ;;  %v7437_v50 = vld [vmem:[#allocation59_spill] sm:$0xff] }
 0x647   :  { %3784 = vtanh.f32 %v2260_v61 }
 0x648   :  { %3786 = vtanh.f32 %v2264_v19 }
 0x649   :  { %3788 = vtanh.f32 %v2258_v46 }
 0x64a   :  { %3790 = vtanh.f32 %v2269_v51 }
 0x651   :  { %v3785_v3 = vpop.eup %3784 }
 0x652   :  { %v3787_v5 = vpop.eup %3786  ;;  %v2262_v8 = vmul.f32 0.5, %v3785_v3 }
 0x653   :  { %v2266_v59 = vmul.f32 0.5, %v3787_v5  ;;  %v3789_v58 = vpop.eup %3788 }
 0x654   :  { %v2263_v54 = vadd.f32 0.5, %v2262_v8  ;;  %v3791_v61 = vpop.eup %3790 }
 0x655   :  { %v2267_v4 = vadd.f32 0.5, %v2266_v59  ;;  %v2271_v46 = vmul.f32 0.5, %v3791_v61 }
 0x656   :  { %v2274_v11 = vmul.f32 %v3789_v58, %v2263_v54  ;;  %v7442_v54 = vld [vmem:[#allocation77_spill] sm:$0xff] }
 0x657   :  { %v2273_v60 = vmul.f32 %v2267_v4, %v7437_v50  ;;  %v2272_v8 = vadd.f32 0.5, %v2271_v46 }
 0x659   :  { %v5934_v63 = vadd.f32 %v2274_v11, %v2273_v60 }
 0x65b   :  { %7438 = vst [vmem:[#allocation60_spill] sm:$0xff] %v5934_v63  ;;  %3792 = vtanh.f32 %v5934_v63 }
 0x662   :  { %v2316_v19 = vpop.f32.mrb[64].mxu0  ;;  %v2357_v57 = vpop.f32.mrb[64].mxu1 }
 0x663   :  { %v2364_v45 = vadd.f32 %v2316_v19, %v7439_v12  ;;  %v2366_v3 = vadd.f32 %v2357_v57, %v7440_v40  ;;  %v2318_v5 = vpop.f32.mrb[65].mxu0  ;;  %v2359_v51 = vpop.f32.mrb[65].mxu1 }
 0x664   :  { %v2365_v59 = vadd.f32 %v2318_v5, %v7441_v18  ;;  %v2367_v58 = vadd.f32 %v2359_v51, %v7442_v54  ;;  %v2320_v4 = vpop.f32.mrb[66].mxu0  ;;  %v2361_v11 = vpop.f32.mrb[66].mxu1 }
 0x665   :  { %v3793_v50 = vpop.eup %3792  ;;  %v2368_v60 = vmul.f32 0.5, %v2364_v45  ;;  %v2321_v63 = vpop.f32.mrb[67].mxu0  ;;  %v5948_v11 = vld [vmem:[%s6797_s1 + $0x200] ss:$16 sps:$4 sm:$0xff]  }
 0x666   :  { %v2362_v49 = vpop.f32.mrb[67].mxu1  ;;  %v2372_v61 = vmul.f32 0.5, %v2365_v59  ;;  %v2277_v62 = vmul.f32 %v3793_v50, %v2272_v8  ;;  %v2377_v40 = vmul.f32 0.5, %v2367_v58  ;;  %v5960_v50 = vld [vmem:[%s6797_s1 + $0x224] ss:$16 sps:$4 sm:$0xff]  }
 0x667   :  { %3794 = vtanh.f32 %v2368_v60  ;;  %v5966_v60 = vld [vmem:[%s6797_s1 + $0x22c] ss:$16 sps:$4 sm:$0xff]  }
 0x668   :  { %3796 = vtanh.f32 %v2372_v61  ;;  %v2387_v19 = vpack.c.bf16 %v2277_v62, %v2277_v62  ;;  %v5974_v61 = vld [vmem:[%s6797_s1 + $0x220] ss:$16 sps:$4 sm:$0xff]  }
 0x669   :  { %3798 = vtanh.f32 %v2366_v3 }
 0x66a   :  { %2420 = vmatprep.mubr.bf16.mxu0 %v2387_v19  ;;  %2461 = vmatprep.mubr.bf16.mxu1 %v2387_v19  ;;  %3800 = vtanh.f32 %v2377_v40  ;;  %v5980_v19 = vld [vmem:[%s6797_s1 + $0x228] ss:$16 sps:$4 sm:$0xff]   ;;  %v5986_v40 = vld [vmem:[%s6797_s1 + $0x244] ss:$16 sps:$4 sm:$0xff]  }
 0x671   :  { %v3795_v46 = vpop.eup %3794 }
 0x672   :  { %v3797_v57 = vpop.eup %3796  ;;  %v2370_v18 = vmul.f32 0.5, %v3795_v46  ;;  %v5992_v46 = vld [vmem:[%s6797_s1 + $0x24c] ss:$16 sps:$4 sm:$0xff]  }
 0x673   :  { %v2374_v12 = vmul.f32 0.5, %v3797_v57  ;;  %v3799_v51 = vpop.eup %3798  ;;  %v5998_v57 = vld [vmem:[%s6797_s1 + $0x240] ss:$16 sps:$4 sm:$0xff]  }
 0x674   :  { %v2371_v5 = vadd.f32 0.5, %v2370_v18  ;;  %v3801_v62 = vpop.eup %3800  ;;  %v6004_v18 = vld [vmem:[%s6797_s1 + $0x248] ss:$16 sps:$4 sm:$0xff]  }
 0x675   :  { %v2375_v54 = vadd.f32 0.5, %v2374_v12  ;;  %v2379_v8 = vmul.f32 0.5, %v3801_v62  ;;  %v6010_v12 = vld [vmem:[%s6797_s1 + $0x264] ss:$16 sps:$4 sm:$0xff]  }
 0x676   :  { %v2382_v45 = vmul.f32 %v3799_v51, %v2371_v5  ;;  %v6016_v5 = vld [vmem:[%s6797_s1 + $0x26c] ss:$16 sps:$4 sm:$0xff]   ;;  %v6022_v51 = vld [vmem:[%s6797_s1 + $0x260] ss:$16 sps:$4 sm:$0xff]  }
 0x677   :  { %v2381_v49 = vmul.f32 %v2375_v54, %v5828_v56  ;;  %v2380_v59 = vadd.f32 0.5, %v2379_v8  ;;  %v5954_v56 = vld [vmem:[%s6797_s1 + $0x208] ss:$16 sps:$4 sm:$0xff]  }
 0x678   :  { %v6028_v54 = vld [vmem:[%s6797_s1 + $0x268] ss:$16 sps:$4 sm:$0xff]  }
 0x679   :  { %v5942_v63 = vadd.f32 %v2382_v45, %v2381_v49  ;;  %v6114_v45 = vld [vmem:[%s6797_s1 + $0x204] ss:$16 sps:$4 sm:$0xff]   ;;  %v6120_v49 = vld [vmem:[%s6797_s1 + $0x20c] ss:$16 sps:$4 sm:$0xff]  }
 0x67b   :  { %3802 = vtanh.f32 %v5942_v63 }
 0x685   :  { %v3803_v3 = vpop.eup %3802 }
 0x686   :  { %v2385_v58 = vmul.f32 %v3803_v3, %v2380_v59  ;;  %v7483_v59 = vld [vmem:[#allocation5_spill] sm:$0xff] }
 0x688   :  { %v2386_v4 = vpack.c.bf16 %v2385_v58, %v2385_v58 }
 0x68a   :  { %2421 = vmatmul.mubr.bf16.vlgmr.msra.gmra.mrb[68].mxu0 %v2386_v4  ;;  %2462 = vmatmul.mubr.bf16.vlgmr.msra.gmra.mrb[68].mxu1 %v2386_v4 }
 0x68b   :  { %2497 = vmatpush1.bf16.msra.mxu0 %v5948_v11  ;;  %2538 = vmatpush1.bf16.msra.mxu1 %v5954_v56 }
 0x68c   :  { %2498 = vmatprep.subr.bf16.mxu0 %v5960_v50  ;;  %2539 = vmatprep.subr.bf16.mxu1 %v5966_v60 }
 0x68d   :  { %2528 = vmatprep.mubr.bf16.mxu0 %v7194_v23  ;;  %2569 = vmatprep.mubr.bf16.mxu1 %v7194_v23 }
 0x68f   :  { %2499 = vmatpush1.bf16.msra.mxu0 %v5974_v61  ;;  %2540 = vmatpush1.bf16.msra.mxu1 %v5980_v19 }
 0x690   :  { %2500 = vmatprep.subr.bf16.mxu0 %v5986_v40  ;;  %2541 = vmatprep.subr.bf16.mxu1 %v5992_v46 }
 0x693   :  { %2501 = vmatpush1.bf16.msra.mxu0 %v5998_v57  ;;  %2542 = vmatpush1.bf16.msra.mxu1 %v6004_v18 }
 0x694   :  { %2502 = vmatprep.subr.bf16.mxu0 %v6010_v12  ;;  %2543 = vmatprep.subr.bf16.mxu1 %v6016_v5 }
 0x697   :  { %2503 = vmatpush1.bf16.msra.mxu0 %v6022_v51  ;;  %2544 = vmatpush1.bf16.msra.mxu1 %v6028_v54 }
 0x698   :  { %2504 = vmatprep.subr.bf16.mxu0 %v5336_v35  ;;  %2545 = vmatprep.subr.bf16.mxu1 %v5342_v37  ;;  %v7443_v35 = vld [vmem:[#allocation64_spill] sm:$0xff]  ;;  %v7444_v37 = vld [vmem:[#allocation65_spill] sm:$0xff] }
 0x69b   :  { %2505 = vmatpush1.bf16.msra.mxu0 %v5348_v38  ;;  %2546 = vmatpush1.bf16.msra.mxu1 %v5354_v43  ;;  %v7445_v38 = vld [vmem:[#allocation21_spill] sm:$0xff]  ;;  %v7446_v43 = vld [vmem:[#allocation22_spill] sm:$0xff] }
 0x69c   :  { %2506 = vmatprep.subr.bf16.mxu0 %v5360_v44  ;;  %2547 = vmatprep.subr.bf16.mxu1 %v5366_v47  ;;  %v7447_v44 = vld [vmem:[#allocation23_spill] sm:$0xff]  ;;  %v7448_v47 = vld [vmem:[#allocation24_spill] sm:$0xff] }
 0x69f   :  { %2507 = vmatpush1.bf16.msra.mxu0 %v5372_v48  ;;  %2548 = vmatpush1.bf16.msra.mxu1 %v5378_v52  ;;  %v7449_v48 = vld [vmem:[#allocation25_spill] sm:$0xff]  ;;  %v7450_v52 = vld [vmem:[#allocation26_spill] sm:$0xff] }
 0x6a0   :  { %2508 = vmatprep.subr.bf16.mxu0 %v5384_v55  ;;  %2549 = vmatprep.subr.bf16.mxu1 %v5390_v0  ;;  %v7451_v55 = vld [vmem:[#allocation27_spill] sm:$0xff]  ;;  %v7452_v0 = vld [vmem:[#allocation28_spill] sm:$0xff] }
 0x6a3   :  { %2509 = vmatpush1.bf16.msra.mxu0 %v5396_v2  ;;  %2550 = vmatpush1.bf16.msra.mxu1 %v5402_v9  ;;  %v7453_v2 = vld [vmem:[#allocation29_spill] sm:$0xff]  ;;  %v7454_v9 = vld [vmem:[#allocation30_spill] sm:$0xff] }
 0x6a4   :  { %2510 = vmatprep.subr.bf16.mxu0 %v5408_v10  ;;  %2551 = vmatprep.subr.bf16.mxu1 %v5414_v13  ;;  %v7455_v10 = vld [vmem:[#allocation31_spill] sm:$0xff]  ;;  %v7456_v13 = vld [vmem:[#allocation32_spill] sm:$0xff] }
 0x6a7   :  { %2511 = vmatpush1.bf16.msra.mxu0 %v5420_v14  ;;  %2552 = vmatpush1.bf16.msra.mxu1 %v5426_v1  ;;  %v7457_v14 = vld [vmem:[#allocation33_spill] sm:$0xff]  ;;  %v7458_v1 = vld [vmem:[#allocation34_spill] sm:$0xff] }
 0x6a8   :  { %2602 = vmatprep.subr.bf16.mxu0 %v5432_v41  ;;  %2643 = vmatprep.subr.bf16.mxu1 %v5438_v29  ;;  %v7459_v41 = vld [vmem:[#allocation35_spill] sm:$0xff]  ;;  %v7460_v29 = vld [vmem:[#allocation36_spill] sm:$0xff] }
 0x6aa   :  { %2529 = vmatmul.mubr.bf16.vlgmr.msra.gmra.mrb[72].mxu0 %v2386_v4  ;;  %2570 = vmatmul.mubr.bf16.vlgmr.msra.gmra.mrb[72].mxu1 %v2386_v4 }
 0x6ab   :  { %2603 = vmatpush1.bf16.msra.mxu0 %v5444_v15  ;;  %2644 = vmatpush1.bf16.msra.mxu1 %v5450_v6  ;;  %v7461_v15 = vld [vmem:[#allocation37_spill] sm:$0xff]  ;;  %v7462_v6 = vld [vmem:[#allocation38_spill] sm:$0xff] }
 0x6ac   :  { %2604 = vmatprep.subr.bf16.mxu0 %v5456_v21  ;;  %2645 = vmatprep.subr.bf16.mxu1 %v5462_v53  ;;  %v7463_v21 = vld [vmem:[#allocation39_spill] sm:$0xff]  ;;  %v7464_v53 = vld [vmem:[#allocation40_spill] sm:$0xff] }
 0x6af   :  { %2605 = vmatpush1.bf16.msra.mxu0 %v5468_v22  ;;  %2646 = vmatpush1.bf16.msra.mxu1 %v5474_v31  ;;  %v7465_v22 = vld [vmem:[#allocation41_spill] sm:$0xff]  ;;  %v7466_v31 = vld [vmem:[#allocation42_spill] sm:$0xff] }
 0x6b0   :  { %2606 = vmatprep.subr.bf16.mxu0 %v5480_v32  ;;  %2647 = vmatprep.subr.bf16.mxu1 %v5486_v39  ;;  %v7467_v32 = vld [vmem:[#allocation43_spill] sm:$0xff]  ;;  %v7468_v39 = vld [vmem:[#allocation44_spill] sm:$0xff] }
 0x6b3   :  { %2607 = vmatpush1.bf16.msra.mxu0 %v7377_v30  ;;  %2648 = vmatpush1.bf16.msra.mxu1 %v7378_v17  ;;  %v7469_v30 = vld [vmem:[#allocation45_spill] sm:$0xff]  ;;  %v7470_v17 = vld [vmem:[#allocation46_spill] sm:$0xff] }
 0x6b4   :  { %2608 = vmatprep.subr.bf16.mxu0 %v7379_v20  ;;  %2649 = vmatprep.subr.bf16.mxu1 %v7380_v42  ;;  %v7471_v20 = vld [vmem:[#allocation47_spill] sm:$0xff]  ;;  %v7472_v42 = vld [vmem:[#allocation48_spill] sm:$0xff] }
 0x6b7   :  { %2609 = vmatpush1.bf16.msra.mxu0 %v7381_v25  ;;  %2650 = vmatpush1.bf16.msra.mxu1 %v7382_v16  ;;  %v7473_v25 = vld [vmem:[#allocation49_spill] sm:$0xff]  ;;  %v7474_v16 = vld [vmem:[#allocation50_spill] sm:$0xff] }
 0x6b8   :  { %2610 = vmatprep.subr.bf16.mxu0 %v7383_v26  ;;  %2651 = vmatprep.subr.bf16.mxu1 %v7384_v24  ;;  %v7475_v26 = vld [vmem:[#allocation51_spill] sm:$0xff]  ;;  %v7476_v24 = vld [vmem:[#allocation52_spill] sm:$0xff] }
 0x6bb   :  { %2611 = vmatpush1.bf16.msra.mxu0 %v7385_v34  ;;  %2652 = vmatpush1.bf16.msra.mxu1 %v7386_v27  ;;  %v7477_v34 = vld [vmem:[#allocation53_spill] sm:$0xff]  ;;  %v7478_v27 = vld [vmem:[#allocation54_spill] sm:$0xff] }
 0x6bc   :  { %2612 = vmatprep.subr.bf16.mxu0 %v7387_v28  ;;  %2653 = vmatprep.subr.bf16.mxu1 %v7388_v36  ;;  %v7479_v28 = vld [vmem:[#allocation55_spill] sm:$0xff]  ;;  %v7480_v36 = vld [vmem:[#allocation56_spill] sm:$0xff] }
 0x6bf   :  { %2613 = vmatpush1.bf16.msra.mxu0 %v7389_v33  ;;  %2654 = vmatpush1.bf16.msra.mxu1 %v7390_v7  ;;  %v7481_v33 = vld [vmem:[#allocation57_spill] sm:$0xff]  ;;  %v7482_v7 = vld [vmem:[#allocation58_spill] sm:$0xff] }
 0x6c0   :  { %2614 = vmatprep.subr.bf16.mxu0 %v7443_v35  ;;  %2655 = vmatprep.subr.bf16.mxu1 %v7444_v37  ;;  %v7484_v35 = vld [vmem:[#allocation6_spill] sm:$0xff] }
 0x6c3   :  { %2615 = vmatpush1.bf16.msra.mxu0 %v7445_v38  ;;  %2656 = vmatpush1.bf16.msra.mxu1 %v7446_v43 }
 0x6c4   :  { %2616 = vmatprep.subr.bf16.mxu0 %v7447_v44  ;;  %2657 = vmatprep.subr.bf16.mxu1 %v7448_v47 }
 0x6c7   :  { %2617 = vmatpush1.bf16.msra.mxu0 %v7449_v48  ;;  %2658 = vmatpush1.bf16.msra.mxu1 %v7450_v52 }
 0x6c8   :  { %2618 = vmatprep.subr.bf16.mxu0 %v7451_v55  ;;  %2659 = vmatprep.subr.bf16.mxu1 %v7452_v0  ;;  %v7485_v55 = vld [vmem:[#allocation7_spill] sm:$0xff] }
 0x6cb   :  { %2619 = vmatpush1.bf16.msra.mxu0 %v7453_v2  ;;  %2660 = vmatpush1.bf16.msra.mxu1 %v7454_v9  ;;  %v7486_v2 = vld [vmem:[#allocation8_spill] sm:$0xff] }
 0x6cc   :  { %2620 = vmatprep.subr.bf16.mxu0 %v7455_v10  ;;  %2661 = vmatprep.subr.bf16.mxu1 %v7456_v13 }
 0x6cf   :  { %2621 = vmatpush1.bf16.msra.mxu0 %v7457_v14  ;;  %2662 = vmatpush1.bf16.msra.mxu1 %v7458_v1 }
 0x6d0   :  { %2622 = vmatprep.subr.bf16.mxu0 %v7459_v41  ;;  %2663 = vmatprep.subr.bf16.mxu1 %v7460_v29 }
 0x6d3   :  { %2623 = vmatpush1.bf16.msra.mxu0 %v7461_v15  ;;  %2664 = vmatpush1.bf16.msra.mxu1 %v7462_v6 }
 0x6d4   :  { %2624 = vmatprep.subr.bf16.mxu0 %v7463_v21  ;;  %2665 = vmatprep.subr.bf16.mxu1 %v7464_v53  ;;  %v7487_v53 = vld [vmem:[#allocation60_spill] sm:$0xff] }
 0x6d7   :  { %2625 = vmatpush1.bf16.msra.mxu0 %v7465_v22  ;;  %2666 = vmatpush1.bf16.msra.mxu1 %v7466_v31 }
 0x6d8   :  { %2626 = vmatprep.subr.bf16.mxu0 %v7467_v32  ;;  %2667 = vmatprep.subr.bf16.mxu1 %v7468_v39 }
 0x6db   :  { %2627 = vmatpush1.bf16.msra.mxu0 %v7469_v30  ;;  %2668 = vmatpush1.bf16.msra.mxu1 %v7470_v17 }
 0x6dc   :  { %2628 = vmatprep.subr.bf16.mxu0 %v7471_v20  ;;  %2669 = vmatprep.subr.bf16.mxu1 %v7472_v42  ;;  %v7488_v20 = vld [vmem:[#allocation78_spill] sm:$0xff] }
 0x6df   :  { %2629 = vmatpush1.bf16.msra.mxu0 %v7473_v25  ;;  %2670 = vmatpush1.bf16.msra.mxu1 %v7474_v16  ;;  %v7489_v25 = vld [vmem:[#allocation79_spill] sm:$0xff] }
 0x6e0   :  { %2630 = vmatprep.subr.bf16.mxu0 %v7475_v26  ;;  %2671 = vmatprep.subr.bf16.mxu1 %v7476_v24 }
 0x6e3   :  { %2631 = vmatpush1.bf16.msra.mxu0 %v7477_v34  ;;  %2672 = vmatpush1.bf16.msra.mxu1 %v7478_v27  ;;  %v7490_v27 = vld [vmem:[#allocation80_spill] sm:$0xff] }
 0x6e4   :  { %2632 = vmatprep.subr.bf16.mxu0 %v7479_v28  ;;  %2673 = vmatprep.subr.bf16.mxu1 %v7480_v36  ;;  %v7491_v36 = vld [vmem:[#allocation81_spill] sm:$0xff] }
 0x6e7   :  { %2633 = vmatpush1.bf16.msra.mxu0 %v7481_v33  ;;  %2674 = vmatpush1.bf16.msra.mxu1 %v7482_v7 }
 0x6e8   :  { %2710 = vmatprep.subr.bf16.mxu0 %v6114_v45  ;;  %2751 = vmatprep.subr.bf16.mxu1 %v6120_v49 }
 0x75d   :  { %v2422_v62 = vpop.f32.mrb[68].mxu0  ;;  %v2463_v8 = vpop.f32.mrb[68].mxu1 }
 0x75e   :  { %v2470_v3 = vadd.f32 %v2422_v62, %v7483_v59  ;;  %v2424_v58 = vpop.f32.mrb[69].mxu0  ;;  %v2465_v4 = vpop.f32.mrb[69].mxu1  ;;  %v2472_v0 = vadd.f32 %v2463_v8, %v7485_v55 }
 0x75f   :  { %v2471_v37 = vadd.f32 %v2424_v58, %v7484_v35  ;;  %v2426_v38 = vpop.f32.mrb[70].mxu0  ;;  %v2467_v43 = vpop.f32.mrb[70].mxu1  ;;  %v2473_v9 = vadd.f32 %v2465_v4, %v7486_v2 }
 0x760   :  { %v2474_v44 = vmul.f32 0.5, %v2470_v3  ;;  %v2427_v47 = vpop.f32.mrb[71].mxu0  ;;  %v2468_v48 = vpop.f32.mrb[71].mxu1 }
 0x761   :  { %v2478_v52 = vmul.f32 0.5, %v2471_v37  ;;  %v2483_v10 = vmul.f32 0.5, %v2473_v9 }
 0x762   :  { %3804 = vtanh.f32 %v2474_v44 }
 0x763   :  { %3806 = vtanh.f32 %v2478_v52 }
 0x764   :  { %3808 = vtanh.f32 %v2472_v0 }
 0x765   :  { %3810 = vtanh.f32 %v2483_v10 }
 0x76c   :  { %v3805_v13 = vpop.eup %3804 }
 0x76d   :  { %v3807_v14 = vpop.eup %3806  ;;  %v2476_v1 = vmul.f32 0.5, %v3805_v13 }
 0x76e   :  { %v2480_v41 = vmul.f32 0.5, %v3807_v14  ;;  %v3809_v15 = vpop.eup %3808 }
 0x76f   :  { %v2477_v29 = vadd.f32 0.5, %v2476_v1  ;;  %v3811_v32 = vpop.eup %3810 }
 0x770   :  { %v2481_v6 = vadd.f32 0.5, %v2480_v41  ;;  %v2485_v39 = vmul.f32 0.5, %v3811_v32  ;;  %v6164_v32 = vld [vmem:[%s6797_s1 + $0x28c] ss:$16 sps:$4 sm:$0xff]  }
 0x771   :  { %v2488_v21 = vmul.f32 %v3809_v15, %v2477_v29 }
 0x772   :  { %v2487_v22 = vmul.f32 %v2481_v6, %v7487_v53  ;;  %v2486_v34 = vadd.f32 0.5, %v2485_v39  ;;  %v6170_v39 = vld [vmem:[%s6797_s1 + $0x280] ss:$16 sps:$4 sm:$0xff]  }
 0x774   :  { %v6128_v31 = vadd.f32 %v2488_v21, %v2487_v22 }
 0x776   :  { %3812 = vtanh.f32 %v6128_v31 }
 0x77d   :  { %v2530_v30 = vpop.f32.mrb[72].mxu0  ;;  %v2571_v17 = vpop.f32.mrb[72].mxu1 }
 0x77e   :  { %v2578_v42 = vadd.f32 %v2530_v30, %v7488_v20  ;;  %v2580_v16 = vadd.f32 %v2571_v17, %v7489_v25  ;;  %v2532_v26 = vpop.f32.mrb[73].mxu0  ;;  %v2573_v24 = vpop.f32.mrb[73].mxu1  ;;  %v6176_v30 = vld [vmem:[%s6797_s1 + $0x288] ss:$16 sps:$4 sm:$0xff]   ;;  %v6182_v17 = vld [vmem:[%s6797_s1 + $0x2a4] ss:$16 sps:$4 sm:$0xff]  }
 0x77f   :  { %v2579_v28 = vadd.f32 %v2532_v26, %v7490_v27  ;;  %v2581_v33 = vadd.f32 %v2573_v24, %v7491_v36  ;;  %v2534_v7 = vpop.f32.mrb[74].mxu0  ;;  %v2575_v62 = vpop.f32.mrb[74].mxu1  ;;  %v6188_v20 = vld [vmem:[%s6797_s1 + $0x2ac] ss:$16 sps:$4 sm:$0xff]   ;;  %v6200_v25 = vld [vmem:[%s6797_s1 + $0x2a8] ss:$16 sps:$4 sm:$0xff]  }
 0x780   :  { %v3813_v8 = vpop.eup %3812  ;;  %v2582_v3 = vmul.f32 0.5, %v2578_v42  ;;  %v2535_v58 = vpop.f32.mrb[75].mxu0  ;;  %v6194_v42 = vld [vmem:[%s6797_s1 + $0x2a0] ss:$16 sps:$4 sm:$0xff]   ;;  %v6212_v26 = vld [vmem:[%s6797_s1 + $0x2cc] ss:$16 sps:$4 sm:$0xff]  }
 0x781   :  { %v2576_v4 = vpop.f32.mrb[75].mxu1  ;;  %v2586_v37 = vmul.f32 0.5, %v2579_v28  ;;  %v2491_v38 = vmul.f32 %v3813_v8, %v2486_v34  ;;  %v2591_v44 = vmul.f32 0.5, %v2581_v33  ;;  %v6218_v24 = vld [vmem:[%s6797_s1 + $0x2c0] ss:$16 sps:$4 sm:$0xff]  }
 0x782   :  { %3814 = vtanh.f32 %v2582_v3  ;;  %v6224_v34 = vld [vmem:[%s6797_s1 + $0x2c8] ss:$16 sps:$4 sm:$0xff]   ;;  %v6230_v27 = vld [vmem:[%s6797_s1 + $0x2e4] ss:$16 sps:$4 sm:$0xff]   ;;  %v6236_v28 = vld [vmem:[%s6797_s1 + $0x2ec] ss:$16 sps:$4 sm:$0xff]  }
 0x783   :  { %3816 = vtanh.f32 %v2586_v37  ;;  %v2601_v43 = vpack.c.bf16 %v2491_v38, %v2491_v38  ;;  %v6242_v36 = vld [vmem:[%s6797_s1 + $0x2e0] ss:$16 sps:$4 sm:$0xff]   ;;  %v6248_v33 = vld [vmem:[%s6797_s1 + $0x2e8] ss:$16 sps:$4 sm:$0xff]   ;;  %v6254_v7 = vld [vmem:[%s6797_s1 + $0x304] ss:$16 sps:$4 sm:$0xff]  }
 0x784   :  { %3818 = vtanh.f32 %v2580_v16  ;;  %v6206_v16 = vld [vmem:[%s6797_s1 + $0x2c4] ss:$16 sps:$4 sm:$0xff]   ;;  %v6260_v62 = vld [vmem:[%s6797_s1 + $0x30c] ss:$16 sps:$4 sm:$0xff]   ;;  %v6266_v8 = vld [vmem:[%s6797_s1 + $0x300] ss:$16 sps:$4 sm:$0xff]  }
 0x785   :  { %2634 = vmatprep.mubr.bf16.mxu0 %v2601_v43  ;;  %2675 = vmatprep.mubr.bf16.mxu1 %v2601_v43  ;;  %3820 = vtanh.f32 %v2591_v44  ;;  %v6272_v3 = vld [vmem:[%s6797_s1 + $0x308] ss:$16 sps:$4 sm:$0xff]   ;;  %v6278_v58 = vld [vmem:[%s6797_s1 + $0x324] ss:$16 sps:$4 sm:$0xff]   ;;  %v6284_v4 = vld [vmem:[%s6797_s1 + $0x32c] ss:$16 sps:$4 sm:$0xff]  }
 0x786   :  { %v6290_v37 = vld [vmem:[%s6797_s1 + $0x320] ss:$16 sps:$4 sm:$0xff]   ;;  %v6296_v38 = vld [vmem:[%s6797_s1 + $0x328] ss:$16 sps:$4 sm:$0xff]   ;;  %v6302_v43 = vld [vmem:[%s6797_s1 + $0x344] ss:$16 sps:$4 sm:$0xff]  }
 0x787   :  { %v6308_v44 = vld [vmem:[%s6797_s1 + $0x34c] ss:$16 sps:$4 sm:$0xff]  }
 0x78c   :  { %v3815_v47 = vpop.eup %3814 }
 0x78d   :  { %v3817_v48 = vpop.eup %3816  ;;  %v2584_v52 = vmul.f32 0.5, %v3815_v47  ;;  %v6314_v47 = vld [vmem:[%s6797_s1 + $0x340] ss:$16 sps:$4 sm:$0xff]  }
 0x78e   :  { %v2588_v0 = vmul.f32 0.5, %v3817_v48  ;;  %v3819_v10 = vpop.eup %3818  ;;  %7492 = vst [vmem:[#allocation9_spill] sm:$0xff] %v6314_v47  ;;  %v6320_v48 = vld [vmem:[%s6797_s1 + $0x348] ss:$16 sps:$4 sm:$0xff]  }
 0x78f   :  { %v2585_v9 = vadd.f32 0.5, %v2584_v52  ;;  %v3821_v29 = vpop.eup %3820  ;;  %7493 = vst [vmem:[#allocation66_spill] sm:$0xff] %v6320_v48  ;;  %v6326_v52 = vld [vmem:[%s6797_s1 + $0x364] ss:$16 sps:$4 sm:$0xff]  }
 0x790   :  { %v2589_v13 = vadd.f32 0.5, %v2588_v0  ;;  %v2593_v15 = vmul.f32 0.5, %v3821_v29  ;;  %7494 = vst [vmem:[#allocation67_spill] sm:$0xff] %v6326_v52  ;;  %v6332_v0 = vld [vmem:[%s6797_s1 + $0x36c] ss:$16 sps:$4 sm:$0xff]  }
 0x791   :  { %v2596_v14 = vmul.f32 %v3819_v10, %v2585_v9  ;;  %7495 = vst [vmem:[#allocation68_spill] sm:$0xff] %v6332_v0  ;;  %v6338_v9 = vld [vmem:[%s6797_s1 + $0x360] ss:$16 sps:$4 sm:$0xff]   ;;  %v6344_v10 = vld [vmem:[%s6797_s1 + $0x368] ss:$16 sps:$4 sm:$0xff]  }
 0x792   :  { %v2595_v1 = vmul.f32 %v2589_v13, %v5942_v63  ;;  %v2594_v6 = vadd.f32 0.5, %v2593_v15  ;;  %v6158_v63 = vld [vmem:[%s6797_s1 + $0x284] ss:$16 sps:$4 sm:$0xff]   ;;  %7496 = vst [vmem:[#allocation69_spill] sm:$0xff] %v6338_v9  ;;  %7497 = vst [vmem:[#allocation70_spill] sm:$0xff] %v6344_v10 }
 0x793   :  { %v6350_v13 = vld [vmem:[%s6797_s1 + $0x384] ss:$16 sps:$4 sm:$0xff]   ;;  %v6368_v29 = vld [vmem:[%s6797_s1 + $0x388] ss:$16 sps:$4 sm:$0xff]  }
 0x794   :  { %v6136_v41 = vadd.f32 %v2596_v14, %v2595_v1  ;;  %7498 = vst [vmem:[#allocation71_spill] sm:$0xff] %v6350_v13  ;;  %v6356_v14 = vld [vmem:[%s6797_s1 + $0x38c] ss:$16 sps:$4 sm:$0xff]   ;;  %v6362_v1 = vld [vmem:[%s6797_s1 + $0x380] ss:$16 sps:$4 sm:$0xff]   ;;  %7501 = vst [vmem:[#allocation12_spill] sm:$0xff] %v6368_v29 }
 0x795   :  { %7499 = vst [vmem:[#allocation72_spill] sm:$0xff] %v6356_v14  ;;  %7500 = vst [vmem:[#allocation73_spill] sm:$0xff] %v6362_v1  ;;  %v6374_v15 = vld [vmem:[%s6797_s1 + $0x3a4] ss:$16 sps:$4 sm:$0xff]  }
 0x796   :  { %3822 = vtanh.f32 %v6136_v41  ;;  %7502 = vst [vmem:[#allocation13_spill] sm:$0xff] %v6374_v15 }
 0x7a0   :  { %v3823_v21 = vpop.eup %3822 }
 0x7a1   :  { %v2599_v53 = vmul.f32 %v3823_v21, %v2594_v6  ;;  %v6380_v6 = vld [vmem:[%s6797_s1 + $0x3ac] ss:$16 sps:$4 sm:$0xff]   ;;  %v6386_v21 = vld [vmem:[%s6797_s1 + $0x3a0] ss:$16 sps:$4 sm:$0xff]  }
 0x7a2   :  { %7503 = vst [vmem:[#allocation14_spill] sm:$0xff] %v6380_v6  ;;  %7504 = vst [vmem:[#allocation15_spill] sm:$0xff] %v6386_v21 }
 0x7a3   :  { %v2600_v22 = vpack.c.bf16 %v2599_v53, %v2599_v53  ;;  %v6392_v53 = vld [vmem:[%s6797_s1 + $0x3a8] ss:$16 sps:$4 sm:$0xff]  }
 0x7a4   :  { %7505 = vst [vmem:[#allocation16_spill] sm:$0xff] %v6392_v53 }
 0x7a5   :  { %2635 = vmatmul.mubr.bf16.vlgmr.msra.gmra.mrb[76].mxu0 %v2600_v22  ;;  %2676 = vmatmul.mubr.bf16.vlgmr.msra.gmra.mrb[76].mxu1 %v2600_v22 }
 0x7a6   :  { %2711 = vmatpush1.bf16.msra.mxu0 %v5948_v11  ;;  %2752 = vmatpush1.bf16.msra.mxu1 %v5954_v56 }
 0x7a7   :  { %2712 = vmatprep.subr.bf16.mxu0 %v5960_v50  ;;  %2753 = vmatprep.subr.bf16.mxu1 %v5966_v60 }
 0x7a8   :  { %2742 = vmatprep.mubr.bf16.mxu0 %v7194_v23  ;;  %2783 = vmatprep.mubr.bf16.mxu1 %v7194_v23 }
 0x7aa   :  { %2713 = vmatpush1.bf16.msra.mxu0 %v5974_v61  ;;  %2754 = vmatpush1.bf16.msra.mxu1 %v5980_v19 }
 0x7ab   :  { %2714 = vmatprep.subr.bf16.mxu0 %v5986_v40  ;;  %2755 = vmatprep.subr.bf16.mxu1 %v5992_v46 }
 0x7ae   :  { %2715 = vmatpush1.bf16.msra.mxu0 %v5998_v57  ;;  %2756 = vmatpush1.bf16.msra.mxu1 %v6004_v18 }
 0x7af   :  { %2716 = vmatprep.subr.bf16.mxu0 %v6010_v12  ;;  %2757 = vmatprep.subr.bf16.mxu1 %v6016_v5 }
 0x7b2   :  { %2717 = vmatpush1.bf16.msra.mxu0 %v6022_v51  ;;  %2758 = vmatpush1.bf16.msra.mxu1 %v6028_v54 }
 0x7b3   :  { %2718 = vmatprep.subr.bf16.mxu0 %v6158_v63  ;;  %2759 = vmatprep.subr.bf16.mxu1 %v6164_v32 }
 0x7b6   :  { %2719 = vmatpush1.bf16.msra.mxu0 %v6170_v39  ;;  %2760 = vmatpush1.bf16.msra.mxu1 %v6176_v30 }
 0x7b7   :  { %2720 = vmatprep.subr.bf16.mxu0 %v6182_v17  ;;  %2761 = vmatprep.subr.bf16.mxu1 %v6188_v20 }
 0x7ba   :  { %2721 = vmatpush1.bf16.msra.mxu0 %v6194_v42  ;;  %2762 = vmatpush1.bf16.msra.mxu1 %v6200_v25 }
 0x7bb   :  { %2722 = vmatprep.subr.bf16.mxu0 %v6206_v16  ;;  %2763 = vmatprep.subr.bf16.mxu1 %v6212_v26 }
 0x7be   :  { %2723 = vmatpush1.bf16.msra.mxu0 %v6218_v24  ;;  %2764 = vmatpush1.bf16.msra.mxu1 %v6224_v34 }
 0x7bf   :  { %2724 = vmatprep.subr.bf16.mxu0 %v6230_v27  ;;  %2765 = vmatprep.subr.bf16.mxu1 %v6236_v28 }
 0x7c2   :  { %2725 = vmatpush1.bf16.msra.mxu0 %v6242_v36  ;;  %2766 = vmatpush1.bf16.msra.mxu1 %v6248_v33 }
 0x7c3   :  { %2816 = vmatprep.subr.bf16.mxu0 %v6254_v7  ;;  %2857 = vmatprep.subr.bf16.mxu1 %v6260_v62 }
 0x7c5   :  { %2743 = vmatmul.mubr.bf16.vlgmr.msra.gmra.mrb[80].mxu0 %v2600_v22  ;;  %2784 = vmatmul.mubr.bf16.vlgmr.msra.gmra.mrb[80].mxu1 %v2600_v22  ;;  %v6398_v22 = vld [vmem:[%s6797_s1 + $0x3c4] ss:$16 sps:$4 sm:$0xff]  }
 0x7c6   :  { %2817 = vmatpush1.bf16.msra.mxu0 %v6266_v8  ;;  %2858 = vmatpush1.bf16.msra.mxu1 %v6272_v3  ;;  %7506 = vst [vmem:[#allocation17_spill] sm:$0xff] %v6398_v22 }
 0x7c7   :  { %2818 = vmatprep.subr.bf16.mxu0 %v6278_v58  ;;  %2859 = vmatprep.subr.bf16.mxu1 %v6284_v4 }
 0x7ca   :  { %2819 = vmatpush1.bf16.msra.mxu0 %v6290_v37  ;;  %2860 = vmatpush1.bf16.msra.mxu1 %v6296_v38 }
 0x7cb   :  { %2820 = vmatprep.subr.bf16.mxu0 %v6302_v43  ;;  %2861 = vmatprep.subr.bf16.mxu1 %v6308_v44 }
 0x7ce   :  { %2821 = vmatpush1.bf16.msra.mxu0 %v6314_v47  ;;  %2862 = vmatpush1.bf16.msra.mxu1 %v6320_v48 }
 0x7cf   :  { %2822 = vmatprep.subr.bf16.mxu0 %v6326_v52  ;;  %2863 = vmatprep.subr.bf16.mxu1 %v6332_v0 }
 0x7d2   :  { %2823 = vmatpush1.bf16.msra.mxu0 %v6338_v9  ;;  %2864 = vmatpush1.bf16.msra.mxu1 %v6344_v10 }
 0x7d3   :  { %2824 = vmatprep.subr.bf16.mxu0 %v6350_v13  ;;  %2865 = vmatprep.subr.bf16.mxu1 %v6356_v14 }
 0x7d6   :  { %2825 = vmatpush1.bf16.msra.mxu0 %v6362_v1  ;;  %2866 = vmatpush1.bf16.msra.mxu1 %v6368_v29 }
 0x7d7   :  { %2826 = vmatprep.subr.bf16.mxu0 %v6374_v15  ;;  %2867 = vmatprep.subr.bf16.mxu1 %v6380_v6  ;;  %v6404_v6 = vld [vmem:[%s6797_s1 + $0x3cc] ss:$16 sps:$4 sm:$0xff]  }
 0x7d8   :  { %7507 = vst [vmem:[#allocation18_spill] sm:$0xff] %v6404_v6 }
 0x7da   :  { %2827 = vmatpush1.bf16.msra.mxu0 %v6386_v21  ;;  %2868 = vmatpush1.bf16.msra.mxu1 %v6392_v53  ;;  %v6410_v21 = vld [vmem:[%s6797_s1 + $0x3c0] ss:$16 sps:$4 sm:$0xff]   ;;  %v6416_v53 = vld [vmem:[%s6797_s1 + $0x3c8] ss:$16 sps:$4 sm:$0xff]  }
 0x7db   :  { %2828 = vmatprep.subr.bf16.mxu0 %v6398_v22  ;;  %2869 = vmatprep.subr.bf16.mxu1 %v6404_v6  ;;  %7508 = vst [vmem:[#allocation19_spill] sm:$0xff] %v6410_v21  ;;  %7509 = vst [vmem:[#allocation20_spill] sm:$0xff] %v6416_v53  ;;  %v6422_v22 = vld [vmem:[%s6797_s1 + $0x3e4] ss:$16 sps:$4 sm:$0xff]   ;;  %v6428_v6 = vld [vmem:[%s6797_s1 + $0x3ec] ss:$16 sps:$4 sm:$0xff]  }
 0x7dc   :  { %7510 = vst [vmem:[#allocation3_spill] sm:$0xff] %v6422_v22  ;;  %7511 = vst [vmem:[#allocation4_spill] sm:$0xff] %v6428_v6 }
 0x7de   :  { %2829 = vmatpush1.bf16.msra.mxu0 %v6410_v21  ;;  %2870 = vmatpush1.bf16.msra.mxu1 %v6416_v53  ;;  %v6434_v21 = vld [vmem:[%s6797_s1 + $0x3e0] ss:$16 sps:$4 sm:$0xff]   ;;  %v6440_v53 = vld [vmem:[%s6797_s1 + $0x3e8] ss:$16 sps:$4 sm:$0xff]  }
 0x7df   :  { %2830 = vmatprep.subr.bf16.mxu0 %v6422_v22  ;;  %2871 = vmatprep.subr.bf16.mxu1 %v6428_v6  ;;  %7512 = vst [vmem:[#allocation61_spill] sm:$0xff] %v6434_v21  ;;  %7513 = vst [vmem:[#allocation62_spill] sm:$0xff] %v6440_v53  ;;  %v6446_v22 = vld [vmem:[%s6797_s1 + $0x404] ss:$16 sps:$4 sm:$0xff]   ;;  %v6452_v6 = vld [vmem:[%s6797_s1 + $0x40c] ss:$16 sps:$4 sm:$0xff]  }
 0x7e0   :  { %7514 = vst [vmem:[#allocation63_spill] sm:$0xff] %v6446_v22  ;;  %7515 = vst [vmem:[#allocation10_spill] sm:$0xff] %v6452_v6 }
 0x7e2   :  { %2831 = vmatpush1.bf16.msra.mxu0 %v6434_v21  ;;  %2872 = vmatpush1.bf16.msra.mxu1 %v6440_v53  ;;  %v6458_v21 = vld [vmem:[%s6797_s1 + $0x400] ss:$16 sps:$4 sm:$0xff]   ;;  %v6464_v53 = vld [vmem:[%s6797_s1 + $0x408] ss:$16 sps:$4 sm:$0xff]  }
 0x7e3   :  { %2832 = vmatprep.subr.bf16.mxu0 %v6446_v22  ;;  %2873 = vmatprep.subr.bf16.mxu1 %v6452_v6  ;;  %7516 = vst [vmem:[#allocation11_spill] sm:$0xff] %v6458_v21  ;;  %7517 = vst [vmem:[#allocation59_spill] sm:$0xff] %v6464_v53  ;;  %v6470_v22 = vld [vmem:[%s6797_s1 + $0x424] ss:$16 sps:$4 sm:$0xff]   ;;  %v6476_v6 = vld [vmem:[%s6797_s1 + $0x42c] ss:$16 sps:$4 sm:$0xff]  }
 0x7e4   :  { %7518 = vst [vmem:[#allocation74_spill] sm:$0xff] %v6470_v22  ;;  %7519 = vst [vmem:[#allocation75_spill] sm:$0xff] %v6476_v6 }
 0x7e6   :  { %2833 = vmatpush1.bf16.msra.mxu0 %v6458_v21  ;;  %2874 = vmatpush1.bf16.msra.mxu1 %v6464_v53  ;;  %v6482_v21 = vld [vmem:[%s6797_s1 + $0x420] ss:$16 sps:$4 sm:$0xff]   ;;  %v6488_v53 = vld [vmem:[%s6797_s1 + $0x428] ss:$16 sps:$4 sm:$0xff]  }
 0x7e7   :  { %2834 = vmatprep.subr.bf16.mxu0 %v6470_v22  ;;  %2875 = vmatprep.subr.bf16.mxu1 %v6476_v6  ;;  %7520 = vst [vmem:[#allocation76_spill] sm:$0xff] %v6482_v21  ;;  %7521 = vst [vmem:[#allocation77_spill] sm:$0xff] %v6488_v53  ;;  %v6494_v22 = vld [vmem:[%s6797_s1 + $0x444] ss:$16 sps:$4 sm:$0xff]   ;;  %v6500_v6 = vld [vmem:[%s6797_s1 + $0x44c] ss:$16 sps:$4 sm:$0xff]  }
 0x7e8   :  { %7522 = vst [vmem:[#allocation64_spill] sm:$0xff] %v6494_v22  ;;  %7523 = vst [vmem:[#allocation65_spill] sm:$0xff] %v6500_v6 }
 0x7ea   :  { %2835 = vmatpush1.bf16.msra.mxu0 %v6482_v21  ;;  %2876 = vmatpush1.bf16.msra.mxu1 %v6488_v53  ;;  %v6506_v21 = vld [vmem:[%s6797_s1 + $0x440] ss:$16 sps:$4 sm:$0xff]   ;;  %v6512_v53 = vld [vmem:[%s6797_s1 + $0x448] ss:$16 sps:$4 sm:$0xff]  }
 0x7eb   :  { %2836 = vmatprep.subr.bf16.mxu0 %v6494_v22  ;;  %2877 = vmatprep.subr.bf16.mxu1 %v6500_v6  ;;  %7524 = vst [vmem:[#allocation21_spill] sm:$0xff] %v6506_v21  ;;  %7525 = vst [vmem:[#allocation22_spill] sm:$0xff] %v6512_v53  ;;  %v6518_v22 = vld [vmem:[%s6797_s1 + $0x464] ss:$16 sps:$4 sm:$0xff]   ;;  %v6524_v6 = vld [vmem:[%s6797_s1 + $0x46c] ss:$16 sps:$4 sm:$0xff]  }
 0x7ec   :  { %7526 = vst [vmem:[#allocation23_spill] sm:$0xff] %v6518_v22  ;;  %7527 = vst [vmem:[#allocation24_spill] sm:$0xff] %v6524_v6 }
 0x7ee   :  { %2837 = vmatpush1.bf16.msra.mxu0 %v6506_v21  ;;  %2878 = vmatpush1.bf16.msra.mxu1 %v6512_v53  ;;  %v6530_v21 = vld [vmem:[%s6797_s1 + $0x460] ss:$16 sps:$4 sm:$0xff]   ;;  %v6536_v53 = vld [vmem:[%s6797_s1 + $0x468] ss:$16 sps:$4 sm:$0xff]  }
 0x7ef   :  { %2838 = vmatprep.subr.bf16.mxu0 %v6518_v22  ;;  %2879 = vmatprep.subr.bf16.mxu1 %v6524_v6  ;;  %7528 = vst [vmem:[#allocation25_spill] sm:$0xff] %v6530_v21  ;;  %7529 = vst [vmem:[#allocation26_spill] sm:$0xff] %v6536_v53  ;;  %v6542_v22 = vld [vmem:[%s6797_s1 + $0x484] ss:$16 sps:$4 sm:$0xff]   ;;  %v6548_v6 = vld [vmem:[%s6797_s1 + $0x48c] ss:$16 sps:$4 sm:$0xff]  }
 0x7f0   :  { %7530 = vst [vmem:[#allocation27_spill] sm:$0xff] %v6542_v22  ;;  %7531 = vst [vmem:[#allocation28_spill] sm:$0xff] %v6548_v6 }
 0x7f2   :  { %2839 = vmatpush1.bf16.msra.mxu0 %v6530_v21  ;;  %2880 = vmatpush1.bf16.msra.mxu1 %v6536_v53  ;;  %v6554_v21 = vld [vmem:[%s6797_s1 + $0x480] ss:$16 sps:$4 sm:$0xff]   ;;  %v6560_v53 = vld [vmem:[%s6797_s1 + $0x488] ss:$16 sps:$4 sm:$0xff]  }
 0x7f3   :  { %2840 = vmatprep.subr.bf16.mxu0 %v6542_v22  ;;  %2881 = vmatprep.subr.bf16.mxu1 %v6548_v6  ;;  %7532 = vst [vmem:[#allocation29_spill] sm:$0xff] %v6554_v21  ;;  %7533 = vst [vmem:[#allocation30_spill] sm:$0xff] %v6560_v53  ;;  %v6566_v22 = vld [vmem:[%s6797_s1 + $0x4a4] ss:$16 sps:$4 sm:$0xff]   ;;  %v6572_v6 = vld [vmem:[%s6797_s1 + $0x4ac] ss:$16 sps:$4 sm:$0xff]  }
 0x7f4   :  { %7534 = vst [vmem:[#allocation31_spill] sm:$0xff] %v6566_v22  ;;  %7535 = vst [vmem:[#allocation32_spill] sm:$0xff] %v6572_v6 }
 0x7f6   :  { %2841 = vmatpush1.bf16.msra.mxu0 %v6554_v21  ;;  %2882 = vmatpush1.bf16.msra.mxu1 %v6560_v53  ;;  %v6578_v21 = vld [vmem:[%s6797_s1 + $0x4a0] ss:$16 sps:$4 sm:$0xff]   ;;  %v6584_v53 = vld [vmem:[%s6797_s1 + $0x4a8] ss:$16 sps:$4 sm:$0xff]  }
 0x7f7   :  { %2842 = vmatprep.subr.bf16.mxu0 %v6566_v22  ;;  %2883 = vmatprep.subr.bf16.mxu1 %v6572_v6  ;;  %7536 = vst [vmem:[#allocation33_spill] sm:$0xff] %v6578_v21  ;;  %7537 = vst [vmem:[#allocation34_spill] sm:$0xff] %v6584_v53  ;;  %v6590_v22 = vld [vmem:[%s6797_s1 + $0x4c4] ss:$16 sps:$4 sm:$0xff]   ;;  %v6596_v6 = vld [vmem:[%s6797_s1 + $0x4cc] ss:$16 sps:$4 sm:$0xff]  }
 0x7f8   :  { %7538 = vst [vmem:[#allocation35_spill] sm:$0xff] %v6590_v22  ;;  %7539 = vst [vmem:[#allocation36_spill] sm:$0xff] %v6596_v6 }
 0x7fa   :  { %2843 = vmatpush1.bf16.msra.mxu0 %v6578_v21  ;;  %2884 = vmatpush1.bf16.msra.mxu1 %v6584_v53  ;;  %v6602_v21 = vld [vmem:[%s6797_s1 + $0x4c0] ss:$16 sps:$4 sm:$0xff]   ;;  %v6608_v53 = vld [vmem:[%s6797_s1 + $0x4c8] ss:$16 sps:$4 sm:$0xff]  }
 0x7fb   :  { %2844 = vmatprep.subr.bf16.mxu0 %v6590_v22  ;;  %2885 = vmatprep.subr.bf16.mxu1 %v6596_v6  ;;  %7540 = vst [vmem:[#allocation37_spill] sm:$0xff] %v6602_v21  ;;  %7541 = vst [vmem:[#allocation38_spill] sm:$0xff] %v6608_v53  ;;  %v6614_v22 = vld [vmem:[%s6797_s1 + $0x4e4] ss:$16 sps:$4 sm:$0xff]   ;;  %v6620_v6 = vld [vmem:[%s6797_s1 + $0x4ec] ss:$16 sps:$4 sm:$0xff]  }
 0x7fc   :  { %7542 = vst [vmem:[#allocation39_spill] sm:$0xff] %v6614_v22  ;;  %7543 = vst [vmem:[#allocation40_spill] sm:$0xff] %v6620_v6 }
 0x7fe   :  { %2845 = vmatpush1.bf16.msra.mxu0 %v6602_v21  ;;  %2886 = vmatpush1.bf16.msra.mxu1 %v6608_v53  ;;  %v6626_v21 = vld [vmem:[%s6797_s1 + $0x4e0] ss:$16 sps:$4 sm:$0xff]   ;;  %v6632_v53 = vld [vmem:[%s6797_s1 + $0x4e8] ss:$16 sps:$4 sm:$0xff]  }
 0x7ff   :  { %2846 = vmatprep.subr.bf16.mxu0 %v6614_v22  ;;  %2887 = vmatprep.subr.bf16.mxu1 %v6620_v6  ;;  %7544 = vst [vmem:[#allocation41_spill] sm:$0xff] %v6626_v21  ;;  %7545 = vst [vmem:[#allocation42_spill] sm:$0xff] %v6632_v53 }
 0x802   :  { %2847 = vmatpush1.bf16.msra.mxu0 %v6626_v21  ;;  %2888 = vmatpush1.bf16.msra.mxu1 %v6632_v53 }
 0x803   :  { %2924 = vmatprep.subr.bf16.mxu0 %v6114_v45  ;;  %2965 = vmatprep.subr.bf16.mxu1 %v6120_v49 }
 0x878   :  { %v2636_v22 = vpop.f32.mrb[76].mxu0  ;;  %v2677_v6 = vpop.f32.mrb[76].mxu1 }
 0x879   :  { %v2684_v15 = vadd.f32 %v2636_v22, %v7483_v59  ;;  %v2638_v29 = vpop.f32.mrb[77].mxu0  ;;  %v2679_v1 = vpop.f32.mrb[77].mxu1  ;;  %v2686_v53 = vadd.f32 %v2677_v6, %v7485_v55  ;;  %v7547_v6 = vld [vmem:[#allocation82_spill] sm:$0xff] }
 0x87a   :  { %v2685_v14 = vadd.f32 %v2638_v29, %v7484_v35  ;;  %v2640_v21 = vpop.f32.mrb[78].mxu0  ;;  %v2681_v13 = vpop.f32.mrb[78].mxu1  ;;  %v2687_v45 = vadd.f32 %v2679_v1, %v7486_v2  ;;  %v7549_v2 = vld [vmem:[#allocation84_spill] sm:$0xff] }
 0x87b   :  { %v2688_v10 = vmul.f32 0.5, %v2684_v15  ;;  %v2641_v9 = vpop.f32.mrb[79].mxu0  ;;  %v2682_v0 = vpop.f32.mrb[79].mxu1 }
 0x87c   :  { %v2692_v52 = vmul.f32 0.5, %v2685_v14  ;;  %v2697_v49 = vmul.f32 0.5, %v2687_v45  ;;  %v7548_v45 = vld [vmem:[#allocation83_spill] sm:$0xff] }
 0x87d   :  { %3824 = vtanh.f32 %v2688_v10 }
 0x87e   :  { %3826 = vtanh.f32 %v2692_v52 }
 0x87f   :  { %3828 = vtanh.f32 %v2686_v53 }
 0x880   :  { %3830 = vtanh.f32 %v2697_v49 }
 0x887   :  { %v3825_v48 = vpop.eup %3824 }
 0x888   :  { %v3827_v22 = vpop.eup %3826  ;;  %v2690_v59 = vmul.f32 0.5, %v3825_v48 }
 0x889   :  { %v2694_v47 = vmul.f32 0.5, %v3827_v22  ;;  %v3829_v21 = vpop.eup %3828 }
 0x88a   :  { %v2691_v29 = vadd.f32 0.5, %v2690_v59  ;;  %v3831_v52 = vpop.eup %3830 }
 0x88b   :  { %v2695_v13 = vadd.f32 0.5, %v2694_v47  ;;  %v2699_v10 = vmul.f32 0.5, %v3831_v52 }
 0x88c   :  { %v2702_v15 = vmul.f32 %v3829_v21, %v2691_v29  ;;  %v7550_v29 = vld [vmem:[#allocation85_spill] sm:$0xff] }
 0x88d   :  { %v2701_v0 = vmul.f32 %v2695_v13, %v6128_v31  ;;  %v2700_v59 = vadd.f32 0.5, %v2699_v10 }
 0x88f   :  { %v6642_v9 = vadd.f32 %v2702_v15, %v2701_v0 }
 0x891   :  { %7546 = vst [vmem:[#allocation43_spill] sm:$0xff] %v6642_v9  ;;  %3832 = vtanh.f32 %v6642_v9 }
 0x898   :  { %v2744_v14 = vpop.f32.mrb[80].mxu0  ;;  %v2785_v1 = vpop.f32.mrb[80].mxu1 }
 0x899   :  { %v2792_v53 = vadd.f32 %v2744_v14, %v7547_v6  ;;  %v2794_v48 = vadd.f32 %v2785_v1, %v7548_v45  ;;  %v2746_v22 = vpop.f32.mrb[81].mxu0  ;;  %v2787_v49 = vpop.f32.mrb[81].mxu1 }
 0x89a   :  { %v2793_v47 = vadd.f32 %v2746_v22, %v7549_v2  ;;  %v2795_v21 = vadd.f32 %v2787_v49, %v7550_v29  ;;  %v2748_v31 = vpop.f32.mrb[82].mxu0  ;;  %v2789_v13 = vpop.f32.mrb[82].mxu1 }
 0x89b   :  { %v3833_v15 = vpop.eup %3832  ;;  %v2796_v0 = vmul.f32 0.5, %v2792_v53  ;;  %v2749_v9 = vpop.f32.mrb[83].mxu0  ;;  %v7593_v13 = vld [vmem:[#allocation31_spill] sm:$0xff] }
 0x89c   :  { %v2790_v55 = vpop.f32.mrb[83].mxu1  ;;  %v2800_v52 = vmul.f32 0.5, %v2793_v47  ;;  %v2705_v35 = vmul.f32 %v3833_v15, %v2700_v59  ;;  %v2805_v1 = vmul.f32 0.5, %v2795_v21  ;;  %v7594_v15 = vld [vmem:[#allocation32_spill] sm:$0xff] }
 0x89d   :  { %3834 = vtanh.f32 %v2796_v0  ;;  %v7595_v0 = vld [vmem:[#allocation33_spill] sm:$0xff] }
 0x89e   :  { %3836 = vtanh.f32 %v2800_v52  ;;  %v2815_v14 = vpack.c.bf16 %v2705_v35, %v2705_v35  ;;  %v7596_v52 = vld [vmem:[#allocation34_spill] sm:$0xff] }
 0x89f   :  { %3838 = vtanh.f32 %v2794_v48 }
 0x8a0   :  { %2848 = vmatprep.mubr.bf16.mxu0 %v2815_v14  ;;  %2889 = vmatprep.mubr.bf16.mxu1 %v2815_v14  ;;  %3840 = vtanh.f32 %v2805_v1  ;;  %v7597_v14 = vld [vmem:[#allocation35_spill] sm:$0xff]  ;;  %v7598_v1 = vld [vmem:[#allocation36_spill] sm:$0xff] }
 0x8a7   :  { %v3835_v10 = vpop.eup %3834 }
 0x8a8   :  { %v3837_v6 = vpop.eup %3836  ;;  %v2798_v2 = vmul.f32 0.5, %v3835_v10  ;;  %v7599_v10 = vld [vmem:[#allocation37_spill] sm:$0xff] }
 0x8a9   :  { %v2802_v45 = vmul.f32 0.5, %v3837_v6  ;;  %v3839_v49 = vpop.eup %3838  ;;  %v7600_v6 = vld [vmem:[#allocation38_spill] sm:$0xff] }
 0x8aa   :  { %v2799_v22 = vadd.f32 0.5, %v2798_v2  ;;  %v3841_v35 = vpop.eup %3840  ;;  %v7601_v2 = vld [vmem:[#allocation39_spill] sm:$0xff] }
 0x8ab   :  { %v2803_v29 = vadd.f32 0.5, %v2802_v45  ;;  %v2807_v59 = vmul.f32 0.5, %v3841_v35  ;;  %v7602_v45 = vld [vmem:[#allocation40_spill] sm:$0xff] }
 0x8ac   :  { %v2810_v53 = vmul.f32 %v3839_v49, %v2799_v22  ;;  %v7603_v22 = vld [vmem:[#allocation41_spill] sm:$0xff]  ;;  %v7604_v49 = vld [vmem:[#allocation42_spill] sm:$0xff] }
 0x8ad   :  { %v2809_v55 = vmul.f32 %v2803_v29, %v6136_v41  ;;  %v2808_v47 = vadd.f32 0.5, %v2807_v59  ;;  %v7566_v41 = vld [vmem:[#allocation18_spill] sm:$0xff] }
 0x8af   :  { %v6650_v9 = vadd.f32 %v2810_v53, %v2809_v55  ;;  %v7605_v55 = vld [vmem:[#allocation5_spill] sm:$0xff] }
 0x8b1   :  { %3842 = vtanh.f32 %v6650_v9 }
 0x8bb   :  { %v3843_v48 = vpop.eup %3842 }
 0x8bc   :  { %v2813_v21 = vmul.f32 %v3843_v48, %v2808_v47  ;;  %v7606_v48 = vld [vmem:[#allocation6_spill] sm:$0xff] }
 0x8be   :  { %v2814_v31 = vpack.c.bf16 %v2813_v21, %v2813_v21 }
 0x8c0   :  { %2849 = vmatmul.mubr.bf16.vlgmr.msra.gmra.mrb[84].mxu0 %v2814_v31  ;;  %2890 = vmatmul.mubr.bf16.vlgmr.msra.gmra.mrb[84].mxu1 %v2814_v31 }
 0x8c1   :  { %2925 = vmatpush1.bf16.msra.mxu0 %v5948_v11  ;;  %2966 = vmatpush1.bf16.msra.mxu1 %v5954_v56  ;;  %v7552_v11 = vld [vmem:[#allocation66_spill] sm:$0xff]  ;;  %v7553_v56 = vld [vmem:[#allocation67_spill] sm:$0xff] }
 0x8c2   :  { %2926 = vmatprep.subr.bf16.mxu0 %v5960_v50  ;;  %2967 = vmatprep.subr.bf16.mxu1 %v5966_v60  ;;  %v7554_v50 = vld [vmem:[#allocation68_spill] sm:$0xff]  ;;  %v7555_v60 = vld [vmem:[#allocation69_spill] sm:$0xff] }
 0x8c3   :  { %2956 = vmatprep.mubr.bf16.mxu0 %v7194_v23  ;;  %2997 = vmatprep.mubr.bf16.mxu1 %v7194_v23  ;;  %v7551_v23 = vld [vmem:[#allocation9_spill] sm:$0xff] }
 0x8c5   :  { %2927 = vmatpush1.bf16.msra.mxu0 %v5974_v61  ;;  %2968 = vmatpush1.bf16.msra.mxu1 %v5980_v19  ;;  %v7556_v61 = vld [vmem:[#allocation70_spill] sm:$0xff]  ;;  %v7557_v19 = vld [vmem:[#allocation71_spill] sm:$0xff] }
 0x8c6   :  { %2928 = vmatprep.subr.bf16.mxu0 %v5986_v40  ;;  %2969 = vmatprep.subr.bf16.mxu1 %v5992_v46  ;;  %v7558_v40 = vld [vmem:[#allocation72_spill] sm:$0xff]  ;;  %v7559_v46 = vld [vmem:[#allocation73_spill] sm:$0xff] }
 0x8c9   :  { %2929 = vmatpush1.bf16.msra.mxu0 %v5998_v57  ;;  %2970 = vmatpush1.bf16.msra.mxu1 %v6004_v18  ;;  %v7560_v57 = vld [vmem:[#allocation12_spill] sm:$0xff]  ;;  %v7561_v18 = vld [vmem:[#allocation13_spill] sm:$0xff] }
 0x8ca   :  { %2930 = vmatprep.subr.bf16.mxu0 %v6010_v12  ;;  %2971 = vmatprep.subr.bf16.mxu1 %v6016_v5  ;;  %v7562_v12 = vld [vmem:[#allocation14_spill] sm:$0xff]  ;;  %v7563_v5 = vld [vmem:[#allocation15_spill] sm:$0xff] }
 0x8cd   :  { %2931 = vmatpush1.bf16.msra.mxu0 %v6022_v51  ;;  %2972 = vmatpush1.bf16.msra.mxu1 %v6028_v54  ;;  %v7564_v51 = vld [vmem:[#allocation16_spill] sm:$0xff]  ;;  %v7565_v54 = vld [vmem:[#allocation17_spill] sm:$0xff] }
 0x8ce   :  { %2932 = vmatprep.subr.bf16.mxu0 %v6158_v63  ;;  %2973 = vmatprep.subr.bf16.mxu1 %v6164_v32  ;;  %v7567_v63 = vld [vmem:[#allocation19_spill] sm:$0xff]  ;;  %v7568_v32 = vld [vmem:[#allocation20_spill] sm:$0xff] }
 0x8d1   :  { %2933 = vmatpush1.bf16.msra.mxu0 %v6170_v39  ;;  %2974 = vmatpush1.bf16.msra.mxu1 %v6176_v30  ;;  %v7569_v39 = vld [vmem:[#allocation3_spill] sm:$0xff]  ;;  %v7570_v30 = vld [vmem:[#allocation4_spill] sm:$0xff] }
 0x8d2   :  { %2934 = vmatprep.subr.bf16.mxu0 %v6182_v17  ;;  %2975 = vmatprep.subr.bf16.mxu1 %v6188_v20  ;;  %v7571_v17 = vld [vmem:[#allocation61_spill] sm:$0xff]  ;;  %v7572_v20 = vld [vmem:[#allocation62_spill] sm:$0xff] }
 0x8d5   :  { %2935 = vmatpush1.bf16.msra.mxu0 %v6194_v42  ;;  %2976 = vmatpush1.bf16.msra.mxu1 %v6200_v25  ;;  %v7573_v42 = vld [vmem:[#allocation63_spill] sm:$0xff]  ;;  %v7574_v25 = vld [vmem:[#allocation10_spill] sm:$0xff] }
 0x8d6   :  { %2936 = vmatprep.subr.bf16.mxu0 %v6206_v16  ;;  %2977 = vmatprep.subr.bf16.mxu1 %v6212_v26  ;;  %v7575_v16 = vld [vmem:[#allocation11_spill] sm:$0xff] }
 0x8d7   :  { %v7576_v26 = vld [vmem:[#allocation59_spill] sm:$0xff] }
 0x8d9   :  { %2937 = vmatpush1.bf16.msra.mxu0 %v6218_v24  ;;  %2978 = vmatpush1.bf16.msra.mxu1 %v6224_v34  ;;  %v7577_v24 = vld [vmem:[#allocation74_spill] sm:$0xff]  ;;  %v7578_v34 = vld [vmem:[#allocation75_spill] sm:$0xff] }
 0x8da   :  { %2938 = vmatprep.subr.bf16.mxu0 %v6230_v27  ;;  %2979 = vmatprep.subr.bf16.mxu1 %v6236_v28  ;;  %v7579_v27 = vld [vmem:[#allocation76_spill] sm:$0xff]  ;;  %v7580_v28 = vld [vmem:[#allocation77_spill] sm:$0xff] }
 0x8dd   :  { %2939 = vmatpush1.bf16.msra.mxu0 %v6242_v36  ;;  %2980 = vmatpush1.bf16.msra.mxu1 %v6248_v33  ;;  %v7581_v36 = vld [vmem:[#allocation64_spill] sm:$0xff]  ;;  %v7582_v33 = vld [vmem:[#allocation65_spill] sm:$0xff] }
 0x8de   :  { %3030 = vmatprep.subr.bf16.mxu0 %v6254_v7  ;;  %3071 = vmatprep.subr.bf16.mxu1 %v6260_v62  ;;  %v7583_v7 = vld [vmem:[#allocation21_spill] sm:$0xff]  ;;  %v7584_v62 = vld [vmem:[#allocation22_spill] sm:$0xff] }
 0x8e0   :  { %2957 = vmatmul.mubr.bf16.vlgmr.msra.gmra.mrb[88].mxu0 %v2814_v31  ;;  %2998 = vmatmul.mubr.bf16.vlgmr.msra.gmra.mrb[88].mxu1 %v2814_v31 }
 0x8e1   :  { %3031 = vmatpush1.bf16.msra.mxu0 %v6266_v8  ;;  %3072 = vmatpush1.bf16.msra.mxu1 %v6272_v3  ;;  %v7585_v8 = vld [vmem:[#allocation23_spill] sm:$0xff]  ;;  %v7586_v3 = vld [vmem:[#allocation24_spill] sm:$0xff] }
 0x8e2   :  { %3032 = vmatprep.subr.bf16.mxu0 %v6278_v58  ;;  %3073 = vmatprep.subr.bf16.mxu1 %v6284_v4  ;;  %v7587_v58 = vld [vmem:[#allocation25_spill] sm:$0xff]  ;;  %v7588_v4 = vld [vmem:[#allocation26_spill] sm:$0xff] }
 0x8e5   :  { %3033 = vmatpush1.bf16.msra.mxu0 %v6290_v37  ;;  %3074 = vmatpush1.bf16.msra.mxu1 %v6296_v38  ;;  %v7589_v37 = vld [vmem:[#allocation27_spill] sm:$0xff]  ;;  %v7590_v38 = vld [vmem:[#allocation28_spill] sm:$0xff] }
 0x8e6   :  { %3034 = vmatprep.subr.bf16.mxu0 %v6302_v43  ;;  %3075 = vmatprep.subr.bf16.mxu1 %v6308_v44  ;;  %v7591_v43 = vld [vmem:[#allocation29_spill] sm:$0xff]  ;;  %v7592_v44 = vld [vmem:[#allocation30_spill] sm:$0xff] }
 0x8e9   :  { %3035 = vmatpush1.bf16.msra.mxu0 %v7551_v23  ;;  %3076 = vmatpush1.bf16.msra.mxu1 %v7552_v11 }
 0x8ea   :  { %3036 = vmatprep.subr.bf16.mxu0 %v7553_v56  ;;  %3077 = vmatprep.subr.bf16.mxu1 %v7554_v50 }
 0x8ed   :  { %3037 = vmatpush1.bf16.msra.mxu0 %v7555_v60  ;;  %3078 = vmatpush1.bf16.msra.mxu1 %v7556_v61  ;;  %v7607_v61 = vld [vmem:[#allocation7_spill] sm:$0xff] }
 0x8ee   :  { %3038 = vmatprep.subr.bf16.mxu0 %v7557_v19  ;;  %3079 = vmatprep.subr.bf16.mxu1 %v7558_v40  ;;  %v7608_v40 = vld [vmem:[#allocation8_spill] sm:$0xff] }
 0x8f1   :  { %3039 = vmatpush1.bf16.msra.mxu0 %v7559_v46  ;;  %3080 = vmatpush1.bf16.msra.mxu1 %v7560_v57 }
 0x8f2   :  { %3040 = vmatprep.subr.bf16.mxu0 %v7561_v18  ;;  %3081 = vmatprep.subr.bf16.mxu1 %v7562_v12 }
 0x8f5   :  { %3041 = vmatpush1.bf16.msra.mxu0 %v7563_v5  ;;  %3082 = vmatpush1.bf16.msra.mxu1 %v7564_v51 }
 0x8f6   :  { %3042 = vmatprep.subr.bf16.mxu0 %v7565_v54  ;;  %3083 = vmatprep.subr.bf16.mxu1 %v7566_v41 }
 0x8f9   :  { %3043 = vmatpush1.bf16.msra.mxu0 %v7567_v63  ;;  %3084 = vmatpush1.bf16.msra.mxu1 %v7568_v32 }
 0x8fa   :  { %3044 = vmatprep.subr.bf16.mxu0 %v7569_v39  ;;  %3085 = vmatprep.subr.bf16.mxu1 %v7570_v30  ;;  %v7609_v39 = vld [vmem:[#allocation43_spill] sm:$0xff] }
 0x8fd   :  { %3045 = vmatpush1.bf16.msra.mxu0 %v7571_v17  ;;  %3086 = vmatpush1.bf16.msra.mxu1 %v7572_v20 }
 0x8fe   :  { %3046 = vmatprep.subr.bf16.mxu0 %v7573_v42  ;;  %3087 = vmatprep.subr.bf16.mxu1 %v7574_v25 }
 0x901   :  { %3047 = vmatpush1.bf16.msra.mxu0 %v7575_v16  ;;  %3088 = vmatpush1.bf16.msra.mxu1 %v7576_v26  ;;  %v7610_v26 = vld [vmem:[#allocation86_spill] sm:$0xff] }
 0x902   :  { %3048 = vmatprep.subr.bf16.mxu0 %v7577_v24  ;;  %3089 = vmatprep.subr.bf16.mxu1 %v7578_v34  ;;  %v7611_v34 = vld [vmem:[#allocation87_spill] sm:$0xff] }
 0x905   :  { %3049 = vmatpush1.bf16.msra.mxu0 %v7579_v27  ;;  %3090 = vmatpush1.bf16.msra.mxu1 %v7580_v28 }
 0x906   :  { %3050 = vmatprep.subr.bf16.mxu0 %v7581_v36  ;;  %3091 = vmatprep.subr.bf16.mxu1 %v7582_v33 }
 0x909   :  { %3051 = vmatpush1.bf16.msra.mxu0 %v7583_v7  ;;  %3092 = vmatpush1.bf16.msra.mxu1 %v7584_v62  ;;  %v7612_v7 = vld [vmem:[#allocation88_spill] sm:$0xff] }
 0x90a   :  { %3052 = vmatprep.subr.bf16.mxu0 %v7585_v8  ;;  %3093 = vmatprep.subr.bf16.mxu1 %v7586_v3  ;;  %v7613_v8 = vld [vmem:[#allocation89_spill] sm:$0xff] }
 0x90d   :  { %3053 = vmatpush1.bf16.msra.mxu0 %v7587_v58  ;;  %3094 = vmatpush1.bf16.msra.mxu1 %v7588_v4 }
 0x90e   :  { %3054 = vmatprep.subr.bf16.mxu0 %v7589_v37  ;;  %3095 = vmatprep.subr.bf16.mxu1 %v7590_v38 }
 0x911   :  { %3055 = vmatpush1.bf16.msra.mxu0 %v7591_v43  ;;  %3096 = vmatpush1.bf16.msra.mxu1 %v7592_v44 }
 0x912   :  { %3056 = vmatprep.subr.bf16.mxu0 %v7593_v13  ;;  %3097 = vmatprep.subr.bf16.mxu1 %v7594_v15 }
 0x915   :  { %3057 = vmatpush1.bf16.msra.mxu0 %v7595_v0  ;;  %3098 = vmatpush1.bf16.msra.mxu1 %v7596_v52 }
 0x916   :  { %3058 = vmatprep.subr.bf16.mxu0 %v7597_v14  ;;  %3099 = vmatprep.subr.bf16.mxu1 %v7598_v1 }
 0x919   :  { %3059 = vmatpush1.bf16.msra.mxu0 %v7599_v10  ;;  %3100 = vmatpush1.bf16.msra.mxu1 %v7600_v6 }
 0x91a   :  { %3060 = vmatprep.subr.bf16.mxu0 %v7601_v2  ;;  %3101 = vmatprep.subr.bf16.mxu1 %v7602_v45 }
 0x91d   :  { %3061 = vmatpush1.bf16.msra.mxu0 %v7603_v22  ;;  %3102 = vmatpush1.bf16.msra.mxu1 %v7604_v49 }
 0x993   :  { %v2850_v29 = vpop.f32.mrb[84].mxu0  ;;  %v2891_v53 = vpop.f32.mrb[84].mxu1 }
 0x994   :  { %v2898_v35 = vadd.f32 %v2850_v29, %v7605_v55  ;;  %v2852_v59 = vpop.f32.mrb[85].mxu0  ;;  %v2893_v47 = vpop.f32.mrb[85].mxu1  ;;  %v2900_v19 = vadd.f32 %v2891_v53, %v7607_v61 }
 0x995   :  { %v2899_v21 = vadd.f32 %v2852_v59, %v7606_v48  ;;  %v2854_v31 = vpop.f32.mrb[86].mxu0  ;;  %v2895_v23 = vpop.f32.mrb[86].mxu1  ;;  %v2901_v46 = vadd.f32 %v2893_v47, %v7608_v40 }
 0x996   :  { %v2902_v11 = vmul.f32 0.5, %v2898_v35  ;;  %v2855_v56 = vpop.f32.mrb[87].mxu0  ;;  %v2896_v50 = vpop.f32.mrb[87].mxu1 }
 0x997   :  { %v2906_v60 = vmul.f32 0.5, %v2899_v21  ;;  %v2911_v57 = vmul.f32 0.5, %v2901_v46  ;;  %v4072_v56 = vmov 0.0   ;;  %v3708_v50 = vld [vmem:[%s6797_s1 + $0x540] ss:$16 sps:$4 sm:$0xff]  }
 0x998   :  { %3844 = vtanh.f32 %v2902_v11  ;;  %v3706_v11 = vld [vmem:[%s6797_s1 + $0x500] ss:$16 sps:$4 sm:$0xff]   ;;  %3438 = vmatprep.subr.bf16.mxu0 %v4072_v56 }
 0x999   :  { %3846 = vtanh.f32 %v2906_v60  ;;  %v3709_v60 = vld [vmem:[%s6797_s1 + $0x560] ss:$16 sps:$4 sm:$0xff]  }
 0x99a   :  { %3848 = vtanh.f32 %v2900_v19  ;;  %v3710_v19 = vld [vmem:[%s6797_s1 + $0x580] ss:$16 sps:$4 sm:$0xff]  }
 0x99b   :  { %3850 = vtanh.f32 %v2911_v57  ;;  %v3711_v46 = vld [vmem:[%s6797_s1 + $0x5a0] ss:$16 sps:$4 sm:$0xff]  }
 0x99c   :  { %v3712_v57 = vld [vmem:[%s6797_s1 + $0x5c0] ss:$16 sps:$4 sm:$0xff]  }
 0x9a2   :  { %v3845_v18 = vpop.eup %3844 }
 0x9a3   :  { %v3847_v12 = vpop.eup %3846  ;;  %v2904_v5 = vmul.f32 0.5, %v3845_v18  ;;  %v3713_v18 = vld [vmem:[%s6797_s1 + $0x5e0] ss:$16 sps:$4 sm:$0xff]  }
 0x9a4   :  { %v2908_v51 = vmul.f32 0.5, %v3847_v12  ;;  %v3849_v41 = vpop.eup %3848 }
 0x9a5   :  { %v2905_v54 = vadd.f32 0.5, %v2904_v5  ;;  %v3851_v20 = vpop.eup %3850 }
 0x9a6   :  { %v2909_v63 = vadd.f32 0.5, %v2908_v51  ;;  %v2913_v42 = vmul.f32 0.5, %v3851_v20 }
 0x9a7   :  { %v2916_v32 = vmul.f32 %v3849_v41, %v2905_v54 }
 0x9a8   :  { %v2915_v30 = vmul.f32 %v2909_v63, %v7609_v39  ;;  %v2914_v33 = vadd.f32 0.5, %v2913_v42 }
 0x9aa   :  { %v6754_v17 = vadd.f32 %v2916_v32, %v2915_v30 }
 0x9ac   :  { %3852 = vtanh.f32 %v6754_v17 }
 0x9b3   :  { %v2958_v25 = vpop.f32.mrb[88].mxu0  ;;  %v2999_v16 = vpop.f32.mrb[88].mxu1 }
 0x9b4   :  { %v3006_v24 = vadd.f32 %v2958_v25, %v7610_v26  ;;  %v3008_v27 = vadd.f32 %v2999_v16, %v7611_v34  ;;  %v2960_v28 = vpop.f32.mrb[89].mxu0  ;;  %v3001_v36 = vpop.f32.mrb[89].mxu1 }
 0x9b5   :  { %v3007_v62 = vadd.f32 %v2960_v28, %v7612_v7  ;;  %v3009_v3 = vadd.f32 %v3001_v36, %v7613_v8  ;;  %v2962_v58 = vpop.f32.mrb[90].mxu0  ;;  %v3003_v4 = vpop.f32.mrb[90].mxu1 }
 0x9b6   :  { %v3853_v37 = vpop.eup %3852  ;;  %v3010_v38 = vmul.f32 0.5, %v3006_v24  ;;  %v2963_v43 = vpop.f32.mrb[91].mxu0 }
 0x9b7   :  { %v3004_v44 = vpop.f32.mrb[91].mxu1  ;;  %v3014_v13 = vmul.f32 0.5, %v3007_v62  ;;  %v2919_v15 = vmul.f32 %v3853_v37, %v2914_v33  ;;  %v3019_v52 = vmul.f32 0.5, %v3009_v3 }
 0x9b8   :  { %3854 = vtanh.f32 %v3010_v38  ;;  %v3151_v38 = vld [vmem:[%s6799_s2 + $0x3] ss:$0 sm:$0xff] }
 0x9b9   :  { %3856 = vtanh.f32 %v3014_v13  ;;  %v3029_v0 = vpack.c.bf16 %v2919_v15, %v2919_v15 }
 0x9ba   :  { %3858 = vtanh.f32 %v3008_v27 }
 0x9bb   :  { %3062 = vmatprep.mubr.bf16.mxu0 %v3029_v0  ;;  %3103 = vmatprep.mubr.bf16.mxu1 %v3029_v0  ;;  %3860 = vtanh.f32 %v3019_v52 }
 0x9c2   :  { %v3855_v14 = vpop.eup %3854 }
 0x9c3   :  { %v3857_v1 = vpop.eup %3856  ;;  %v3012_v10 = vmul.f32 0.5, %v3855_v14 }
 0x9c4   :  { %v3016_v6 = vmul.f32 0.5, %v3857_v1  ;;  %v3859_v45 = vpop.eup %3858 }
 0x9c5   :  { %v3013_v2 = vadd.f32 0.5, %v3012_v10  ;;  %v3861_v35 = vpop.eup %3860 }
 0x9c6   :  { %v3017_v22 = vadd.f32 0.5, %v3016_v6  ;;  %v3021_v59 = vmul.f32 0.5, %v3861_v35 }
 0x9c7   :  { %v3024_v49 = vmul.f32 %v3859_v45, %v3013_v2 }
 0x9c8   :  { %v3023_v29 = vmul.f32 %v3017_v22, %v6650_v9  ;;  %v3022_v47 = vadd.f32 0.5, %v3021_v59  ;;  %v3707_v9 = vld [vmem:[%s6797_s1 + $0x520] ss:$16 sps:$4 sm:$0xff]  }
 0x9ca   :  { %v3025_v53 = vadd.f32 %v3024_v49, %v3023_v29 }
 0x9cc   :  { %3862 = vtanh.f32 %v3025_v53 }
 0x9d6   :  { %v3863_v21 = vpop.eup %3862 }
 0x9d7   :  { %v3027_v31 = vmul.f32 %v3863_v21, %v3022_v47 }
 0x9d9   :  { %v3028_v23 = vpack.c.bf16 %v3027_v31, %v3027_v31 }
 0x9db   :  { %3063 = vmatmul.mubr.bf16.vlgmr.msra.gmra.mrb[92].mxu0 %v3028_v23  ;;  %3104 = vmatmul.mubr.bf16.vlgmr.msra.gmra.mrb[92].mxu1 %v3028_v23 }
 0x9dc   :  { %3439 = vmatpush3.bf16.msra.mxu0 %v3706_v11  ;;  %3454 = vmatprep.mubr.msk.bf16.mxu0 %vm4073_vm0, %v4072_v56 }
 0x9dd   :  { %3440 = vmatprep.subr.bf16.mxu0 %v4072_v56 }
 0x9e0   :  { %3441 = vmatpush3.bf16.msra.mxu0 %v3707_v9 }
 0x9e1   :  { %3442 = vmatprep.subr.bf16.mxu0 %v4072_v56 }
 0x9e4   :  { %3443 = vmatpush3.bf16.msra.mxu0 %v3708_v50 }
 0x9e5   :  { %3444 = vmatprep.subr.bf16.mxu0 %v4072_v56 }
 0x9e8   :  { %3445 = vmatpush3.bf16.msra.mxu0 %v3709_v60 }
 0x9e9   :  { %3446 = vmatprep.subr.bf16.mxu0 %v4072_v56 }
 0x9ec   :  { %3447 = vmatpush3.bf16.msra.mxu0 %v3710_v19 }
 0x9ed   :  { %3448 = vmatprep.subr.bf16.mxu0 %v4072_v56 }
 0x9f0   :  { %3449 = vmatpush3.bf16.msra.mxu0 %v3711_v46 }
 0x9f1   :  { %3450 = vmatprep.subr.bf16.mxu0 %v4072_v56 }
 0x9f4   :  { %3451 = vmatpush3.bf16.msra.mxu0 %v3712_v57 }
 0x9f5   :  { %3452 = vmatprep.subr.bf16.mxu0 %v4072_v56 }
 0x9f8   :  { %3453 = vmatpush3.bf16.msra.mxu0 %v3713_v18 }
 0xaae   :  { %v3064_v12 = vpop.f32.mrb[92].mxu0  ;;  %v3105_v5 = vpop.f32.mrb[92].mxu1 }
 0xaaf   :  { %v3112_v51 = vadd.f32 %v3064_v12, %v7605_v55  ;;  %v3066_v54 = vpop.f32.mrb[93].mxu0  ;;  %v3107_v41 = vpop.f32.mrb[93].mxu1  ;;  %v3114_v16 = vadd.f32 %v3105_v5, %v7607_v61 }
 0xab0   :  { %v3113_v63 = vadd.f32 %v3066_v54, %v7606_v48  ;;  %v3068_v32 = vpop.f32.mrb[94].mxu0  ;;  %v3109_v39 = vpop.f32.mrb[94].mxu1  ;;  %v3115_v26 = vadd.f32 %v3107_v41, %v7608_v40 }
 0xab1   :  { %v3116_v30 = vmul.f32 0.5, %v3112_v51  ;;  %v3069_v20 = vpop.f32.mrb[95].mxu0  ;;  %v3110_v42 = vpop.f32.mrb[95].mxu1 }
 0xab2   :  { %v3120_v25 = vmul.f32 0.5, %v3113_v63  ;;  %v3125_v24 = vmul.f32 0.5, %v3115_v26 }
 0xab3   :  { %3864 = vtanh.f32 %v3116_v30 }
 0xab4   :  { %3866 = vtanh.f32 %v3120_v25 }
 0xab5   :  { %3868 = vtanh.f32 %v3114_v16 }
 0xab6   :  { %3870 = vtanh.f32 %v3125_v24 }
 0xabd   :  { %v3865_v34 = vpop.eup %3864 }
 0xabe   :  { %v3867_v55 = vpop.eup %3866  ;;  %v3118_v27 = vmul.f32 0.5, %v3865_v34 }
 0xabf   :  { %v3122_v28 = vmul.f32 0.5, %v3867_v55  ;;  %v3869_v36 = vpop.eup %3868 }
 0xac0   :  { %v3119_v48 = vadd.f32 0.5, %v3118_v27  ;;  %v3871_v3 = vpop.eup %3870 }
 0xac1   :  { %v3123_v33 = vadd.f32 0.5, %v3122_v28  ;;  %v3127_v61 = vmul.f32 0.5, %v3871_v3 }
 0xac2   :  { %v3130_v7 = vmul.f32 %v3869_v36, %v3119_v48 }
 0xac3   :  { %v3129_v62 = vmul.f32 %v3123_v33, %v6754_v17  ;;  %v3128_v58 = vadd.f32 0.5, %v3127_v61 }
 0xac5   :  { %v3131_v8 = vadd.f32 %v3130_v7, %v3129_v62 }
 0xac7   :  { %3872 = vtanh.f32 %v3131_v8 }
 0xad1   :  { %v3873_v4 = vpop.eup %3872 }
 0xad2   :  { %v3133_v37 = vmul.f32 %v3873_v4, %v3128_v58 }
 0xad4   :  { %v3134_v40 = vpack.c.bf16 %v3133_v37, %v3133_v37 }
 0xad6   :  { %3455 = vmatmul.mubr.bf16.vlgmr.msra.gmra.mrb[96].mxu0 %v3134_v40 }
 0xba9   :  { %v3234_v43 = vpop.f32.mrb[96].mxu0 }
 0xbaa   :  { %v3235_v44 = vadd.f32 %v3234_v43, %v3151_v38  ;;  %v3456_v13 = vpop.f32.mrb[97].mxu0 }
 0xbab   :  { %v3237_v15 = vpop.f32.mrb[98].mxu0 }
 0xbac   :  { %3240 = vmax.xlane.f32.xlu0 %v3235_v44  ;;  %v3457_v0 = vpop.f32.mrb[99].mxu0 }
 0xc39   :  { %v3241_v17 = vpop.xlane.xlu0 %3240 }
 0xc3a   :  { %v3242_v52 = vsub.f32 %v3235_v44, %v3241_v17 }
 0xc3c   :  { %v3243_v14 = vmul.f32 1.442695, %v3242_v52 }
 0xc3e   :  { %3874 = vpow2.f32 %v3243_v14 }
 0xc48   :  { %v3875_v1 = vpop.eup %3874 }
 0xc49   :  { %3245 = vadd.xlane.f32.xlu0 %v3875_v1 }
 0xcd6   :  { %v3246_v10 = vpop.xlane.xlu0 %3245 }
 0xcd7   :  { %3876 = vlog2.f32 %v3246_v10 }
 0xce1   :  { %v3877_v6 = vpop.eup %3876 }
 0xce2   :  { %v3248_v2 = vmul.f32 0.6931472, %v3877_v6 }
 0xce4   :  { %v3249_v45 = vsub.f32 %v3242_v52, %v3248_v2 }
 0xce6   :  { %3250 = vst [vmem:[%s6800_s3] sm:$0xff] %v3249_v45 }

</bundles_post_ra>
